<compile_context>
chip_gen: v6e
topology: v6e:2x2x1
jax: 0.10.0
libtpu: 0.0.40
codegen_flags: <defaults>
</compile_context>

<pallas_src>
import math
import functools

import jax
import jax.numpy as jnp
from jax import lax
from jax.experimental import pallas as pl
from jax.experimental.pallas import tpu as pltpu


def _fused_gt_kernel(x_ref, adj_ref, wq_ref, wk_ref, wv_ref, wo_ref,
                     bq_ref, bk_ref, bv_ref, bo_ref, gamma_ref, beta_ref,
                     out_ref, feat_ref,
                     *, n_heads: int, d_head: int, n_layers: int):
    """All n_layers of the graph-transformer stack, graph resident in VMEM."""
    N, H = x_ref.shape

    # ---- layer-invariant work (hoisted out of the layer loop) --------------
    adj = adj_ref[...].astype(jnp.float32)        # [N, N]  adj[dst, src] in {0,1}
    add_mask = (adj - 1.0) * 1e30                 # 0 on edges, -1e30 off-edges

    wq = wq_ref[...].astype(jnp.bfloat16)         # weights cast to bf16 once
    wk = wk_ref[...].astype(jnp.bfloat16)
    wv = wv_ref[...].astype(jnp.bfloat16)
    wo = wo_ref[...].astype(jnp.bfloat16)
    bq = bq_ref[...]
    bk = bk_ref[...]
    bv = bv_ref[...]
    bo = bo_ref[...]
    gamma = gamma_ref[...]
    beta = beta_ref[...]

    scale = 1.0 / math.sqrt(d_head)

    # Node features stay resident in VMEM for the whole stack.
    feat_ref[...] = x_ref[...].astype(jnp.float32)

    def layer_body(_, carry):
        x = feat_ref[...]                         # [N, H] fp32
        xb = x.astype(jnp.bfloat16)

        # Q / K / V projections: bf16 MXU matmuls, fp32 accumulation.
        q = jnp.dot(xb, wq, preferred_element_type=jnp.float32) + bq
        k = jnp.dot(xb, wk, preferred_element_type=jnp.float32) + bk
        v = jnp.dot(xb, wv, preferred_element_type=jnp.float32) + bv
        kT = k.T                                  # single XLU transpose / layer

        # Accumulate (attn_h @ V_h) @ W_o[h-rows] per head -> no concatenate.
        o = jnp.zeros((N, H), jnp.float32)
        for h in range(n_heads):                  # static unroll (small n_heads)
            lo = h * d_head
            qh = q[:, lo:lo + d_head].astype(jnp.bfloat16)     # [N, dh]
            khT = kT[lo:lo + d_head, :].astype(jnp.bfloat16)   # [dh, N]
            vh = v[:, lo:lo + d_head].astype(jnp.bfloat16)     # [N, dh]

            # scores[i, j]: attention of destination i over source j
            s = jnp.dot(qh, khT, preferred_element_type=jnp.float32) * scale
            s = s + add_mask                      # mask hoisted out of the loop
            m = jnp.max(s, axis=-1, keepdims=True)
            p = jnp.exp(s - m) * adj              # exact zeros off-edges
            denom = jnp.sum(p, axis=-1, keepdims=True)
            a = p * pl.reciprocal(denom + 1e-9, approx=True)   # EUP, not VALU

            hv = jnp.dot(a.astype(jnp.bfloat16), vh,
                         preferred_element_type=jnp.float32)   # [N, dh]
            o = o + jnp.dot(hv.astype(jnp.bfloat16), wo[lo:lo + d_head, :],
                            preferred_element_type=jnp.float32)

        o = o + bo

        # Residual + LayerNorm (fp32 statistics).
        h_res = x + o
        mu = jnp.mean(h_res, axis=-1, keepdims=True)
        var = jnp.mean((h_res - mu) ** 2, axis=-1, keepdims=True)
        normed = (h_res - mu) * lax.rsqrt(var + 1e-5)
        feat_ref[...] = normed * gamma + beta
        return carry

    lax.fori_loop(0, n_layers, layer_body, 0)

    out_ref[...] = feat_ref[...].astype(out_ref.dtype)


def multi_layer_hetero_gt(x, adj, params, *, n_heads, n_layers):
    """MultiLayerHeteroGT.forward — one fused pallas_call for all layers."""
    N, H = x.shape
    assert H % n_heads == 0, "hidden size must divide evenly into heads"
    d_head = H // n_heads

    kernel = functools.partial(_fused_gt_kernel, n_heads=n_heads,
                               d_head=d_head, n_layers=n_layers)

    vmem_spec = pl.BlockSpec(memory_space=pltpu.MemorySpace.VMEM)
    n_inputs = 12
    return pl.pallas_call(
        kernel,
        out_shape=jax.ShapeDtypeStruct((N, H), jnp.float32),
        in_specs=[vmem_spec] * n_inputs,
        out_specs=vmem_spec,
        scratch_shapes=[pltpu.VMEM((N, H), jnp.float32)],   # resident features
        compiler_params=pltpu.CompilerParams(
            vmem_limit_bytes=32 * 1024 * 1024),
    )(x, adj,
      params["wq"], params["wk"], params["wv"], params["wo"],
      params["bq"], params["bk"], params["bv"], params["bo"],
      params["gamma"], params["beta"])


def init_params(key, n_hidden):
    ks = jax.random.split(key, 4)
    scale = 1.0 / math.sqrt(n_hidden)
    return {
        "wq": jax.random.normal(ks[0], (n_hidden, n_hidden), jnp.float32) * scale,
        "wk": jax.random.normal(ks[1], (n_hidden, n_hidden), jnp.float32) * scale,
        "wv": jax.random.normal(ks[2], (n_hidden, n_hidden), jnp.float32) * scale,
        "wo": jax.random.normal(ks[3], (n_hidden, n_hidden), jnp.float32) * scale,
        "bq": jnp.zeros((1, n_hidden), jnp.float32),
        "bk": jnp.zeros((1, n_hidden), jnp.float32),
        "bv": jnp.zeros((1, n_hidden), jnp.float32),
        "bo": jnp.zeros((1, n_hidden), jnp.float32),
        "gamma": jnp.ones((1, n_hidden), jnp.float32),
        "beta": jnp.zeros((1, n_hidden), jnp.float32),
    }


def _ref_forward(x, adj, params, *, n_heads, n_layers):
    """Pure-JAX fp32 reference (same semantics, no bf16 / approx recip)."""
    N, H = x.shape
    dh = H // n_heads
    scale = 1.0 / math.sqrt(dh)
    feats = x
    for _ in range(n_layers):
        q = feats @ params["wq"] + params["bq"]
        k = feats @ params["wk"] + params["bk"]
        v = feats @ params["wv"] + params["bv"]
        heads = []
        for h in range(n_heads):
            lo = h * dh
            qh, kh, vh = q[:, lo:lo + dh], k[:, lo:lo + dh], v[:, lo:lo + dh]
            s = (qh @ kh.T) * scale
            s = jnp.where(adj > 0.0, s, -1e30)
            m = jnp.max(s, axis=-1, keepdims=True)
            p = jnp.exp(s - m) * adj
            a = p / (jnp.sum(p, axis=-1, keepdims=True) + 1e-9)
            heads.append(a @ vh)
        attn = jnp.concatenate(heads, axis=-1)
        o = attn @ params["wo"] + params["bo"]
        h_res = feats + o
        mu = jnp.mean(h_res, axis=-1, keepdims=True)
        var = jnp.mean((h_res - mu) ** 2, axis=-1, keepdims=True)
        feats = ((h_res - mu) * jax.lax.rsqrt(var + 1e-5)
                 * params["gamma"] + params["beta"])
    return feats


if __name__ == "__main__":
    # Small, deterministic, lane-dense example: 128 nodes, hidden=128, 4 heads, 3 layers.
    N, n_hidden, n_heads, n_layers = 128, 128, 4, 3

    key = jax.random.PRNGKey(0)
    k_x, k_adj, k_p = jax.random.split(key, 3)

    x = jax.random.normal(k_x, (N, n_hidden), jnp.float32)
    # Random sparse directed graph; adj[dst, src] = 1 if edge src -> dst.
    adj = (jax.random.uniform(k_adj, (N, N)) < 0.1).astype(jnp.float32)
    # Self-loops so every node has at least one in-edge.
    adj = jnp.maximum(adj, jnp.eye(N, dtype=jnp.float32))

    params = init_params(k_p, n_hidden)

    fwd = jax.jit(functools.partial(multi_layer_hetero_gt,
                                    n_heads=n_heads, n_layers=n_layers))
    out = fwd(x, adj, params)
    jax.block_until_ready(out)

    ref = _ref_forward(x, adj, params, n_heads=n_heads, n_layers=n_layers)

    assert out.shape == (N, n_hidden) and out.dtype == jnp.float32
    assert bool(jnp.all(jnp.isfinite(out)))
    # Loose tolerance: kernel uses bf16 MXU operands + approx reciprocal.
    max_err = float(jnp.max(jnp.abs(out - ref)))
    assert max_err < 0.5, f"kernel/reference mismatch: max abs err {max_err}"
    print("KERNEL_OK")
</pallas_src>

<mosaic_0001>
module attributes {stable_mosaic.version = 11 : i64} {
  func.func @_fused_gt_kernel(%arg0: memref<128x128xf32, #tpu.memory_space<vmem>>, %arg1: memref<128x128xf32, #tpu.memory_space<vmem>>, %arg2: memref<128x128xf32, #tpu.memory_space<vmem>>, %arg3: memref<128x128xf32, #tpu.memory_space<vmem>>, %arg4: memref<128x128xf32, #tpu.memory_space<vmem>>, %arg5: memref<128x128xf32, #tpu.memory_space<vmem>>, %arg6: memref<1x128xf32, #tpu.memory_space<vmem>>, %arg7: memref<1x128xf32, #tpu.memory_space<vmem>>, %arg8: memref<1x128xf32, #tpu.memory_space<vmem>>, %arg9: memref<1x128xf32, #tpu.memory_space<vmem>>, %arg10: memref<1x128xf32, #tpu.memory_space<vmem>>, %arg11: memref<1x128xf32, #tpu.memory_space<vmem>>, %arg12: memref<128x128xf32, #tpu.memory_space<vmem>>, %arg13: memref<128x128xf32, #tpu.memory_space<vmem>>) attributes {dimension_semantics = [], scalar_prefetch = 0 : i64, scratch_operands = 1 : i64, tpu.core_type = #tpu.core_type<tc>} {
    %c0 = arith.constant 0 : index
    %c0_0 = arith.constant 0 : index
    %0 = vector.load %arg1[%c0, %c0_0] : memref<128x128xf32, #tpu.memory_space<vmem>>, vector<128x128xf32>
    %cst = arith.constant 1.000000e+00 : f32
    %1 = vector.broadcast %cst : f32 to vector<128x128xf32>
    %2 = arith.subf %0, %1 : vector<128x128xf32>
    %cst_1 = arith.constant 1.000000e+30 : f32
    %3 = vector.broadcast %cst_1 : f32 to vector<128x128xf32>
    %4 = arith.mulf %2, %3 : vector<128x128xf32>
    %c0_2 = arith.constant 0 : index
    %c0_3 = arith.constant 0 : index
    %5 = vector.load %arg2[%c0_2, %c0_3] : memref<128x128xf32, #tpu.memory_space<vmem>>, vector<128x128xf32>
    %6 = arith.truncf %5 : vector<128x128xf32> to vector<128x128xbf16>
    %c0_4 = arith.constant 0 : index
    %c0_5 = arith.constant 0 : index
    %7 = vector.load %arg3[%c0_4, %c0_5] : memref<128x128xf32, #tpu.memory_space<vmem>>, vector<128x128xf32>
    %8 = arith.truncf %7 : vector<128x128xf32> to vector<128x128xbf16>
    %c0_6 = arith.constant 0 : index
    %c0_7 = arith.constant 0 : index
    %9 = vector.load %arg4[%c0_6, %c0_7] : memref<128x128xf32, #tpu.memory_space<vmem>>, vector<128x128xf32>
    %10 = arith.truncf %9 : vector<128x128xf32> to vector<128x128xbf16>
    %c0_8 = arith.constant 0 : index
    %c0_9 = arith.constant 0 : index
    %11 = vector.load %arg5[%c0_8, %c0_9] : memref<128x128xf32, #tpu.memory_space<vmem>>, vector<128x128xf32>
    %12 = arith.truncf %11 : vector<128x128xf32> to vector<128x128xbf16>
    %c0_10 = arith.constant 0 : index
    %c0_11 = arith.constant 0 : index
    %13 = vector.load %arg6[%c0_10, %c0_11] : memref<1x128xf32, #tpu.memory_space<vmem>>, vector<1x128xf32>
    %c0_12 = arith.constant 0 : index
    %c0_13 = arith.constant 0 : index
    %14 = vector.load %arg7[%c0_12, %c0_13] : memref<1x128xf32, #tpu.memory_space<vmem>>, vector<1x128xf32>
    %c0_14 = arith.constant 0 : index
    %c0_15 = arith.constant 0 : index
    %15 = vector.load %arg8[%c0_14, %c0_15] : memref<1x128xf32, #tpu.memory_space<vmem>>, vector<1x128xf32>
    %c0_16 = arith.constant 0 : index
    %c0_17 = arith.constant 0 : index
    %16 = vector.load %arg9[%c0_16, %c0_17] : memref<1x128xf32, #tpu.memory_space<vmem>>, vector<1x128xf32>
    %c0_18 = arith.constant 0 : index
    %c0_19 = arith.constant 0 : index
    %17 = vector.load %arg10[%c0_18, %c0_19] : memref<1x128xf32, #tpu.memory_space<vmem>>, vector<1x128xf32>
    %c0_20 = arith.constant 0 : index
    %c0_21 = arith.constant 0 : index
    %18 = vector.load %arg11[%c0_20, %c0_21] : memref<1x128xf32, #tpu.memory_space<vmem>>, vector<1x128xf32>
    %c0_22 = arith.constant 0 : index
    %c0_23 = arith.constant 0 : index
    %19 = vector.load %arg0[%c0_22, %c0_23] : memref<128x128xf32, #tpu.memory_space<vmem>>, vector<128x128xf32>
    %c0_24 = arith.constant 0 : index
    %c0_25 = arith.constant 0 : index
    %20 = vector.load %arg13[%c0_24, %c0_25] : memref<128x128xf32, #tpu.memory_space<vmem>>, vector<128x128xf32>
    tpu.vector_store %arg13[%c0_24, %c0_25], %19 {strides = array<i32>} : memref<128x128xf32, #tpu.memory_space<vmem>>, vector<128x128xf32>,
    %c0_i32 = arith.constant 0 : i32
    %c3_i32 = arith.constant 3 : i32
    %21 = arith.addi %c0_i32, %c3_i32 : i32
    %c1_i32 = arith.constant 1 : i32
    scf.for %arg14 = %c0_i32 to %21 step %c1_i32  : i32 {
      %c0_30 = arith.constant 0 : index
      %c0_31 = arith.constant 0 : index
      %24 = vector.load %arg13[%c0_30, %c0_31] : memref<128x128xf32, #tpu.memory_space<vmem>>, vector<128x128xf32>
      %25 = arith.truncf %24 : vector<128x128xf32> to vector<128x128xbf16>
      %cst_32 = arith.constant dense<0.000000e+00> : vector<128x128xf32>
      %26 = tpu.matmul %25, %6, %cst_32 {dimension_numbers = #tpu.dot_dimension_numbers<[1], [0], [0], [1], [0, 0, 1, 1], [], []>} : vector<128x128xbf16>, vector<128x128xbf16>, vector<128x128xf32> -> vector<128x128xf32>
      %27 = vector.broadcast %13 : vector<1x128xf32> to vector<128x128xf32>
      %28 = arith.addf %26, %27 : vector<128x128xf32>
      %cst_33 = arith.constant dense<0.000000e+00> : vector<128x128xf32>
      %29 = tpu.matmul %25, %8, %cst_33 {dimension_numbers = #tpu.dot_dimension_numbers<[1], [0], [0], [1], [0, 0, 1, 1], [], []>} : vector<128x128xbf16>, vector<128x128xbf16>, vector<128x128xf32> -> vector<128x128xf32>
      %30 = vector.broadcast %14 : vector<1x128xf32> to vector<128x128xf32>
      %31 = arith.addf %29, %30 : vector<128x128xf32>
      %cst_34 = arith.constant dense<0.000000e+00> : vector<128x128xf32>
      %32 = tpu.matmul %25, %10, %cst_34 {dimension_numbers = #tpu.dot_dimension_numbers<[1], [0], [0], [1], [0, 0, 1, 1], [], []>} : vector<128x128xbf16>, vector<128x128xbf16>, vector<128x128xf32> -> vector<128x128xf32>
      %33 = vector.broadcast %15 : vector<1x128xf32> to vector<128x128xf32>
      %34 = arith.addf %32, %33 : vector<128x128xf32>
      %35 = tpu.transpose %31, [1, 0] : vector<128x128xf32> -> vector<128x128xf32>
      %cst_35 = arith.constant 0.000000e+00 : f32
      %36 = vector.broadcast %cst_35 : f32 to vector<128x128xf32>
      %37 = vector.extract_strided_slice %28 {offsets = [0, 0], sizes = [128, 32], strides = [1, 1]} : vector<128x128xf32> to vector<128x32xf32>
      %38 = arith.truncf %37 : vector<128x32xf32> to vector<128x32xbf16>
      %39 = vector.extract_strided_slice %35 {offsets = [0, 0], sizes = [32, 128], strides = [1, 1]} : vector<128x128xf32> to vector<32x128xf32>
      %40 = arith.truncf %39 : vector<32x128xf32> to vector<32x128xbf16>
      %41 = vector.extract_strided_slice %34 {offsets = [0, 0], sizes = [128, 32], strides = [1, 1]} : vector<128x128xf32> to vector<128x32xf32>
      %42 = arith.truncf %41 : vector<128x32xf32> to vector<128x32xbf16>
      %cst_36 = arith.constant dense<0.000000e+00> : vector<128x128xf32>
      %43 = tpu.matmul %38, %40, %cst_36 {dimension_numbers = #tpu.dot_dimension_numbers<[1], [0], [0], [1], [0, 0, 1, 1], [], []>} : vector<128x32xbf16>, vector<32x128xbf16>, vector<128x128xf32> -> vector<128x128xf32>
      %cst_37 = arith.constant 0.176776692 : f32
      %44 = vector.broadcast %cst_37 : f32 to vector<128x128xf32>
      %45 = arith.mulf %43, %44 : vector<128x128xf32>
      %46 = arith.addf %45, %4 : vector<128x128xf32>
      %cst_38 = arith.constant dense<0xFF800000> : vector<128xf32>
      %47 = vector.multi_reduction <maximumf>, %46, %cst_38 [1] : vector<128x128xf32> to vector<128xf32>
      %48 = vector.shape_cast %47 : vector<128xf32> to vector<128x1xf32>
      %49 = vector.broadcast %48 : vector<128x1xf32> to vector<128x128xf32>
      %50 = arith.subf %46, %49 : vector<128x128xf32>
      %51 = math.exp %50 : vector<128x128xf32>
      %52 = arith.mulf %51, %0 : vector<128x128xf32>
      %cst_39 = arith.constant dense<0.000000e+00> : vector<128xf32>
      %53 = vector.multi_reduction <add>, %52, %cst_39 [1] : vector<128x128xf32> to vector<128xf32>
      %54 = vector.shape_cast %53 : vector<128xf32> to vector<128x1xf32>
      %cst_40 = arith.constant 9.99999971E-10 : f32
      %55 = vector.broadcast %cst_40 : f32 to vector<128x1xf32>
      %56 = arith.addf %54, %55 : vector<128x1xf32>
      %57 = tpu.reciprocal %56 {approx = true} : vector<128x1xf32> -> vector<128x1xf32>
      %58 = vector.broadcast %57 : vector<128x1xf32> to vector<128x128xf32>
      %59 = arith.mulf %52, %58 : vector<128x128xf32>
      %60 = arith.truncf %59 : vector<128x128xf32> to vector<128x128xbf16>
      %cst_41 = arith.constant dense<0.000000e+00> : vector<128x32xf32>
      %61 = tpu.matmul %60, %42, %cst_41 {dimension_numbers = #tpu.dot_dimension_numbers<[1], [0], [0], [1], [0, 0, 1, 1], [], []>} : vector<128x128xbf16>, vector<128x32xbf16>, vector<128x32xf32> -> vector<128x32xf32>
      %62 = arith.truncf %61 : vector<128x32xf32> to vector<128x32xbf16>
      %63 = vector.extract_strided_slice %12 {offsets = [0, 0], sizes = [32, 128], strides = [1, 1]} : vector<128x128xbf16> to vector<32x128xbf16>
      %cst_42 = arith.constant dense<0.000000e+00> : vector<128x128xf32>
      %64 = tpu.matmul %62, %63, %cst_42 {dimension_numbers = #tpu.dot_dimension_numbers<[1], [0], [0], [1], [0, 0, 1, 1], [], []>} : vector<128x32xbf16>, vector<32x128xbf16>, vector<128x128xf32> -> vector<128x128xf32>
      %65 = arith.addf %36, %64 : vector<128x128xf32>
      %66 = vector.extract_strided_slice %28 {offsets = [0, 32], sizes = [128, 32], strides = [1, 1]} : vector<128x128xf32> to vector<128x32xf32>
      %67 = arith.truncf %66 : vector<128x32xf32> to vector<128x32xbf16>
      %68 = vector.extract_strided_slice %35 {offsets = [32, 0], sizes = [32, 128], strides = [1, 1]} : vector<128x128xf32> to vector<32x128xf32>
      %69 = arith.truncf %68 : vector<32x128xf32> to vector<32x128xbf16>
      %70 = vector.extract_strided_slice %34 {offsets = [0, 32], sizes = [128, 32], strides = [1, 1]} : vector<128x128xf32> to vector<128x32xf32>
      %71 = arith.truncf %70 : vector<128x32xf32> to vector<128x32xbf16>
      %cst_43 = arith.constant dense<0.000000e+00> : vector<128x128xf32>
      %72 = tpu.matmul %67, %69, %cst_43 {dimension_numbers = #tpu.dot_dimension_numbers<[1], [0], [0], [1], [0, 0, 1, 1], [], []>} : vector<128x32xbf16>, vector<32x128xbf16>, vector<128x128xf32> -> vector<128x128xf32>
      %cst_44 = arith.constant 0.176776692 : f32
      %73 = vector.broadcast %cst_44 : f32 to vector<128x128xf32>
      %74 = arith.mulf %72, %73 : vector<128x128xf32>
      %75 = arith.addf %74, %4 : vector<128x128xf32>
      %cst_45 = arith.constant dense<0xFF800000> : vector<128xf32>
      %76 = vector.multi_reduction <maximumf>, %75, %cst_45 [1] : vector<128x128xf32> to vector<128xf32>
      %77 = vector.shape_cast %76 : vector<128xf32> to vector<128x1xf32>
      %78 = vector.broadcast %77 : vector<128x1xf32> to vector<128x128xf32>
      %79 = arith.subf %75, %78 : vector<128x128xf32>
      %80 = math.exp %79 : vector<128x128xf32>
      %81 = arith.mulf %80, %0 : vector<128x128xf32>
      %cst_46 = arith.constant dense<0.000000e+00> : vector<128xf32>
      %82 = vector.multi_reduction <add>, %81, %cst_46 [1] : vector<128x128xf32> to vector<128xf32>
      %83 = vector.shape_cast %82 : vector<128xf32> to vector<128x1xf32>
      %cst_47 = arith.constant 9.99999971E-10 : f32
      %84 = vector.broadcast %cst_47 : f32 to vector<128x1xf32>
      %85 = arith.addf %83, %84 : vector<128x1xf32>
      %86 = tpu.reciprocal %85 {approx = true} : vector<128x1xf32> -> vector<128x1xf32>
      %87 = vector.broadcast %86 : vector<128x1xf32> to vector<128x128xf32>
      %88 = arith.mulf %81, %87 : vector<128x128xf32>
      %89 = arith.truncf %88 : vector<128x128xf32> to vector<128x128xbf16>
      %cst_48 = arith.constant dense<0.000000e+00> : vector<128x32xf32>
      %90 = tpu.matmul %89, %71, %cst_48 {dimension_numbers = #tpu.dot_dimension_numbers<[1], [0], [0], [1], [0, 0, 1, 1], [], []>} : vector<128x128xbf16>, vector<128x32xbf16>, vector<128x32xf32> -> vector<128x32xf32>
      %91 = arith.truncf %90 : vector<128x32xf32> to vector<128x32xbf16>
      %92 = vector.extract_strided_slice %12 {offsets = [32, 0], sizes = [32, 128], strides = [1, 1]} : vector<128x128xbf16> to vector<32x128xbf16>
      %cst_49 = arith.constant dense<0.000000e+00> : vector<128x128xf32>
      %93 = tpu.matmul %91, %92, %cst_49 {dimension_numbers = #tpu.dot_dimension_numbers<[1], [0], [0], [1], [0, 0, 1, 1], [], []>} : vector<128x32xbf16>, vector<32x128xbf16>, vector<128x128xf32> -> vector<128x128xf32>
      %94 = arith.addf %65, %93 : vector<128x128xf32>
      %95 = vector.extract_strided_slice %28 {offsets = [0, 64], sizes = [128, 32], strides = [1, 1]} : vector<128x128xf32> to vector<128x32xf32>
      %96 = arith.truncf %95 : vector<128x32xf32> to vector<128x32xbf16>
      %97 = vector.extract_strided_slice %35 {offsets = [64, 0], sizes = [32, 128], strides = [1, 1]} : vector<128x128xf32> to vector<32x128xf32>
      %98 = arith.truncf %97 : vector<32x128xf32> to vector<32x128xbf16>
      %99 = vector.extract_strided_slice %34 {offsets = [0, 64], sizes = [128, 32], strides = [1, 1]} : vector<128x128xf32> to vector<128x32xf32>
      %100 = arith.truncf %99 : vector<128x32xf32> to vector<128x32xbf16>
      %cst_50 = arith.constant dense<0.000000e+00> : vector<128x128xf32>
      %101 = tpu.matmul %96, %98, %cst_50 {dimension_numbers = #tpu.dot_dimension_numbers<[1], [0], [0], [1], [0, 0, 1, 1], [], []>} : vector<128x32xbf16>, vector<32x128xbf16>, vector<128x128xf32> -> vector<128x128xf32>
      %cst_51 = arith.constant 0.176776692 : f32
      %102 = vector.broadcast %cst_51 : f32 to vector<128x128xf32>
      %103 = arith.mulf %101, %102 : vector<128x128xf32>
      %104 = arith.addf %103, %4 : vector<128x128xf32>
      %cst_52 = arith.constant dense<0xFF800000> : vector<128xf32>
      %105 = vector.multi_reduction <maximumf>, %104, %cst_52 [1] : vector<128x128xf32> to vector<128xf32>
      %106 = vector.shape_cast %105 : vector<128xf32> to vector<128x1xf32>
      %107 = vector.broadcast %106 : vector<128x1xf32> to vector<128x128xf32>
      %108 = arith.subf %104, %107 : vector<128x128xf32>
      %109 = math.exp %108 : vector<128x128xf32>
      %110 = arith.mulf %109, %0 : vector<128x128xf32>
      %cst_53 = arith.constant dense<0.000000e+00> : vector<128xf32>
      %111 = vector.multi_reduction <add>, %110, %cst_53 [1] : vector<128x128xf32> to vector<128xf32>
      %112 = vector.shape_cast %111 : vector<128xf32> to vector<128x1xf32>
      %cst_54 = arith.constant 9.99999971E-10 : f32
      %113 = vector.broadcast %cst_54 : f32 to vector<128x1xf32>
      %114 = arith.addf %112, %113 : vector<128x1xf32>
      %115 = tpu.reciprocal %114 {approx = true} : vector<128x1xf32> -> vector<128x1xf32>
      %116 = vector.broadcast %115 : vector<128x1xf32> to vector<128x128xf32>
      %117 = arith.mulf %110, %116 : vector<128x128xf32>
      %118 = arith.truncf %117 : vector<128x128xf32> to vector<128x128xbf16>
      %cst_55 = arith.constant dense<0.000000e+00> : vector<128x32xf32>
      %119 = tpu.matmul %118, %100, %cst_55 {dimension_numbers = #tpu.dot_dimension_numbers<[1], [0], [0], [1], [0, 0, 1, 1], [], []>} : vector<128x128xbf16>, vector<128x32xbf16>, vector<128x32xf32> -> vector<128x32xf32>
      %120 = arith.truncf %119 : vector<128x32xf32> to vector<128x32xbf16>
      %121 = vector.extract_strided_slice %12 {offsets = [64, 0], sizes = [32, 128], strides = [1, 1]} : vector<128x128xbf16> to vector<32x128xbf16>
      %cst_56 = arith.constant dense<0.000000e+00> : vector<128x128xf32>
      %122 = tpu.matmul %120, %121, %cst_56 {dimension_numbers = #tpu.dot_dimension_numbers<[1], [0], [0], [1], [0, 0, 1, 1], [], []>} : vector<128x32xbf16>, vector<32x128xbf16>, vector<128x128xf32> -> vector<128x128xf32>
      %123 = arith.addf %94, %122 : vector<128x128xf32>
      %124 = vector.extract_strided_slice %28 {offsets = [0, 96], sizes = [128, 32], strides = [1, 1]} : vector<128x128xf32> to vector<128x32xf32>
      %125 = arith.truncf %124 : vector<128x32xf32> to vector<128x32xbf16>
      %126 = vector.extract_strided_slice %35 {offsets = [96, 0], sizes = [32, 128], strides = [1, 1]} : vector<128x128xf32> to vector<32x128xf32>
      %127 = arith.truncf %126 : vector<32x128xf32> to vector<32x128xbf16>
      %128 = vector.extract_strided_slice %34 {offsets = [0, 96], sizes = [128, 32], strides = [1, 1]} : vector<128x128xf32> to vector<128x32xf32>
      %129 = arith.truncf %128 : vector<128x32xf32> to vector<128x32xbf16>
      %cst_57 = arith.constant dense<0.000000e+00> : vector<128x128xf32>
      %130 = tpu.matmul %125, %127, %cst_57 {dimension_numbers = #tpu.dot_dimension_numbers<[1], [0], [0], [1], [0, 0, 1, 1], [], []>} : vector<128x32xbf16>, vector<32x128xbf16>, vector<128x128xf32> -> vector<128x128xf32>
      %cst_58 = arith.constant 0.176776692 : f32
      %131 = vector.broadcast %cst_58 : f32 to vector<128x128xf32>
      %132 = arith.mulf %130, %131 : vector<128x128xf32>
      %133 = arith.addf %132, %4 : vector<128x128xf32>
      %cst_59 = arith.constant dense<0xFF800000> : vector<128xf32>
      %134 = vector.multi_reduction <maximumf>, %133, %cst_59 [1] : vector<128x128xf32> to vector<128xf32>
      %135 = vector.shape_cast %134 : vector<128xf32> to vector<128x1xf32>
      %136 = vector.broadcast %135 : vector<128x1xf32> to vector<128x128xf32>
      %137 = arith.subf %133, %136 : vector<128x128xf32>
      %138 = math.exp %137 : vector<128x128xf32>
      %139 = arith.mulf %138, %0 : vector<128x128xf32>
      %cst_60 = arith.constant dense<0.000000e+00> : vector<128xf32>
      %140 = vector.multi_reduction <add>, %139, %cst_60 [1] : vector<128x128xf32> to vector<128xf32>
      %141 = vector.shape_cast %140 : vector<128xf32> to vector<128x1xf32>
      %cst_61 = arith.constant 9.99999971E-10 : f32
      %142 = vector.broadcast %cst_61 : f32 to vector<128x1xf32>
      %143 = arith.addf %141, %142 : vector<128x1xf32>
      %144 = tpu.reciprocal %143 {approx = true} : vector<128x1xf32> -> vector<128x1xf32>
      %145 = vector.broadcast %144 : vector<128x1xf32> to vector<128x128xf32>
      %146 = arith.mulf %139, %145 : vector<128x128xf32>
      %147 = arith.truncf %146 : vector<128x128xf32> to vector<128x128xbf16>
      %cst_62 = arith.constant dense<0.000000e+00> : vector<128x32xf32>
      %148 = tpu.matmul %147, %129, %cst_62 {dimension_numbers = #tpu.dot_dimension_numbers<[1], [0], [0], [1], [0, 0, 1, 1], [], []>} : vector<128x128xbf16>, vector<128x32xbf16>, vector<128x32xf32> -> vector<128x32xf32>
      %149 = arith.truncf %148 : vector<128x32xf32> to vector<128x32xbf16>
      %150 = vector.extract_strided_slice %12 {offsets = [96, 0], sizes = [32, 128], strides = [1, 1]} : vector<128x128xbf16> to vector<32x128xbf16>
      %cst_63 = arith.constant dense<0.000000e+00> : vector<128x128xf32>
      %151 = tpu.matmul %149, %150, %cst_63 {dimension_numbers = #tpu.dot_dimension_numbers<[1], [0], [0], [1], [0, 0, 1, 1], [], []>} : vector<128x32xbf16>, vector<32x128xbf16>, vector<128x128xf32> -> vector<128x128xf32>
      %152 = arith.addf %123, %151 : vector<128x128xf32>
      %153 = vector.broadcast %16 : vector<1x128xf32> to vector<128x128xf32>
      %154 = arith.addf %152, %153 : vector<128x128xf32>
      %155 = arith.addf %24, %154 : vector<128x128xf32>
      %cst_64 = arith.constant dense<0.000000e+00> : vector<128xf32>
      %156 = vector.multi_reduction <add>, %155, %cst_64 [1] : vector<128x128xf32> to vector<128xf32>
      %157 = vector.shape_cast %156 : vector<128xf32> to vector<128x1xf32>
      %cst_65 = arith.constant 1.280000e+02 : f32
      %158 = vector.broadcast %cst_65 : f32 to vector<128x1xf32>
      %159 = arith.divf %157, %158 : vector<128x1xf32>
      %160 = vector.broadcast %159 : vector<128x1xf32> to vector<128x128xf32>
      %161 = arith.subf %155, %160 : vector<128x128xf32>
      %162 = arith.mulf %161, %161 : vector<128x128xf32>
      %cst_66 = arith.constant dense<0.000000e+00> : vector<128xf32>
      %163 = vector.multi_reduction <add>, %162, %cst_66 [1] : vector<128x128xf32> to vector<128xf32>
      %164 = vector.shape_cast %163 : vector<128xf32> to vector<128x1xf32>
      %cst_67 = arith.constant 1.280000e+02 : f32
      %165 = vector.broadcast %cst_67 : f32 to vector<128x1xf32>
      %166 = arith.divf %164, %165 : vector<128x1xf32>
      %167 = vector.broadcast %159 : vector<128x1xf32> to vector<128x128xf32>
      %168 = arith.subf %155, %167 : vector<128x128xf32>
      %cst_68 = arith.constant 9.99999974E-6 : f32
      %169 = vector.broadcast %cst_68 : f32 to vector<128x1xf32>
      %170 = arith.addf %166, %169 : vector<128x1xf32>
      %171 = math.rsqrt %170 : vector<128x1xf32>
      %172 = vector.broadcast %171 : vector<128x1xf32> to vector<128x128xf32>
      %173 = arith.mulf %168, %172 : vector<128x128xf32>
      %174 = vector.broadcast %17 : vector<1x128xf32> to vector<128x128xf32>
      %175 = arith.mulf %173, %174 : vector<128x128xf32>
      %176 = vector.broadcast %18 : vector<1x128xf32> to vector<128x128xf32>
      %177 = arith.addf %175, %176 : vector<128x128xf32>
      %c0_69 = arith.constant 0 : index
      %c0_70 = arith.constant 0 : index
      %178 = vector.load %arg13[%c0_69, %c0_70] : memref<128x128xf32, #tpu.memory_space<vmem>>, vector<128x128xf32>
      tpu.vector_store %arg13[%c0_69, %c0_70], %177 {strides = array<i32>} : memref<128x128xf32, #tpu.memory_space<vmem>>, vector<128x128xf32>,
    }
    %c0_26 = arith.constant 0 : index
    %c0_27 = arith.constant 0 : index
    %22 = vector.load %arg13[%c0_26, %c0_27] : memref<128x128xf32, #tpu.memory_space<vmem>>, vector<128x128xf32>
    %c0_28 = arith.constant 0 : index
    %c0_29 = arith.constant 0 : index
    %23 = vector.load %arg12[%c0_28, %c0_29] : memref<128x128xf32, #tpu.memory_space<vmem>>, vector<128x128xf32>
    tpu.vector_store %arg12[%c0_28, %c0_29], %22 {strides = array<i32>} : memref<128x128xf32, #tpu.memory_space<vmem>>, vector<128x128xf32>,
    return
  }
}

</mosaic_0001>

<bundles_post_ra>
// kernel: multi_layer_hetero_gt.1
= control target key start
LH: loop header
LB: loop body
LE: loop exit
PB: predicated region body
PF: predicated region fallthrough
CT: control target
= control target key end

     0   :  { %17 = vsyncpa [#allocation4], 0  ;;  %s6325_s0 = inlined_call_operand.hbm [shape: f32[128,128], index: 0, kind: input, shape index: {}]   ;;  %s6326_s1 = inlined_call_operand.hbm [shape: f32[128,128], index: 1, kind: input, shape index: {}]   ;;  %s6327_s2 = inlined_call_operand.hbm [shape: f32[128,128], index: 2, kind: input, shape index: {}]   ;;  %s6328_s3 = inlined_call_operand.hbm [shape: f32[128,128], index: 3, kind: input, shape index: {}]   ;;  %s6329_s4 = inlined_call_operand.hbm [shape: f32[128,128], index: 4, kind: input, shape index: {}]   ;;  %s6330_s5 = inlined_call_operand.hbm [shape: f32[128,128], index: 5, kind: input, shape index: {}]   ;;  %s6331_s6 = inlined_call_operand.vmem [shape: f32[1,128], index: 6, kind: input, shape index: {}]   ;;  %s6332_s7 = inlined_call_operand.vmem [shape: f32[1,128], index: 7, kind: input, shape index: {}]   ;;  %s6333_s8 = inlined_call_operand.vmem [shape: f32[1,128], index: 8, kind: input, shape index: {}]   ;;  %s6334_s9 = inlined_call_operand.vmem [shape: f32[1,128], index: 9, kind: input, shape index: {}]   ;;  %s6335_s10 = inlined_call_operand.vmem [shape: f32[1,128], index: 10, kind: input, shape index: {}]   ;;  %s6336_s11 = inlined_call_operand.hbm [shape: f32[1,128], index: 11, kind: input, shape index: {}]   ;;  %s6337_s12 = inlined_call_operand.hbm [shape: f32[128,128], index: 12, kind: output, shape index: {}]  }
   0x1   :  { %18 = vsyncpa [#allocation7], 0 }
   0x2   :  { %19 = vsyncpa [#allocation10], 0 }
   0x3   :  { %20 = vsyncpa [#allocation13], 0 }
   0x4   :  { %21 = vsyncpa [#allocation5], 0  ;;  %s4647_s21 = smov [#allocation6]   ;;  %s4648_s23 = smov [#allocation9]  }
   0x5   :  { %s39_s22 = sshll.u32 %s4647_s21, 4  ;;  %s63_s24 = sshll.u32 %s4648_s23, 4  ;;  %s40_s22 = int_to_ptr.vmem [resolvable:$true] %s39_s22  ;;  %s64_s24 = int_to_ptr.vmem [resolvable:$true] %s63_s24 }
   0x6   :  { %s4477_s25 = scalar_lea.vmem %s40_s22, 2048  ;;  %p4482_p1 = scmp.lt.s32.totalorder %s40_s22, %s40_s22 }
   0x7   :  { %p4478_p0 = scmp.ne.s32.totalorder %s40_s22, %s4477_s25  ;;  %p4483_p2 = scmp.lt.s32.totalorder %s4477_s25, %s4477_s25 }
   0x9   :  { %p4484_p3 = por %p4483_p2, %p4482_p1 }
   0xb   :  { %p4485_p4 = pnand %p4484_p3, %p4478_p0 }
   0xd   :  { %4488 = shalt.err (!%p4485_p4)
}
   0xe   :  { %s4649_s26 = smov 128   ;;  %s4650_s27 = smov 8  }
   0xf   :  { %45 = dma.hbm_to_vmem [thread:$0]  %s6326_s1, 2048, %s40_s22, [#allocation7], %s4649_s26, %s4649_s26, %s4650_s27  }
  0x10   :  { %s4497_s30 = scalar_lea.vmem %s64_s24, 2048  ;;  %p4502_p6 = scmp.lt.s32.totalorder %s64_s24, %s64_s24 }
  0x11   :  { %p4498_p5 = scmp.ne.s32.totalorder %s64_s24, %s4497_s30  ;;  %p4503_p7 = scmp.lt.s32.totalorder %s4497_s30, %s4497_s30 }
  0x13   :  { %p4504_p8 = por %p4503_p7, %p4502_p6 }
  0x15   :  { %p4505_p9 = pnand %p4504_p8, %p4498_p5 }
  0x17   :  { %4508 = shalt.err (!%p4505_p9)
}
  0x18   :  { %69 = dma.hbm_to_vmem [thread:$0]  %s6328_s3, 2048, %s64_s24, [#allocation10], %s4649_s26, %s4649_s26, %s4650_s27  }
  0x19   :  { %s4651_s15 = smov [#allocation12]   ;;  %s4652_s17 = smov [#allocation3]  }
  0x1a   :  { %s87_s16 = sshll.u32 %s4651_s15, 4  ;;  %s27_s18 = sshll.u32 %s4652_s17, 4  ;;  %s88_s16 = int_to_ptr.vmem [resolvable:$true] %s87_s16  ;;  %s28_s18 = int_to_ptr.vmem [resolvable:$true] %s27_s18 }
  0x1b   :  { %s4517_s1 = scalar_lea.vmem %s88_s16, 2048  ;;  %p4522_p11 = scmp.lt.s32.totalorder %s88_s16, %s88_s16 }
  0x1c   :  { %p4518_p10 = scmp.ne.s32.totalorder %s88_s16, %s4517_s1  ;;  %p4523_p12 = scmp.lt.s32.totalorder %s4517_s1, %s4517_s1 }
  0x1e   :  { %p4524_p13 = por %p4523_p12, %p4522_p11 }
  0x20   :  { %p4525_p0 = pnand %p4524_p13, %p4518_p10 }
  0x22   :  { %4528 = shalt.err (!%p4525_p0)
}
  0x23   :  { %93 = dma.hbm_to_vmem [thread:$0]  %s6330_s5, 2048, %s88_s16, [#allocation13], %s4649_s26, %s4649_s26, %s4650_s27  }
  0x24   :  { %s4537_s3 = scalar_lea.vmem %s28_s18, 2048  ;;  %p4542_p2 = scmp.lt.s32.totalorder %s28_s18, %s28_s18 }
  0x25   :  { %p4538_p1 = scmp.ne.s32.totalorder %s28_s18, %s4537_s3  ;;  %p4543_p3 = scmp.lt.s32.totalorder %s4537_s3, %s4537_s3 }
  0x27   :  { %p4544_p4 = por %p4543_p3, %p4542_p2 }
  0x29   :  { %p4545_p5 = pnand %p4544_p4, %p4538_p1 }
  0x2b   :  { %4548 = shalt.err (!%p4545_p5)
}
  0x2c   :  { %33 = dma.hbm_to_vmem [thread:$0]  %s6325_s0, 2048, %s28_s18, [#allocation4], %s4649_s26, %s4649_s26, %s4650_s27  }
  0x2d   :  { %s4653_s23 = smov [#allocation8]   ;;  %s4654_s25 = smov [#allocation11]  }
  0x2e   :  { %s51_s24 = sshll.u32 %s4653_s23, 4  ;;  %s75_s28 = sshll.u32 %s4654_s25, 4  ;;  %s52_s24 = int_to_ptr.vmem [resolvable:$true] %s51_s24  ;;  %s76_s28 = int_to_ptr.vmem [resolvable:$true] %s75_s28 }
  0x2f   :  { %s4557_s5 = scalar_lea.vmem %s52_s24, 2048  ;;  %p4562_p7 = scmp.lt.s32.totalorder %s52_s24, %s52_s24 }
  0x30   :  { %p4558_p6 = scmp.ne.s32.totalorder %s52_s24, %s4557_s5  ;;  %p4563_p8 = scmp.lt.s32.totalorder %s4557_s5, %s4557_s5 }
  0x32   :  { %p4564_p9 = por %p4563_p8, %p4562_p7 }
  0x34   :  { %p4565_p10 = pnand %p4564_p9, %p4558_p6 }
  0x36   :  { %4568 = shalt.err (!%p4565_p10)
}
  0x37   :  { %57 = dma.hbm_to_vmem [thread:$0]  %s6327_s2, 2048, %s52_s24, [#allocation7], %s4649_s26, %s4649_s26, %s4650_s27  }
  0x38   :  { %s4577_s0 = scalar_lea.vmem %s76_s28, 2048  ;;  %p4582_p12 = scmp.lt.s32.totalorder %s76_s28, %s76_s28 }
  0x39   :  { %p4578_p11 = scmp.ne.s32.totalorder %s76_s28, %s4577_s0  ;;  %p4583_p13 = scmp.lt.s32.totalorder %s4577_s0, %s4577_s0 }
  0x3b   :  { %p4584_p0 = por %p4583_p13, %p4582_p12 }
  0x3d   :  { %p4585_p1 = pnand %p4584_p0, %p4578_p11 }
  0x3f   :  { %4588 = shalt.err (!%p4585_p1)
}
  0x40   :  { %81 = dma.hbm_to_vmem [thread:$0]  %s6329_s4, 2048, %s76_s28, [#allocation10], %s4649_s26, %s4649_s26, %s4650_s27  }
  0x41   :  { %s4655_s15 = smov [#allocation14]  }
  0x42   :  { %s110_s16 = sshll.u32 %s4655_s15, 4  ;;  %s111_s16 = int_to_ptr.vmem [resolvable:$true] %s110_s16 }
  0x43   :  { %s4597_s17 = scalar_lea.vmem %s111_s16, 16  ;;  %s4601_s2 = scalar_lea.vmem %s111_s16, 32 }
  0x44   :  { %p4598_p2 = scmp.ne.s32.totalorder %s111_s16, %s4597_s17  ;;  %p4602_p3 = scmp.lt.s32.totalorder %s111_s16, %s111_s16 }
  0x45   :  { %p4603_p4 = scmp.lt.s32.totalorder %s4601_s2, %s4597_s17 }
  0x47   :  { %p4604_p5 = por %p4603_p4, %p4602_p3 }
  0x49   :  { %p4605_p6 = pnand %p4604_p5, %p4598_p2 }
  0x4b   :  { %4608 = shalt.err (!%p4605_p6)
}
  0x4c   :  { %113 = dma.hbm_to_vmem [thread:$0]  %s6336_s11, 16, %s111_s16, [#allocation13]  }
  0x4d   :  { %4633 = dma.done.wait [#allocation4], 2048  }
  0x4e   :  { %4634 = vsyncadd [#allocation4], 4294965248 }
  0x4f   :  { %4635 = dma.done.wait [#allocation7], 4096  }
  0x50   :  { %4636 = vsyncadd [#allocation7], 4294963200 }
  0x51   :  { %4637 = dma.done.wait [#allocation10], 4096  }
  0x52   :  { %4638 = vsyncadd [#allocation10], 4294963200 }
  0x53   :  { %4639 = dma.done.wait [#allocation13], 2064  }
  0x54   :  { %4640 = vsyncadd [#allocation13], 4294965232  ;;  %v4764_v0 = vld [vmem:[#allocation6] sm:$0xff]  ;;  %v4766_v1 = vld [vmem:[#allocation6 + $0x8] sm:$0xff] }
  0x55   :  { %6484 = vst [vmem:[#allocation21_spill] sm:$0xff] %v4764_v0  ;;  %6485 = vst [vmem:[#allocation22_spill] sm:$0xff] %v4766_v1  ;;  %v4768_v2 = vld [vmem:[#allocation6 + $0x10] sm:$0xff]  ;;  %v4770_v3 = vld [vmem:[#allocation6 + $0x18] sm:$0xff]  ;;  %v3466_v6 = vadd.f32 -1.0, %v4764_v0  ;;  %v3467_v7 = vadd.f32 -1.0, %v4766_v1 }
  0x56   :  { %6486 = vst [vmem:[#allocation23_spill] sm:$0xff] %v4768_v2  ;;  %6487 = vst [vmem:[#allocation24_spill] sm:$0xff] %v4770_v3  ;;  %v4772_v4 = vld [vmem:[#allocation6 + $0x20] sm:$0xff]  ;;  %v4774_v5 = vld [vmem:[#allocation6 + $0x28] sm:$0xff]  ;;  %v3468_v11 = vadd.f32 -1.0, %v4768_v2  ;;  %v3469_v12 = vadd.f32 -1.0, %v4770_v3 }
  0x57   :  { %6488 = vst [vmem:[#allocation25_spill] sm:$0xff] %v4772_v4  ;;  %6489 = vst [vmem:[#allocation26_spill] sm:$0xff] %v4774_v5  ;;  %v4778_v8 = vld [vmem:[#allocation6 + $0x30] sm:$0xff]  ;;  %v4780_v9 = vld [vmem:[#allocation6 + $0x38] sm:$0xff]  ;;  %v3470_v13 = vadd.f32 -1.0, %v4772_v4  ;;  %v3471_v17 = vadd.f32 -1.0, %v4774_v5 }
  0x58   :  { %6490 = vst [vmem:[#allocation27_spill] sm:$0xff] %v4778_v8  ;;  %6491 = vst [vmem:[#allocation28_spill] sm:$0xff] %v4780_v9  ;;  %v4782_v10 = vld [vmem:[#allocation6 + $0x40] sm:$0xff]  ;;  %v4787_v14 = vld [vmem:[#allocation6 + $0x48] sm:$0xff]  ;;  %v3472_v18 = vadd.f32 -1.0, %v4778_v8  ;;  %v3473_v19 = vadd.f32 -1.0, %v4780_v9 }
  0x59   :  { %6492 = vst [vmem:[#allocation29_spill] sm:$0xff] %v4782_v10  ;;  %6493 = vst [vmem:[#allocation30_spill] sm:$0xff] %v4787_v14  ;;  %v4789_v15 = vld [vmem:[#allocation6 + $0x50] sm:$0xff]  ;;  %v4791_v16 = vld [vmem:[#allocation6 + $0x58] sm:$0xff]  ;;  %v3474_v23 = vadd.f32 -1.0, %v4782_v10  ;;  %v3475_v24 = vadd.f32 -1.0, %v4787_v14 }
  0x5a   :  { %6494 = vst [vmem:[#allocation31_spill] sm:$0xff] %v4789_v15  ;;  %6495 = vst [vmem:[#allocation32_spill] sm:$0xff] %v4791_v16  ;;  %v4796_v20 = vld [vmem:[#allocation6 + $0x60] sm:$0xff]  ;;  %v4798_v21 = vld [vmem:[#allocation6 + $0x68] sm:$0xff]  ;;  %v3476_v25 = vadd.f32 -1.0, %v4789_v15  ;;  %v3477_v27 = vadd.f32 -1.0, %v4791_v16 }
  0x5b   :  { %6496 = vst [vmem:[#allocation33_spill] sm:$0xff] %v4796_v20  ;;  %6497 = vst [vmem:[#allocation34_spill] sm:$0xff] %v4798_v21  ;;  %v4800_v22 = vld [vmem:[#allocation6 + $0x70] sm:$0xff]  ;;  %v4805_v26 = vld [vmem:[#allocation6 + $0x78] sm:$0xff]  ;;  %v3478_v28 = vadd.f32 -1.0, %v4796_v20  ;;  %v3479_v29 = vadd.f32 -1.0, %v4798_v21 }
  0x5c   :  { %6498 = vst [vmem:[#allocation35_spill] sm:$0xff] %v4800_v22  ;;  %6499 = vst [vmem:[#allocation36_spill] sm:$0xff] %v4805_v26  ;;  %v4810_v30 = vmul.f32 1e+30, %v3466_v6  ;;  %v3480_v31 = vadd.f32 -1.0, %v4800_v22  ;;  %v3481_v32 = vadd.f32 -1.0, %v4805_v26 }
  0x5d   :  { %v4814_v33 = vmul.f32 1e+30, %v3467_v7  ;;  %v4816_v34 = vmul.f32 1e+30, %v3468_v11  ;;  %v4818_v35 = vmul.f32 1e+30, %v3469_v12 }
  0x5e   :  { %6500 = vst [vmem:[#allocation37_spill] sm:$0xff] %v4810_v30  ;;  %v4820_v36 = vmul.f32 1e+30, %v3470_v13  ;;  %v4822_v37 = vmul.f32 1e+30, %v3471_v17  ;;  %v184_v38 = vld [vmem:[#allocation8] sm:$0xff] }
  0x5f   :  { %6501 = vst [vmem:[#allocation38_spill] sm:$0xff] %v4814_v33  ;;  %6502 = vst [vmem:[#allocation39_spill] sm:$0xff] %v4816_v34  ;;  %v4824_v39 = vmul.f32 1e+30, %v3472_v18  ;;  %v4826_v40 = vmul.f32 1e+30, %v3473_v19 }
  0x60   :  { %6503 = vst [vmem:[#allocation40_spill] sm:$0xff] %v4818_v35  ;;  %6504 = vst [vmem:[#allocation41_spill] sm:$0xff] %v4820_v36  ;;  %v4828_v41 = vmul.f32 1e+30, %v3474_v23  ;;  %v4830_v42 = vmul.f32 1e+30, %v3475_v24 }
  0x61   :  { %6505 = vst [vmem:[#allocation42_spill] sm:$0xff] %v4822_v37  ;;  %6506 = vst [vmem:[#allocation43_spill] sm:$0xff] %v4824_v39  ;;  %v4832_v43 = vmul.f32 1e+30, %v3476_v25  ;;  %v4834_v44 = vmul.f32 1e+30, %v3477_v27 }
  0x62   :  { %6507 = vst [vmem:[#allocation44_spill] sm:$0xff] %v4826_v40  ;;  %6508 = vst [vmem:[#allocation45_spill] sm:$0xff] %v4828_v41  ;;  %v4836_v45 = vmul.f32 1e+30, %v3478_v28  ;;  %v4838_v46 = vmul.f32 1e+30, %v3479_v29 }
  0x63   :  { %6509 = vst [vmem:[#allocation46_spill] sm:$0xff] %v4830_v42  ;;  %6510 = vst [vmem:[#allocation47_spill] sm:$0xff] %v4832_v43  ;;  %v4840_v47 = vmul.f32 1e+30, %v3480_v31  ;;  %v4842_v48 = vmul.f32 1e+30, %v3481_v32 }
  0x64   :  { %6511 = vst [vmem:[#allocation48_spill] sm:$0xff] %v4834_v44  ;;  %6512 = vst [vmem:[#allocation49_spill] sm:$0xff] %v4836_v45  ;;  %v185_v49 = vld [vmem:[#allocation8 + $0x8] sm:$0xff]  ;;  %v186_v50 = vld [vmem:[#allocation8 + $0x10] sm:$0xff] }
  0x65   :  { %6513 = vst [vmem:[#allocation50_spill] sm:$0xff] %v4838_v46  ;;  %6514 = vst [vmem:[#allocation51_spill] sm:$0xff] %v4840_v47  ;;  %v187_v51 = vld [vmem:[#allocation8 + $0x18] sm:$0xff]  ;;  %v188_v52 = vld [vmem:[#allocation8 + $0x20] sm:$0xff]  ;;  %v4844_v55 = vpack.c.bf16 %v185_v49, %v184_v38 }
  0x66   :  { %6515 = vst [vmem:[#allocation52_spill] sm:$0xff] %v4842_v48  ;;  %v189_v53 = vld [vmem:[#allocation8 + $0x28] sm:$0xff]  ;;  %v190_v54 = vld [vmem:[#allocation8 + $0x30] sm:$0xff]  ;;  %v4846_v56 = vpack.c.bf16 %v187_v51, %v186_v50  ;;  %v191_v57 = vld [vmem:[#allocation8 + $0x38] sm:$0xff] }
  0x67   :  { %6516 = vst [vmem:[#allocation53_spill] sm:$0xff] %v4844_v55  ;;  %v192_v58 = vld [vmem:[#allocation8 + $0x40] sm:$0xff]  ;;  %v193_v59 = vld [vmem:[#allocation8 + $0x48] sm:$0xff]  ;;  %v4848_v60 = vpack.c.bf16 %v189_v53, %v188_v52  ;;  %v194_v61 = vld [vmem:[#allocation8 + $0x50] sm:$0xff]  ;;  %v4850_v6 = vpack.c.bf16 %v191_v57, %v190_v54 }
  0x68   :  { %6517 = vst [vmem:[#allocation54_spill] sm:$0xff] %v4846_v56  ;;  %v195_v62 = vld [vmem:[#allocation8 + $0x58] sm:$0xff]  ;;  %v196_v63 = vld [vmem:[#allocation8 + $0x60] sm:$0xff]  ;;  %v4852_v7 = vpack.c.bf16 %v193_v59, %v192_v58  ;;  %v197_v11 = vld [vmem:[#allocation8 + $0x68] sm:$0xff] }
  0x69   :  { %6518 = vst [vmem:[#allocation55_spill] sm:$0xff] %v4848_v60  ;;  %6519 = vst [vmem:[#allocation56_spill] sm:$0xff] %v4850_v6  ;;  %v198_v12 = vld [vmem:[#allocation8 + $0x70] sm:$0xff]  ;;  %v199_v13 = vld [vmem:[#allocation8 + $0x78] sm:$0xff]  ;;  %v4854_v17 = vpack.c.bf16 %v195_v62, %v194_v61  ;;  %v4856_v18 = vpack.c.bf16 %v197_v11, %v196_v63 }
  0x6a   :  { %6520 = vst [vmem:[#allocation57_spill] sm:$0xff] %v4852_v7  ;;  %v4858_v19 = vpack.c.bf16 %v199_v13, %v198_v12  ;;  %v208_v23 = vld [vmem:[#allocation9] sm:$0xff]  ;;  %v209_v24 = vld [vmem:[#allocation9 + $0x8] sm:$0xff]  ;;  %v210_v25 = vld [vmem:[#allocation9 + $0x10] sm:$0xff] }
  0x6b   :  { %6521 = vst [vmem:[#allocation58_spill] sm:$0xff] %v4854_v17  ;;  %6522 = vst [vmem:[#allocation59_spill] sm:$0xff] %v4856_v18  ;;  %v211_v27 = vld [vmem:[#allocation9 + $0x18] sm:$0xff]  ;;  %v212_v28 = vld [vmem:[#allocation9 + $0x20] sm:$0xff]  ;;  %v4860_v31 = vpack.c.bf16 %v209_v24, %v208_v23 }
  0x6c   :  { %6523 = vst [vmem:[#allocation60_spill] sm:$0xff] %v4858_v19  ;;  %v213_v29 = vld [vmem:[#allocation9 + $0x28] sm:$0xff]  ;;  %v214_v32 = vld [vmem:[#allocation9 + $0x30] sm:$0xff]  ;;  %v215_v38 = vld [vmem:[#allocation9 + $0x38] sm:$0xff]  ;;  %v4862_v50 = vpack.c.bf16 %v211_v27, %v210_v25 }
  0x6d   :  { %6524 = vst [vmem:[#allocation61_spill] sm:$0xff] %v4860_v31  ;;  %v216_v49 = vld [vmem:[#allocation9 + $0x40] sm:$0xff]  ;;  %v4864_v51 = vpack.c.bf16 %v213_v29, %v212_v28  ;;  %v217_v52 = vld [vmem:[#allocation9 + $0x48] sm:$0xff]  ;;  %v218_v53 = vld [vmem:[#allocation9 + $0x50] sm:$0xff]  ;;  %v4866_v57 = vpack.c.bf16 %v215_v38, %v214_v32 }
  0x6e   :  { %6525 = vst [vmem:[#allocation62_spill] sm:$0xff] %v4862_v50  ;;  %v219_v54 = vld [vmem:[#allocation9 + $0x58] sm:$0xff]  ;;  %v220_v58 = vld [vmem:[#allocation9 + $0x60] sm:$0xff]  ;;  %v221_v59 = vld [vmem:[#allocation9 + $0x68] sm:$0xff]  ;;  %v4868_v62 = vpack.c.bf16 %v217_v52, %v216_v49 }
  0x6f   :  { %6526 = vst [vmem:[#allocation63_spill] sm:$0xff] %v4864_v51  ;;  %6527 = vst [vmem:[#allocation64_spill] sm:$0xff] %v4866_v57  ;;  %v222_v61 = vld [vmem:[#allocation9 + $0x70] sm:$0xff]  ;;  %v4870_v63 = vpack.c.bf16 %v219_v54, %v218_v53  ;;  %v223_v11 = vld [vmem:[#allocation9 + $0x78] sm:$0xff]  ;;  %v4872_v12 = vpack.c.bf16 %v221_v59, %v220_v58 }
  0x70   :  { %6528 = vst [vmem:[#allocation65_spill] sm:$0xff] %v4868_v62  ;;  %v232_v13 = vld [vmem:[#allocation11] sm:$0xff]  ;;  %v233_v23 = vld [vmem:[#allocation11 + $0x8] sm:$0xff]  ;;  %v4874_v24 = vpack.c.bf16 %v223_v11, %v222_v61  ;;  %v234_v25 = vld [vmem:[#allocation11 + $0x10] sm:$0xff] }
  0x71   :  { %6529 = vst [vmem:[#allocation66_spill] sm:$0xff] %v4870_v63  ;;  %6530 = vst [vmem:[#allocation67_spill] sm:$0xff] %v4872_v12  ;;  %v235_v27 = vld [vmem:[#allocation11 + $0x18] sm:$0xff]  ;;  %v236_v28 = vld [vmem:[#allocation11 + $0x20] sm:$0xff]  ;;  %v4876_v29 = vpack.c.bf16 %v233_v23, %v232_v13 }
  0x72   :  { %6531 = vst [vmem:[#allocation68_spill] sm:$0xff] %v4874_v24  ;;  %v237_v32 = vld [vmem:[#allocation11 + $0x28] sm:$0xff]  ;;  %v238_v38 = vld [vmem:[#allocation11 + $0x30] sm:$0xff]  ;;  %v239_v21 = vld [vmem:[#allocation11 + $0x38] sm:$0xff]  ;;  %v4878_v26 = vpack.c.bf16 %v235_v27, %v234_v25 }
  0x73   :  { %6532 = vst [vmem:[#allocation69_spill] sm:$0xff] %v4876_v29  ;;  %v240_v49 = vld [vmem:[#allocation11 + $0x40] sm:$0xff]  ;;  %v241_v52 = vld [vmem:[#allocation11 + $0x48] sm:$0xff]  ;;  %v242_v53 = vld [vmem:[#allocation11 + $0x50] sm:$0xff]  ;;  %v4880_v54 = vpack.c.bf16 %v237_v32, %v236_v28  ;;  %v4882_v58 = vpack.c.bf16 %v239_v21, %v238_v38 }
  0x74   :  { %6533 = vst [vmem:[#allocation70_spill] sm:$0xff] %v4878_v26  ;;  %v243_v59 = vld [vmem:[#allocation11 + $0x58] sm:$0xff]  ;;  %v244_v61 = vld [vmem:[#allocation11 + $0x60] sm:$0xff]  ;;  %v245_v11 = vld [vmem:[#allocation11 + $0x68] sm:$0xff]  ;;  %v4884_v20 = vpack.c.bf16 %v241_v52, %v240_v49 }
  0x75   :  { %6534 = vst [vmem:[#allocation71_spill] sm:$0xff] %v4880_v54  ;;  %6535 = vst [vmem:[#allocation72_spill] sm:$0xff] %v4882_v58  ;;  %v246_v22 = vld [vmem:[#allocation11 + $0x70] sm:$0xff]  ;;  %v247_v13 = vld [vmem:[#allocation11 + $0x78] sm:$0xff]  ;;  %v4886_v23 = vpack.c.bf16 %v243_v59, %v242_v53  ;;  %v4888_v14 = vpack.c.bf16 %v245_v11, %v244_v61 }
  0x76   :  { %6536 = vst [vmem:[#allocation73_spill] sm:$0xff] %v4884_v20  ;;  %v256_v25 = vld [vmem:[#allocation12] sm:$0xff]  ;;  %v4890_v27 = vpack.c.bf16 %v247_v13, %v246_v22  ;;  %v257_v16 = vld [vmem:[#allocation12 + $0x8] sm:$0xff]  ;;  %v258_v10 = vld [vmem:[#allocation12 + $0x10] sm:$0xff] }
  0x77   :  { %6537 = vst [vmem:[#allocation74_spill] sm:$0xff] %v4886_v23  ;;  %6538 = vst [vmem:[#allocation75_spill] sm:$0xff] %v4888_v14  ;;  %v259_v28 = vld [vmem:[#allocation12 + $0x18] sm:$0xff]  ;;  %v260_v32 = vld [vmem:[#allocation12 + $0x20] sm:$0xff]  ;;  %v4892_v15 = vpack.c.bf16 %v257_v16, %v256_v25 }
  0x78   :  { %6539 = vst [vmem:[#allocation76_spill] sm:$0xff] %v4890_v27  ;;  %v261_v21 = vld [vmem:[#allocation12 + $0x28] sm:$0xff]  ;;  %v262_v38 = vld [vmem:[#allocation12 + $0x30] sm:$0xff]  ;;  %v4894_v5 = vpack.c.bf16 %v259_v28, %v258_v10  ;;  %v263_v49 = vld [vmem:[#allocation12 + $0x38] sm:$0xff] }
  0x79   :  { %6540 = vst [vmem:[#allocation77_spill] sm:$0xff] %v4892_v15  ;;  %v264_v52 = vld [vmem:[#allocation12 + $0x40] sm:$0xff]  ;;  %v265_v9 = vld [vmem:[#allocation12 + $0x48] sm:$0xff]  ;;  %v4896_v53 = vpack.c.bf16 %v261_v21, %v260_v32  ;;  %v266_v59 = vld [vmem:[#allocation12 + $0x50] sm:$0xff]  ;;  %v4898_v22 = vpack.c.bf16 %v263_v49, %v262_v38 }
  0x7a   :  { %6541 = vst [vmem:[#allocation78_spill] sm:$0xff] %v4894_v5  ;;  %v267_v61 = vld [vmem:[#allocation12 + $0x58] sm:$0xff]  ;;  %v268_v11 = vld [vmem:[#allocation12 + $0x60] sm:$0xff]  ;;  %v4900_v13 = vpack.c.bf16 %v265_v9, %v264_v52  ;;  %v269_v4 = vld [vmem:[#allocation12 + $0x68] sm:$0xff] }
  0x7b   :  { %6542 = vst [vmem:[#allocation79_spill] sm:$0xff] %v4896_v53  ;;  %6543 = vst [vmem:[#allocation80_spill] sm:$0xff] %v4898_v22  ;;  %v270_v1 = vld [vmem:[#allocation12 + $0x70] sm:$0xff]  ;;  %v271_v8 = vld [vmem:[#allocation12 + $0x78] sm:$0xff]  ;;  %v4902_v3 = vpack.c.bf16 %v267_v61, %v266_v59  ;;  %v4904_v16 = vpack.c.bf16 %v269_v4, %v268_v11 }
  0x7c   :  { %6544 = vst [vmem:[#allocation81_spill] sm:$0xff] %v4900_v13  ;;  %v4906_v10 = vpack.c.bf16 %v271_v8, %v270_v1  ;;  %v4911_v25 = vld [vmem:[%s6331_s6] ss:$0 sm:$0xff]  ;;  %v287_v21 = vld [vmem:[#allocation3 + $0x8] sm:$0xff]  ;;  %v288_v38 = vld [vmem:[#allocation3 + $0x10] sm:$0xff]  ;;  %s4935_s6 = smov 0  }
  0x7d   :  { %6545 = vst [vmem:[#allocation82_spill] sm:$0xff] %v4902_v3  ;;  %6546 = vst [vmem:[#allocation83_spill] sm:$0xff] %v4904_v16  ;;  %v4916_v28 = vld [vmem:[%s6332_s7] ss:$0 sm:$0xff]  ;;  %v289_v49 = vld [vmem:[#allocation3 + $0x18] sm:$0xff] }
  0x7e   :  { %6547 = vst [vmem:[#allocation84_spill] sm:$0xff] %v4906_v10  ;;  %6548 = vst [vmem:[#allocation85_spill] sm:$0xff] %v4911_v25  ;;  %v4921_v9 = vld [vmem:[%s6333_s8] ss:$0 sm:$0xff]  ;;  %v291_v59 = vld [vmem:[#allocation3 + $0x28] sm:$0xff] }
  0x7f   :  { %6549 = vst [vmem:[#allocation86_spill] sm:$0xff] %v4916_v28  ;;  %6550 = vst [vmem:[#allocation87_spill] sm:$0xff] %v4921_v9  ;;  %v4926_v1 = vld [vmem:[%s6334_s9] ss:$0 sm:$0xff]  ;;  %v292_v61 = vld [vmem:[#allocation3 + $0x30] sm:$0xff] }
  0x80   :  { %6551 = vst [vmem:[#allocation88_spill] sm:$0xff] %v4926_v1  ;;  %v4931_v4 = vld [vmem:[%s6335_s10] ss:$0 sm:$0xff]  ;;  %303 = vst [vmem:[#allocation2] sm:$0xff] %v287_v21  ;;  %v293_v11 = vld [vmem:[#allocation3 + $0x38] sm:$0xff] }
  0x81   :  { %6552 = vst [vmem:[#allocation89_spill] sm:$0xff] %v4931_v4  ;;  %v4933_v8 = vld [vmem:[#allocation14] ss:$0 sm:$0xff]  ;;  %304 = vst [vmem:[#allocation2 + $0x58] sm:$0xff] %v288_v38  ;;  %v295_v4 = vld [vmem:[#allocation3 + $0x48] sm:$0xff] }
  0x82   :  { %6553 = vst [vmem:[#allocation90_spill] sm:$0xff] %v4933_v8  ;;  %v286_v32 = vld [vmem:[#allocation3] sm:$0xff]  ;;  %305 = vst [vmem:[#allocation2 + $0x18] sm:$0xff] %v289_v49  ;;  %v296_v8 = vld [vmem:[#allocation3 + $0x50] sm:$0xff] }
  0x83   :  { %302 = vst [vmem:[#allocation2 + $0x30] sm:$0xff] %v286_v32  ;;  %v290_v52 = vld [vmem:[#allocation3 + $0x20] sm:$0xff]  ;;  %307 = vst [vmem:[#allocation2 + $0x68] sm:$0xff] %v291_v59  ;;  %v297_v16 = vld [vmem:[#allocation3 + $0x58] sm:$0xff] }
  0x84   :  { %306 = vst [vmem:[#allocation2 + $0x50] sm:$0xff] %v290_v52  ;;  %v294_v1 = vld [vmem:[#allocation3 + $0x40] sm:$0xff]  ;;  %308 = vst [vmem:[#allocation2 + $0x8] sm:$0xff] %v292_v61  ;;  %v299_v21 = vld [vmem:[#allocation3 + $0x68] sm:$0xff] }
  0x85   :  { %309 = vst [vmem:[#allocation2 + $0x48] sm:$0xff] %v293_v11  ;;  %310 = vst [vmem:[#allocation2 + $0x40] sm:$0xff] %v294_v1  ;;  %v298_v32 = vld [vmem:[#allocation3 + $0x60] sm:$0xff]  ;;  %v300_v38 = vld [vmem:[#allocation3 + $0x70] sm:$0xff] }
  0x86   :  { %311 = vst [vmem:[#allocation2 + $0x20] sm:$0xff] %v295_v4  ;;  %312 = vst [vmem:[#allocation2 + $0x10] sm:$0xff] %v296_v8  ;;  %v301_v49 = vld [vmem:[#allocation3 + $0x78] sm:$0xff] }
  0x87   :  { %313 = vst [vmem:[#allocation2 + $0x38] sm:$0xff] %v297_v16  ;;  %314 = vst [vmem:[#allocation2 + $0x60] sm:$0xff] %v298_v32 }
  0x88   :  { %315 = vst [vmem:[#allocation2 + $0x70] sm:$0xff] %v299_v21  ;;  %316 = vst [vmem:[#allocation2 + $0x78] sm:$0xff] %v300_v38 }
  0x89   :  { %317 = vst [vmem:[#allocation2 + $0x28] sm:$0xff] %v301_v49 }
  0x8a LB: > { %v6554_v2 = vld [vmem:[#allocation23_spill] sm:$0xff]  ;;  %v6555_v0 = vld [vmem:[#allocation21_spill] sm:$0xff]  ;;  %v6557_v33 = vld [vmem:[#allocation38_spill] sm:$0xff]  ;;  %vm707_vm0 = vcmask 261120   ;;  %s4656_s7 = smov 96   ;;  %s4657_s8 = smov 64   ;;  %s4645_s6 = sphi %s4935_s6, %s323_s6  }
  0x8b   : > { %v6556_v30 = vld [vmem:[#allocation37_spill] sm:$0xff]  ;;  %v6558_v35 = vld [vmem:[#allocation40_spill] sm:$0xff]  ;;  %v6560_v37 = vld [vmem:[#allocation42_spill] sm:$0xff]  ;;  %s4658_s9 = smov 32   ;;  %s323_s6 = sadd.s32 1, %s4645_s6  }
  0x8c   : > { %v6559_v40 = vld [vmem:[#allocation44_spill] sm:$0xff]  ;;  %v6561_v46 = vld [vmem:[#allocation50_spill] sm:$0xff]  ;;  %v6564_v41 = vld [vmem:[#allocation45_spill] sm:$0xff]  ;;  %p320_p7 = scmp.ge.s32.totalorder %s323_s6, 3  }
  0x8d   : > { %v6562_v48 = vld [vmem:[#allocation52_spill] sm:$0xff]  ;;  %v6565_v42 = vld [vmem:[#allocation46_spill] sm:$0xff]  ;;  %v6566_v45 = vld [vmem:[#allocation49_spill] sm:$0xff]  ;;  %s4659_s10 = smov (%p320_p7), [#allocation15]  }
  0x8e   : > { %v6563_v44 = vld [vmem:[#allocation48_spill] sm:$0xff]  ;;  %v6567_v47 = vld [vmem:[#allocation51_spill] sm:$0xff]  ;;  %v6569_v36 = vld [vmem:[#allocation41_spill] sm:$0xff]  ;;  %s3446_s28 = sshll.u32 (%p320_p7), %s4659_s10, 4  ;;  %s3447_s28 = int_to_ptr.vmem [resolvable:$true] %s3446_s28 }
  0x8f   : > { %v6568_v43 = vld [vmem:[#allocation47_spill] sm:$0xff]  ;;  %v6572_v63 = vld [vmem:[#allocation66_spill] sm:$0xff]  ;;  %v6573_v62 = vld [vmem:[#allocation65_spill] sm:$0xff]  ;;  %s4609_s5 = scalar_lea.vmem (%p320_p7), %s3447_s28, 2048  ;;  %p4614_p9 = scmp.lt.s32.totalorder (%p320_p7), %s3447_s28, %s3447_s28 }
  0x90   : > { %v6570_v39 = vld [vmem:[#allocation43_spill] sm:$0xff]  ;;  %v6575_v58 = vld [vmem:[#allocation72_spill] sm:$0xff]  ;;  %v6577_v56 = vld [vmem:[#allocation54_spill] sm:$0xff]  ;;  %p4610_p8 = scmp.ne.s32.totalorder (%p320_p7), %s3447_s28, %s4609_s5  ;;  %p4615_p10 = scmp.lt.s32.totalorder (%p320_p7), %s4609_s5, %s4609_s5 }
  0x91   : > { %v6571_v34 = vld [vmem:[#allocation39_spill] sm:$0xff]  ;;  %v6576_v57 = vld [vmem:[#allocation64_spill] sm:$0xff]  ;;  %v6578_v55 = vld [vmem:[#allocation53_spill] sm:$0xff] }
  0x92   : > { %v6574_v60 = vld [vmem:[#allocation55_spill] sm:$0xff]  ;;  %v6582_v50 = vld [vmem:[#allocation62_spill] sm:$0xff]  ;;  %v6583_v31 = vld [vmem:[#allocation61_spill] sm:$0xff]  ;;  %p4616_p11 = por (%p320_p7), %p4615_p10, %p4614_p9 }
  0x93   : > { %v6579_v54 = vld [vmem:[#allocation71_spill] sm:$0xff]  ;;  %v6584_v29 = vld [vmem:[#allocation69_spill] sm:$0xff]  ;;  %v6585_v28 = vld [vmem:[#allocation86_spill] sm:$0xff] }
  0x94   : > { %v6580_v9 = vld [vmem:[#allocation87_spill] sm:$0xff]  ;;  %v6586_v27 = vld [vmem:[#allocation76_spill] sm:$0xff]  ;;  %v6587_v26 = vld [vmem:[#allocation70_spill] sm:$0xff]  ;;  %p4617_p12 = pnand (%p320_p7), %p4616_p11, %p4610_p8 }
  0x95   : > { %v6581_v51 = vld [vmem:[#allocation63_spill] sm:$0xff]  ;;  %v6588_v25 = vld [vmem:[#allocation85_spill] sm:$0xff]  ;;  %v6589_v24 = vld [vmem:[#allocation68_spill] sm:$0xff] }
  0x96   : > { %v6590_v23 = vld [vmem:[#allocation74_spill] sm:$0xff]  ;;  %v6591_v20 = vld [vmem:[#allocation73_spill] sm:$0xff]  ;;  %v6592_v19 = vld [vmem:[#allocation60_spill] sm:$0xff]  ;;  %3776 = vmatprep.subr.bf16.mxu1 %v6589_v24 }
  0x97   : > { %v6593_v18 = vld [vmem:[#allocation59_spill] sm:$0xff]  ;;  %v6594_v17 = vld [vmem:[#allocation58_spill] sm:$0xff]  ;;  %v6597_v7 = vld [vmem:[#allocation57_spill] sm:$0xff]  ;;  %3744 = vmatprep.subr.bf16.mxu0 %v6592_v19  ;;  %3777 = vmatpush3.bf16.msra.mxu1 %v6589_v24 }
  0x98   : > { %v6595_v14 = vld [vmem:[#allocation75_spill] sm:$0xff]  ;;  %v6598_v6 = vld [vmem:[#allocation56_spill] sm:$0xff]  ;;  %3745 = vmatpush3.bf16.msra.mxu0 %v6592_v19  ;;  %v329_v61 = vld [vmem:[#allocation2 + $0x68] sm:$0xff] }
  0x99   : > { %v6596_v12 = vld [vmem:[#allocation67_spill] sm:$0xff]  ;;  %v325_v4 = vld [vmem:[#allocation2] sm:$0xff]  ;;  %3746 = vmatprep.subr.bf16.mxu0 %v6593_v18  ;;  %v330_v21 = vld [vmem:[#allocation2 + $0x8] sm:$0xff] }
  0x9a   : > { %v324_v1 = vld [vmem:[#allocation2 + $0x30] sm:$0xff]  ;;  %3778 = vmatprep.subr.bf16.mxu1 %v6596_v12  ;;  %v326_v8 = vld [vmem:[#allocation2 + $0x58] sm:$0xff]  ;;  %v331_v38 = vld [vmem:[#allocation2 + $0x48] sm:$0xff] }
  0x9b   : > { %v4943_v16 = vpack.c.bf16 %v325_v4, %v324_v1  ;;  %3779 = vmatpush3.bf16.msra.mxu1 %v6596_v12  ;;  %v327_v52 = vld [vmem:[#allocation2 + $0x18] sm:$0xff]  ;;  %v328_v59 = vld [vmem:[#allocation2 + $0x50] sm:$0xff]  ;;  %v332_v49 = vld [vmem:[#allocation2 + $0x40] sm:$0xff]  ;;  %v343_v4 = vpack.c.bf16 %v331_v38, %v330_v21 }
  0x9c   : > { %3747 = vmatpush3.bf16.msra.mxu0 %v6593_v18  ;;  %3780 = vmatprep.subr.bf16.mxu1 %v6572_v63  ;;  %v341_v11 = vpack.c.bf16 %v327_v52, %v326_v8  ;;  %v342_v32 = vpack.c.bf16 %v329_v61, %v328_v59  ;;  %v333_v1 = vld [vmem:[#allocation2 + $0x20] sm:$0xff]  ;;  %v334_v52 = vld [vmem:[#allocation2 + $0x10] sm:$0xff]  ;;  %v335_v59 = vld [vmem:[#allocation2 + $0x38] sm:$0xff] }
  0x9d   : > { %3792 = vmatprep.mubr.bf16.mxu1 %v4943_v16  ;;  %3760 = vmatprep.mubr.bf16.mxu0 %v4943_v16  ;;  %v344_v8 = vpack.c.bf16 %v333_v1, %v332_v49  ;;  %v336_v61 = vld [vmem:[#allocation2 + $0x60] sm:$0xff]  ;;  %v338_v21 = vld [vmem:[#allocation2 + $0x78] sm:$0xff]  ;;  %v339_v38 = vld [vmem:[#allocation2 + $0x28] sm:$0xff] }
  0x9e   : > { %3748 = vmatprep.subr.bf16.mxu0 %v6594_v17  ;;  %v347_v49 = vpack.c.bf16 %v339_v38, %v338_v21 }
  0x9f   : > { %3781 = vmatpush3.bf16.msra.mxu1 %v6572_v63 }
  0xa0   : > { %3749 = vmatpush3.bf16.msra.mxu0 %v6594_v17  ;;  %3782 = vmatprep.subr.bf16.mxu1 %v6573_v62 }
  0xa1   : > { %3750 = vmatprep.subr.bf16.mxu0 %v6597_v7 }
  0xa3   : > { %3783 = vmatpush3.bf16.msra.mxu1 %v6573_v62 }
  0xa4   : > { %3751 = vmatpush3.bf16.msra.mxu0 %v6597_v7  ;;  %3784 = vmatprep.subr.bf16.mxu1 %v6576_v57  ;;  %v345_v7 = vpack.c.bf16 %v335_v59, %v334_v52 }
  0xa5   : > { %3752 = vmatprep.subr.bf16.mxu0 %v6598_v6 }
  0xa7   : > { %3785 = vmatpush3.bf16.msra.mxu1 %v6576_v57 }
  0xa8   : > { %3753 = vmatpush3.bf16.msra.mxu0 %v6598_v6  ;;  %3786 = vmatprep.subr.bf16.mxu1 %v6581_v51  ;;  %v337_v6 = vld [vmem:[#allocation2 + $0x70] sm:$0xff] }
  0xa9   : > { %3754 = vmatprep.subr.bf16.mxu0 %v6574_v60  ;;  %v346_v12 = vpack.c.bf16 %v337_v6, %v336_v61 }
  0xab   : > { %3787 = vmatpush3.bf16.msra.mxu1 %v6581_v51 }
  0xac   : > { %3755 = vmatpush3.bf16.msra.mxu0 %v6574_v60  ;;  %3788 = vmatprep.subr.bf16.mxu1 %v6582_v50 }
  0xad   : > { %3756 = vmatprep.subr.bf16.mxu0 %v6577_v56 }
  0xaf   : > { %3789 = vmatpush3.bf16.msra.mxu1 %v6582_v50 }
  0xb0   : > { %3757 = vmatpush3.bf16.msra.mxu0 %v6577_v56  ;;  %3790 = vmatprep.subr.bf16.mxu1 %v6583_v31 }
  0xb1   : > { %3758 = vmatprep.subr.bf16.mxu0 %v6578_v55 }
  0xb3   : > { %3791 = vmatpush3.bf16.msra.mxu1 %v6583_v31 }
  0xb4   : > { %3759 = vmatpush3.bf16.msra.mxu0 %v6578_v55 }
  0xb5   : > { %3808 = vmatprep.subr.bf16.mxu0 %v6586_v27 }
  0xb6   : > { %3793 = vmatmul.mubr.bf16.vlgmr.msra.gmra.mxu1 %v341_v11 }
  0xb7   : > { %3761 = vmatmul.mubr.bf16.vlgmr.msra.gmra.mxu0 %v341_v11  ;;  %3796 = vmatprep.mubr.bf16.mxu1 %v342_v32 }
  0xb8   : > { %3764 = vmatprep.mubr.bf16.mxu0 %v342_v32  ;;  %3809 = vmatpush3.bf16.msra.mxu0 %v6586_v27 }
  0xb9   : > { %3810 = vmatprep.subr.bf16.mxu0 %v6595_v14 }
  0xbc   : > { %3811 = vmatpush3.bf16.msra.mxu0 %v6595_v14 }
  0xbd   : > { %3812 = vmatprep.subr.bf16.mxu0 %v6590_v23 }
  0xbe   : > { %3797 = vmatmul.mubr.bf16.gmra.mxu1 %v343_v4 }
  0xbf   : > { %3765 = vmatmul.mubr.bf16.gmra.mxu0 %v343_v4  ;;  %3800 = vmatprep.mubr.bf16.mxu1 %v344_v8 }
  0xc0   : > { %3768 = vmatprep.mubr.bf16.mxu0 %v344_v8  ;;  %3813 = vmatpush3.bf16.msra.mxu0 %v6590_v23 }
  0xc1   : > { %3814 = vmatprep.subr.bf16.mxu0 %v6591_v20 }
  0xc4   : > { %3815 = vmatpush3.bf16.msra.mxu0 %v6591_v20 }
  0xc5   : > { %3816 = vmatprep.subr.bf16.mxu0 %v6575_v58 }
  0xc6   : > { %3801 = vmatmul.mubr.bf16.gmra.mxu1 %v345_v7 }
  0xc7   : > { %3769 = vmatmul.mubr.bf16.gmra.mxu0 %v345_v7  ;;  %3804 = vmatprep.mubr.bf16.mxu1 %v346_v12 }
  0xc8   : > { %3772 = vmatprep.mubr.bf16.mxu0 %v346_v12  ;;  %3817 = vmatpush3.bf16.msra.mxu0 %v6575_v58 }
  0xc9   : > { %3818 = vmatprep.subr.bf16.mxu0 %v6579_v54 }
  0xcc   : > { %3819 = vmatpush3.bf16.msra.mxu0 %v6579_v54 }
  0xcd   : > { %3820 = vmatprep.subr.bf16.mxu0 %v6587_v26 }
  0xce   : > { %3805 = vmatmul.mubr.bf16.gmra.mxu1 %v347_v49 }
  0xcf   : > { %3773 = vmatmul.mubr.bf16.gmra.mxu0 %v347_v49 }
  0xd0   : > { %3824 = vmatprep.mubr.bf16.mxu0 %v4943_v16  ;;  %3821 = vmatpush3.bf16.msra.mxu0 %v6587_v26 }
  0xd1   : > { %3822 = vmatprep.subr.bf16.mxu0 %v6584_v29 }
  0xd4   : > { %3823 = vmatpush3.bf16.msra.mxu0 %v6584_v29 }
  0xd7   : > { %3825 = vmatmul.mubr.bf16.vlgmr.msra.gmra.mxu0 %v341_v11 }
  0xd8   : > { %3828 = vmatprep.mubr.bf16.mxu0 %v342_v32 }
  0xdf   : > { %3829 = vmatmul.mubr.bf16.gmra.mxu0 %v343_v4 }
  0xe0   : > { %3832 = vmatprep.mubr.bf16.mxu0 %v344_v8 }
  0xe7   : > { %3833 = vmatmul.mubr.bf16.gmra.mxu0 %v345_v7 }
  0xe8   : > { %3836 = vmatprep.mubr.bf16.mxu0 %v346_v12 }
  0xef   : > { %3837 = vmatmul.mubr.bf16.gmra.mxu0 %v347_v49 }
 0x176   : > { %v3794_v6 = vpop.f32.mrf.mxu1 }
 0x177   : > { %v3762_v1 = vpop.f32.mrf.mxu0 }
 0x178   : > { %v491_v52 = vpop.f32.mrf.mxu1  ;;  %v397_v32 = vadd.f32 %v3762_v1, %v6588_v25 }
 0x179   : > { %v388_v59 = vpop.f32.mrf.mxu0  ;;  %v492_v61 = vadd.f32 %v6585_v28, %v491_v52 }
 0x17a   : > { %v3795_v16 = vpop.f32.mrf.mxu1  ;;  %v389_v38 = vadd.f32 %v6588_v25, %v388_v59 }
 0x17b   : > { %v3763_v21 = vpop.f32.mrf.mxu0  ;;  %657 = vxpose.xlu0.b32.start [1/16] %v492_v61, 128  ;;  %v500_v61 = vadd.f32 %v3794_v6, %v6585_v28 }
 0x17c   : > { %v494_v14 = vpop.f32.mrf.mxu1  ;;  %v400_v7 = vadd.f32 %v3763_v21, %v6588_v25 }
 0x17d   : > { %v391_v17 = vpop.f32.mrf.mxu0  ;;  %v495_v11 = vadd.f32 %v6585_v28, %v494_v14 }
 0x17e   : > { %v392_v12 = vadd.f32 %v6588_v25, %v391_v17  ;;  %v3798_v4 = vpop.f32.mrf.mxu1  ;;  %v5002_v59 = vpack.c.bf16 %v400_v7, %v397_v32 }
 0x17f   : > { %v3766_v8 = vpop.f32.mrf.mxu0  ;;  %658 = vxpose.xlu0.b32.cont [2/16] %v495_v11, 128 }
 0x180   : > { %v4999_v49 = vpack.c.bf16 %v392_v12, %v389_v38  ;;  %6600 = vst [vmem:[#allocation92_spill] sm:$0xff] %v5002_v59  ;;  %v507_v14 = vpop.f32.mrf.mxu1  ;;  %v503_v38 = vadd.f32 %v3795_v16, %v6585_v28  ;;  %v413_v11 = vadd.f32 %v3766_v8, %v6588_v25 }
 0x181   : > { %v404_v52 = vpop.f32.mrf.mxu0 }
 0x182   : > { %6599 = vst [vmem:[#allocation91_spill] sm:$0xff] %v4999_v49  ;;  %1160 = vrot.lane.b32.xlu1 %v4999_v49, %s4656_s7  ;;  %3844 = vmatprep.mubr.msk.bf16.mxu1 %vm707_vm0, %v4999_v49  ;;  %v405_v1 = vadd.f32 %v6588_v25, %v404_v52  ;;  %v3799_v7 = vpop.f32.mrf.mxu1  ;;  %v508_v52 = vadd.f32 %v6585_v28, %v507_v14 }
 0x183   : > { %v3767_v17 = vpop.f32.mrf.mxu0  ;;  %659 = vxpose.xlu0.b32.cont [3/16] %v500_v61, 128  ;;  %v519_v24 = vadd.f32 %v3799_v7, %v6585_v28 }
 0x184   : > { %v416_v6 = vadd.f32 %v3767_v17, %v6588_v25  ;;  %v510_v16 = vpop.f32.mrf.mxu1 }
 0x185   : > { %v407_v21 = vpop.f32.mrf.mxu0  ;;  %v511_v20 = vadd.f32 %v6585_v28, %v510_v16 }
 0x186   : > { %v408_v32 = vadd.f32 %v6588_v25, %v407_v21  ;;  %1162 = vrot.lane.b32.xlu1 %v5002_v59, %s4656_s7  ;;  %v5018_v19 = vpack.c.bf16 %v416_v6, %v413_v11  ;;  %v3802_v14 = vpop.f32.mrf.mxu1 }
 0x187   : > { %v3770_v12 = vpop.f32.mrf.mxu0  ;;  %660 = vxpose.xlu0.b32.cont [4/16] %v503_v38, 128 }
 0x188   : > { %v5015_v18 = vpack.c.bf16 %v408_v32, %v405_v1  ;;  %6602 = vst [vmem:[#allocation94_spill] sm:$0xff] %v5018_v19  ;;  %v429_v38 = vadd.f32 %v3770_v12, %v6588_v25  ;;  %v523_v12 = vpop.f32.mrf.mxu1 }
 0x189   : > { %v420_v61 = vpop.f32.mrf.mxu0 }
 0x18a   : > { %6601 = vst [vmem:[#allocation93_spill] sm:$0xff] %v5015_v18  ;;  %1164 = vrot.lane.b32.xlu1 %v5015_v18, %s4656_s7  ;;  %v421_v17 = vadd.f32 %v6588_v25, %v420_v61  ;;  %v516_v61 = vadd.f32 %v3798_v4, %v6585_v28  ;;  %v3803_v4 = vpop.f32.mrf.mxu1 }
 0x18b   : > { %v3771_v8 = vpop.f32.mrf.mxu0  ;;  %661 = vxpose.xlu0.b32.cont [5/16] %v508_v52, 128 }
 0x18c   : > { %v432_v1 = vadd.f32 %v3771_v8, %v6588_v25  ;;  %v526_v7 = vpop.f32.mrf.mxu1 }
 0x18d   : > { %v423_v21 = vpop.f32.mrf.mxu0 }
 0x18e   : > { %v424_v32 = vadd.f32 %v6588_v25, %v423_v21  ;;  %1166 = vrot.lane.b32.xlu1 %v5018_v19, %s4656_s7  ;;  %v5032_v23 = vpack.c.bf16 %v432_v1, %v429_v38  ;;  %v524_v1 = vadd.f32 %v6585_v28, %v523_v12  ;;  %v535_v12 = vadd.f32 %v3803_v4, %v6585_v28 }
 0x18f   : > { %v3774_v11 = vpop.f32.mrf.mxu0  ;;  %662 = vxpose.xlu0.b32.cont [6/16] %v511_v20, 128 }
 0x190   : > { %v5029_v6 = vpack.c.bf16 %v424_v32, %v421_v17  ;;  %6604 = vst [vmem:[#allocation96_spill] sm:$0xff] %v5032_v23  ;;  %v445_v20 = vadd.f32 %v3774_v11, %v6588_v25  ;;  %v527_v11 = vadd.f32 %v6585_v28, %v526_v7 }
 0x191   : > { %v436_v52 = vpop.f32.mrf.mxu0 }
 0x192   : > { %6603 = vst [vmem:[#allocation95_spill] sm:$0xff] %v5029_v6  ;;  %1168 = vrot.lane.b32.xlu1 %v5029_v6, %s4656_s7  ;;  %v437_v8 = vadd.f32 %v6588_v25, %v436_v52  ;;  %v3806_v52 = vpop.f32.mrf.mxu1 }
 0x193   : > { %v3775_v16 = vpop.f32.mrf.mxu0  ;;  %663 = vxpose.xlu0.b32.cont [7/16] %v516_v61, 128 }
 0x194   : > { %v448_v17 = vadd.f32 %v3775_v16, %v6588_v25  ;;  %v539_v16 = vpop.f32.mrf.mxu1 }
 0x195   : > { %v439_v21 = vpop.f32.mrf.mxu0 }
 0x196   : > { %v440_v32 = vadd.f32 %v6588_v25, %v439_v21  ;;  %1170 = vrot.lane.b32.xlu1 %v5032_v23, %s4656_s7  ;;  %v5046_v61 = vpack.c.bf16 %v448_v17, %v445_v20  ;;  %v540_v21 = vadd.f32 %v6585_v28, %v539_v16 }
 0x197   : > { %664 = vxpose.xlu0.b32.cont [8/16] %v519_v24, 128  ;;  %v532_v24 = vadd.f32 %v3802_v14, %v6585_v28  ;;  %v3826_v14 = vpop.f32.mrf.mxu0 }
 0x198   : > { %v5043_v38 = vpack.c.bf16 %v440_v32, %v437_v8  ;;  %6606 = vst [vmem:[#allocation98_spill] sm:$0xff] %v5046_v61  ;;  %v3807_v8 = vpop.f32.mrf.mxu1  ;;  %v548_v32 = vadd.f32 %v3806_v52, %v6585_v28 }
 0x199   : > { %v594_v7 = vpop.f32.mrf.mxu0 }
 0x19a   : > { %6605 = vst [vmem:[#allocation97_spill] sm:$0xff] %v5043_v38  ;;  %1172 = vrot.lane.b32.xlu1 %v5043_v38, %s4656_s7  ;;  %v542_v20 = vpop.f32.mrf.mxu1 }
 0x19b   : > { %665 = vxpose.xlu0.b32.cont [9/16] %v524_v1, 128  ;;  %v543_v17 = vadd.f32 %v6585_v28, %v542_v20  ;;  %v551_v1 = vadd.f32 %v3807_v8, %v6585_v28 }
 0x19e   : > { %1174 = vrot.lane.b32.xlu1 %v5046_v61, %s4656_s7 }
 0x19f   : > { %666 = vxpose.xlu0.b32.cont [10/16] %v527_v11, 128  ;;  %v3827_v11 = vpop.f32.mrf.mxu0 }
 0x1a3   : > { %667 = vxpose.xlu0.b32.cont [11/16] %v532_v24, 128  ;;  %v597_v24 = vpop.f32.mrf.mxu0 }
 0x1a5   : > { %v3830_v4 = vpop.f32.mrf.mxu0 }
 0x1a7   : > { %668 = vxpose.xlu0.b32.cont [12/16] %v535_v12, 128  ;;  %v610_v25 = vpop.f32.mrf.mxu0 }
 0x1a9   : > { %v3831_v12 = vpop.f32.mrf.mxu0 }
 0x1aa   : > { %v622_v52 = vadd.f32 %v3831_v12, %v6580_v9 }
 0x1ab   : > { %669 = vxpose.xlu0.b32.cont [13/16] %v540_v21, 128  ;;  %v613_v26 = vpop.f32.mrf.mxu0 }
 0x1ad   : > { %v3834_v16 = vpop.f32.mrf.mxu0 }
 0x1ae   : > { %v635_v21 = vadd.f32 %v3834_v16, %v6580_v9 }
 0x1af   : > { %670 = vxpose.xlu0.b32.cont [14/16] %v543_v17, 128  ;;  %v626_v27 = vpop.f32.mrf.mxu0  ;;  %v619_v17 = vadd.f32 %v3830_v4, %v6580_v9 }
 0x1b0   : > { %v627_v8 = vadd.f32 %v6580_v9, %v626_v27 }
 0x1b1   : > { %v3835_v20 = vpop.f32.mrf.mxu0  ;;  %v5067_v50 = vpack.c.bf16 %v622_v52, %v619_v17 }
 0x1b3   : > { %671 = vxpose.xlu0.b32.cont [15/16] %v548_v32, 128  ;;  %v638_v32 = vadd.f32 %v3835_v20, %v6580_v9  ;;  %6608 = vst [vmem:[#allocation100_spill] sm:$0xff] %v5067_v50 }
 0x1b5   : > { %v5064_v28 = vpack.c.bf16 %v638_v32, %v635_v21  ;;  %v603_v32 = vadd.f32 %v3826_v14, %v6580_v9 }
 0x1b7   : > { %672 = vxpose.xlu0.b32.end [16/16] %v551_v1, 128  ;;  %v629_v1 = vpop.f32.mrf.mxu0  ;;  %6607 = vst [vmem:[#allocation99_spill] sm:$0xff] %v5064_v28  ;;  %1531 = vrot.lane.b32.xlu1 %v5064_v28, %s4656_s7 }
 0x1b8   : > { %v630_v29 = vadd.f32 %v6580_v9, %v629_v1  ;;  %v606_v1 = vadd.f32 %v3827_v11, %v6580_v9 }
 0x1b9   : > { %v3838_v31 = vpop.f32.mrf.mxu0 }
 0x1ba   : > { %v5069_v51 = vpack.c.bf16 %v630_v29, %v627_v8  ;;  %v651_v12 = vadd.f32 %v3838_v31, %v6580_v9  ;;  %v611_v31 = vadd.f32 %v6580_v9, %v610_v25  ;;  %v614_v8 = vadd.f32 %v6580_v9, %v613_v26 }
 0x1bb   : > { %v642_v4 = vpop.f32.mrf.mxu0  ;;  %1527 = vrot.lane.b32.xlu1 %v5067_v50, %s4656_s7  ;;  %v5106_v25 = vpack.c.bf16 %v606_v1, %v603_v32  ;;  %v598_v26 = vadd.f32 %v6580_v9, %v597_v24 }
 0x1bc   : > { %6609 = vst [vmem:[#allocation101_spill] sm:$0xff] %v5069_v51  ;;  %v643_v16 = vadd.f32 %v6580_v9, %v642_v4  ;;  %v5101_v4 = vpack.c.bf16 %v614_v8, %v611_v31 }
 0x1bd   : > { %v3839_v27 = vpop.f32.mrf.mxu0  ;;  %6613 = vst [vmem:[#allocation105_spill] sm:$0xff] %v5106_v25 }
 0x1be   : > { %v654_v21 = vadd.f32 %v3839_v27, %v6580_v9  ;;  %6612 = vst [vmem:[#allocation104_spill] sm:$0xff] %v5101_v4  ;;  %v595_v27 = vadd.f32 %v6580_v9, %v594_v7 }
 0x1bf   : > { %v645_v20 = vpop.f32.mrf.mxu0 }
 0x1c0   : > { %v5080_v29 = vpack.c.bf16 %v654_v21, %v651_v12  ;;  %v646_v17 = vadd.f32 %v6580_v9, %v645_v20  ;;  %v5111_v14 = vpack.c.bf16 %v598_v26, %v595_v27 }
 0x1c2   : > { %6610 = vst [vmem:[#allocation102_spill] sm:$0xff] %v5080_v29  ;;  %v5083_v52 = vpack.c.bf16 %v646_v17, %v643_v16  ;;  %3860 = vmatprep.subr.bf16.mxu0 %v5080_v29  ;;  %1535 = vrot.lane.b32.xlu1 %v5080_v29, %s4656_s7  ;;  %6614 = vst [vmem:[#allocation106_spill] sm:$0xff] %v5111_v14 }
 0x1c3   : > { %3861 = vmatpush3.bf16.msra.mxu0 %v5080_v29 }
 0x1c4   : > { %6611 = vst [vmem:[#allocation103_spill] sm:$0xff] %v5083_v52  ;;  %3862 = vmatprep.subr.bf16.mxu0 %v5083_v52 }
 0x1c7   : > { %3863 = vmatpush3.bf16.msra.mxu0 %v5083_v52 }
 0x1c8   : > { %3864 = vmatprep.subr.bf16.mxu0 %v5064_v28 }
 0x1cb   : > { %3865 = vmatpush3.bf16.msra.mxu0 %v5064_v28 }
 0x1cc   : > { %3866 = vmatprep.subr.bf16.mxu0 %v5069_v51 }
 0x1cf   : > { %3867 = vmatpush3.bf16.msra.mxu0 %v5069_v51 }
 0x1d0   : > { %3868 = vmatprep.subr.bf16.mxu0 %v5067_v50 }
 0x1d3   : > { %3869 = vmatpush3.bf16.msra.mxu0 %v5067_v50 }
 0x1d4   : > { %3870 = vmatprep.subr.bf16.mxu0 %v5101_v4 }
 0x1d7   : > { %3871 = vmatpush3.bf16.msra.mxu0 %v5101_v4 }
 0x1d8   : > { %3872 = vmatprep.subr.bf16.mxu0 %v5106_v25 }
 0x1db   : > { %3873 = vmatpush3.bf16.msra.mxu0 %v5106_v25 }
 0x1dc   : > { %3874 = vmatprep.subr.bf16.mxu0 %v5111_v14 }
 0x1df   : > { %3875 = vmatpush3.bf16.msra.mxu0 %v5111_v14 }
 0x1e0   : > { %1529 = vrot.lane.b32.xlu0 %v5069_v51, %s4656_s7 }
 0x1e4   : > { %1533 = vrot.lane.b32.xlu0 %v5083_v52, %s4656_s7 }
 0x1f7   : > { %v673_v12 = vpop.trf.xlu0 }
 0x1fb   : > { %v674_v16 = vpop.trf.xlu0 }
 0x1fc   : > { %v697_v20 = vpack.c.bf16 %v674_v16, %v673_v12  ;;  %v1161_v12 = vpop.permute.xlu1 %1160 }
 0x1ff   : > { %v675_v11 = vpop.trf.xlu0 }
 0x200   : > { %v1163_v27 = vpop.permute.xlu1 %1162 }
 0x203   : > { %v676_v21 = vpop.trf.xlu0 }
 0x204   : > { %v698_v7 = vpack.c.bf16 %v676_v21, %v675_v11  ;;  %v1165_v26 = vpop.permute.xlu1 %1164 }
 0x206   : > { %3840 = vmatprep.subr.bf16.mxu1 %v698_v7 }
 0x207   : > { %3841 = vmatpush3.bf16.msra.mxu1 %v698_v7  ;;  %v677_v24 = vpop.trf.xlu0 }
 0x208   : > { %3842 = vmatprep.subr.bf16.mxu1 %v697_v20  ;;  %v1167_v16 = vpop.permute.xlu1 %1166 }
 0x20b   : > { %3843 = vmatpush3.bf16.msra.mxu1 %v697_v20  ;;  %v678_v17 = vpop.trf.xlu0 }
 0x20c   : > { %v1150_v32 = vpack.c.bf16 %v678_v17, %v677_v24  ;;  %v1169_v11 = vpop.permute.xlu1 %1168 }
 0x20e   : > { %3845 = vmatmul.mubr.msk.bf16.vlgmr.msra.gmra.mxu1 %vm707_vm0, %v5002_v59 }
 0x20f   : > { %3848 = vmatprep.mubr.msk.bf16.mxu1 %vm707_vm0, %v5015_v18  ;;  %v679_v31 = vpop.trf.xlu0 }
 0x210   : > { %v1171_v21 = vpop.permute.xlu1 %1170 }
 0x213   : > { %v680_v8 = vpop.trf.xlu0 }
 0x214   : > { %v1151_v1 = vpack.c.bf16 %v680_v8, %v679_v31  ;;  %v1173_v7 = vpop.permute.xlu1 %1172 }
 0x216   : > { %3849 = vmatmul.mubr.msk.bf16.gmra.mxu1 %vm707_vm0, %v5018_v19  ;;  %3892 = vmatprep.subr.bf16.mxu1 %v1151_v1 }
 0x217   : > { %3852 = vmatprep.mubr.msk.bf16.mxu1 %vm707_vm0, %v5029_v6  ;;  %3893 = vmatpush3.bf16.msra.mxu1 %v1151_v1  ;;  %v5139_v24 = vpop.trf.xlu0 }
 0x218   : > { %3894 = vmatprep.subr.bf16.mxu1 %v1150_v32  ;;  %v1175_v20 = vpop.permute.xlu1 %1174  ;;  %6615 = vst [vmem:[#allocation107_spill] sm:$0xff] %v5139_v24 }
 0x21b   : > { %3895 = vmatpush3.bf16.msra.mxu1 %v1150_v32  ;;  %v5141_v17 = vpop.trf.xlu0 }
 0x21c   : > { %6616 = vst [vmem:[#allocation108_spill] sm:$0xff] %v5141_v17 }
 0x21e   : > { %3853 = vmatmul.mubr.msk.bf16.gmra.mxu1 %vm707_vm0, %v5032_v23 }
 0x21f   : > { %3856 = vmatprep.mubr.msk.bf16.mxu1 %vm707_vm0, %v5043_v38  ;;  %v5143_v31 = vpop.trf.xlu0 }
 0x220   : > { %6617 = vst [vmem:[#allocation109_spill] sm:$0xff] %v5143_v31 }
 0x223   : > { %v5145_v8 = vpop.trf.xlu0 }
 0x224   : > { %6618 = vst [vmem:[#allocation110_spill] sm:$0xff] %v5145_v8 }
 0x226   : > { %3857 = vmatmul.mubr.msk.bf16.gmra.mxu1 %vm707_vm0, %v5046_v61 }
 0x227   : > { %3896 = vmatprep.mubr.msk.bf16.mxu1 %vm707_vm0, %v1161_v12  ;;  %v5147_v32 = vpop.trf.xlu0 }
 0x228   : > { %6619 = vst [vmem:[#allocation111_spill] sm:$0xff] %v5147_v32 }
 0x22b   : > { %v5149_v1 = vpop.trf.xlu0 }
 0x22c   : > { %6620 = vst [vmem:[#allocation112_spill] sm:$0xff] %v5149_v1 }
 0x22e   : > { %3897 = vmatmul.mubr.msk.bf16.vlgmr.msra.gmra.mxu1 %vm707_vm0, %v1163_v27  ;;  %v5153_v27 = vpop.permute.xlu1 %1531 }
 0x22f   : > { %3900 = vmatprep.mubr.msk.bf16.mxu1 %vm707_vm0, %v1165_v26  ;;  %v5151_v12 = vpop.trf.xlu0  ;;  %6622 = vst [vmem:[#allocation114_spill] sm:$0xff] %v5153_v27 }
 0x230   : > { %6621 = vst [vmem:[#allocation113_spill] sm:$0xff] %v5151_v12 }
 0x233   : > { %v5155_v26 = vpop.trf.xlu0 }
 0x234   : > { %6623 = vst [vmem:[#allocation115_spill] sm:$0xff] %v5155_v26 }
 0x236   : > { %3901 = vmatmul.mubr.msk.bf16.gmra.mxu1 %vm707_vm0, %v1167_v16  ;;  %v5157_v16 = vpop.permute.xlu1 %1527 }
 0x237   : > { %3904 = vmatprep.mubr.msk.bf16.mxu1 %vm707_vm0, %v1169_v11  ;;  %6624 = vst [vmem:[#allocation116_spill] sm:$0xff] %v5157_v16 }
 0x23e   : > { %3905 = vmatmul.mubr.msk.bf16.gmra.mxu1 %vm707_vm0, %v1171_v21  ;;  %v5161_v21 = vpop.permute.xlu1 %1535 }
 0x23f   : > { %3908 = vmatprep.mubr.msk.bf16.mxu1 %vm707_vm0, %v1173_v7  ;;  %6626 = vst [vmem:[#allocation118_spill] sm:$0xff] %v5161_v21  ;;  %4128 = vmatprep.subr.bf16.mxu1 %v5161_v21 }
 0x240   : > { %3912 = vmatprep.subr.bf16.mxu0 %v5161_v21  ;;  %4136 = vmatpush3.bf16.msra.mxu1 %v5161_v21 }
 0x246   : > { %3909 = vmatmul.mubr.msk.bf16.gmra.mxu1 %vm707_vm0, %v1175_v20 }
 0x252   : > { %v5159_v11 = vpop.permute.xlu0 %1529 }
 0x253   : > { %6625 = vst [vmem:[#allocation117_spill] sm:$0xff] %v5159_v11 }
 0x256   : > { %v5166_v7 = vpop.permute.xlu0 %1533 }
 0x257   : > { %6627 = vst [vmem:[#allocation119_spill] sm:$0xff] %v5166_v7  ;;  %4129 = vmatprep.subr.bf16.mxu1 %v5166_v7 }
 0x258   : > { %4137 = vmatpush3.bf16.msra.mxu1 %v5166_v7 }
 0x259   : > { %4130 = vmatprep.subr.bf16.mxu1 %v5153_v27 }
 0x25c   : > { %4138 = vmatpush3.bf16.msra.mxu1 %v5153_v27 }
 0x25d   : > { %4131 = vmatprep.subr.bf16.mxu1 %v5159_v11 }
 0x260   : > { %4139 = vmatpush3.bf16.msra.mxu1 %v5159_v11 }
 0x261   : > { %4132 = vmatprep.subr.bf16.mxu1 %v5157_v16 }
 0x264   : > { %4140 = vmatpush3.bf16.msra.mxu1 %v5157_v16 }
 0x2ce   : > { %v3846_v20 = vpop.f32.mrf.mxu1 }
 0x2cf   : > { %v831_v9 = vmul.f32 0.17677669, %v3846_v20 }
 0x2d0   : > { %v766_v54 = vpop.f32.mrf.mxu1 }
 0x2d1   : > { %v5177_v55 = vadd.f32 %v831_v9, %v6571_v34  ;;  %v829_v56 = vmul.f32 0.17677669, %v766_v54 }
 0x2d2   : > { %v3847_v57 = vpop.f32.mrf.mxu1 }
 0x2d3   : > { %865 = vmax.xlane.f32.xlu1 %v5177_v55  ;;  %v5181_v60 = vadd.f32 %v829_v56, %v6556_v30  ;;  %v832_v62 = vmul.f32 0.17677669, %v3847_v57 }
 0x2d4   : > { %v769_v58 = vpop.f32.mrf.mxu1 }
 0x2d5   : > { %v830_v63 = vmul.f32 0.17677669, %v769_v58  ;;  %v5188_v9 = vadd.f32 %v832_v62, %v6558_v35 }
 0x2d6   : > { %v3850_v10 = vpop.f32.mrf.mxu1 }
 0x2d7   : > { %v5184_v1 = vadd.f32 %v830_v63, %v6557_v33  ;;  %861 = vmax.xlane.f32.xlu1 %v5181_v60  ;;  %v835_v54 = vmul.f32 0.17677669, %v3850_v10 }
 0x2d8   : > { %v782_v20 = vpop.f32.mrf.mxu1 }
 0x2d9   : > { %863 = vmax.xlane.f32.xlu0 %v5184_v1  ;;  %v5193_v57 = vadd.f32 %v835_v54, %v6570_v39  ;;  %v833_v58 = vmul.f32 0.17677669, %v782_v20 }
 0x2da   : > { %v3851_v32 = vpop.f32.mrf.mxu1 }
 0x2db   : > { %867 = vmax.xlane.f32.xlu1 %v5188_v9  ;;  %v5197_v12 = vadd.f32 %v833_v58, %v6569_v36  ;;  %v836_v62 = vmul.f32 0.17677669, %v3851_v32 }
 0x2dc   : > { %v785_v56 = vpop.f32.mrf.mxu1 }
 0x2dd   : > { %v5201_v13 = vadd.f32 %v836_v62, %v6559_v40  ;;  %v834_v3 = vmul.f32 0.17677669, %v785_v56 }
 0x2de   : > { %v3854_v26 = vpop.f32.mrf.mxu1 }
 0x2df   : > { %873 = vmax.xlane.f32.xlu1 %v5193_v57  ;;  %v5205_v54 = vadd.f32 %v834_v3, %v6560_v37  ;;  %v839_v24 = vmul.f32 0.17677669, %v3854_v26 }
 0x2e0   : > { %v798_v63 = vpop.f32.mrf.mxu1 }
 0x2e1   : > { %v5209_v58 = vadd.f32 %v839_v24, %v6568_v43  ;;  %v837_v31 = vmul.f32 0.17677669, %v798_v63 }
 0x2e2   : > { %v3855_v50 = vpop.f32.mrf.mxu1 }
 0x2e3   : > { %869 = vmax.xlane.f32.xlu1 %v5197_v12  ;;  %v5215_v62 = vadd.f32 %v837_v31, %v6564_v41  ;;  %v840_v3 = vmul.f32 0.17677669, %v3855_v50 }
 0x2e4   : > { %v801_v10 = vpop.f32.mrf.mxu1 }
 0x2e5   : > { %v5219_v22 = vadd.f32 %v840_v3, %v6563_v44  ;;  %v838_v24 = vmul.f32 0.17677669, %v801_v10 }
 0x2e6   : > { %v3858_v17 = vpop.f32.mrf.mxu1 }
 0x2e7   : > { %875 = vmax.xlane.f32.xlu1 %v5201_v13  ;;  %v843_v5 = vmul.f32 0.17677669, %v3858_v17 }
 0x2e8   : > { %v814_v20 = vpop.f32.mrf.mxu1 }
 0x2e9   : > { %v5227_v50 = vadd.f32 %v843_v5, %v6567_v47  ;;  %v841_v31 = vmul.f32 0.17677669, %v814_v20 }
 0x2ea   : > { %v3859_v8 = vpop.f32.mrf.mxu1 }
 0x2eb   : > { %871 = vmax.xlane.f32.xlu1 %v5205_v54  ;;  %v5231_v10 = vadd.f32 %v841_v31, %v6566_v45  ;;  %v844_v21 = vmul.f32 0.17677669, %v3859_v8 }
 0x2ec   : > { %v817_v32 = vpop.f32.mrf.mxu1 }
 0x2ed   : > { %v5246_v31 = vadd.f32 %v844_v21, %v6562_v48 }
 0x2ee   : > { %v3898_v53 = vpop.f32.mrf.mxu1 }
 0x2ef   : > { %1525 = vrot.lane.b32.xlu0 %v5101_v4, %s4656_s7  ;;  %881 = vmax.xlane.f32.xlu1 %v5209_v58  ;;  %v5223_v4 = vadd.f32 %v838_v24, %v6565_v42  ;;  %v1299_v3 = vmul.f32 0.17677669, %v3898_v53 }
 0x2f0   : > { %v1234_v56 = vpop.f32.mrf.mxu1 }
 0x2f1   : > { %v5234_v7 = vadd.f32 %v1299_v3, %v6571_v34  ;;  %v1297_v17 = vmul.f32 0.17677669, %v1234_v56  ;;  %v842_v3 = vmul.f32 0.17677669, %v817_v32 }
 0x2f2   : > { %v3899_v26 = vpop.f32.mrf.mxu1 }
 0x2f3   : > { %877 = vmax.xlane.f32.xlu1 %v5215_v62  ;;  %v5239_v20 = vadd.f32 %v1297_v17, %v6556_v30  ;;  %v1300_v17 = vmul.f32 0.17677669, %v3899_v26 }
 0x2f4   : > { %v1237_v15 = vpop.f32.mrf.mxu1 }
 0x2f5   : > { %v1298_v32 = vmul.f32 0.17677669, %v1237_v15 }
 0x2f6   : > { %v3902_v63 = vpop.f32.mrf.mxu1 }
 0x2f7   : > { %883 = vmax.xlane.f32.xlu1 %v5219_v22  ;;  %v1303_v5 = vmul.f32 0.17677669, %v3902_v63  ;;  %v5251_v63 = vadd.f32 %v842_v3, %v6561_v46  ;;  %v5267_v26 = vadd.f32 %v1298_v32, %v6557_v33 }
 0x2f8   : > { %v1250_v16 = vpop.f32.mrf.mxu1 }
 0x2f9   : > { %v5242_v53 = vadd.f32 %v1303_v5, %v6570_v39  ;;  %v1301_v34 = vmul.f32 0.17677669, %v1250_v16  ;;  %v5262_v16 = vadd.f32 %v1300_v17, %v6558_v35 }
 0x2fa   : > { %v3903_v11 = vpop.f32.mrf.mxu1 }
 0x2fb   : > { %879 = vmax.xlane.f32.xlu1 %v5223_v4  ;;  %v5254_v5 = vadd.f32 %v1301_v34, %v6569_v36  ;;  %v1304_v36 = vmul.f32 0.17677669, %v3903_v11 }
 0x2fc   : > { %v1253_v27 = vpop.f32.mrf.mxu1 }
 0x2fd   : > { %v5278_v15 = vadd.f32 %v1304_v36, %v6559_v40 }
 0x2fe   : > { %v3906_v24 = vpop.f32.mrf.mxu1 }
 0x2ff   : > { %889 = vmax.xlane.f32.xlu1 %v5227_v50  ;;  %v1307_v8 = vmul.f32 0.17677669, %v3906_v24 }
 0x300   : > { %v1266_v51 = vpop.f32.mrf.mxu1 }
 0x301   : > { %v5258_v21 = vadd.f32 %v1307_v8, %v6568_v43  ;;  %v1305_v24 = vmul.f32 0.17677669, %v1266_v51  ;;  %v1302_v51 = vmul.f32 0.17677669, %v1253_v27 }
 0x302   : > { %v3907_v56 = vpop.f32.mrf.mxu1 }
 0x303   : > { %885 = vmax.xlane.f32.xlu1 %v5231_v10  ;;  %v5270_v8 = vadd.f32 %v1305_v24, %v6564_v41  ;;  %v5283_v11 = vadd.f32 %v1302_v51, %v6560_v37  ;;  %v1308_v32 = vmul.f32 0.17677669, %v3907_v56 }
 0x304   : > { %v1269_v39 = vpop.f32.mrf.mxu1 }
 0x305   : > { %v5291_v36 = vadd.f32 %v1308_v32, %v6563_v44  ;;  %v1306_v27 = vmul.f32 0.17677669, %v1269_v39 }
 0x306   : > { %v3910_v3 = vpop.f32.mrf.mxu1 }
 0x307   : > { %1333 = vmax.xlane.f32.xlu1 %v5234_v7  ;;  %v1311_v34 = vmul.f32 0.17677669, %v3910_v3 }
 0x308   : > { %v1282_v43 = vpop.f32.mrf.mxu1 }
 0x309   : > { %v5274_v17 = vadd.f32 %v1311_v34, %v6567_v47  ;;  %v1309_v3 = vmul.f32 0.17677669, %v1282_v43  ;;  %v5295_v34 = vadd.f32 %v1306_v27, %v6565_v42 }
 0x30a   : > { %v3911_v43 = vpop.f32.mrf.mxu1 }
 0x30b   : > { %1329 = vmax.xlane.f32.xlu1 %v5239_v20  ;;  %v5286_v24 = vadd.f32 %v1309_v3, %v6566_v45  ;;  %v1312_v51 = vmul.f32 0.17677669, %v3911_v43 }
 0x30c   : > { %v1285_v47 = vpop.f32.mrf.mxu1 }
 0x30d   : > { %v5299_v56 = vadd.f32 %v1312_v51, %v6562_v48  ;;  %v1310_v3 = vmul.f32 0.17677669, %v1285_v47 }
 0x30e   : > { %891 = vmax.xlane.f32.xlu0 %v5246_v31 }
 0x30f   : > { %1341 = vmax.xlane.f32.xlu1 %v5242_v53  ;;  %v5303_v32 = vadd.f32 %v1310_v3, %v6561_v46 }
 0x312   : > { %887 = vmax.xlane.f32.xlu0 %v5251_v63 }
 0x313   : > { %1337 = vmax.xlane.f32.xlu1 %v5254_v5 }
 0x316   : > { %1335 = vmax.xlane.f32.xlu0 %v5262_v16 }
 0x317   : > { %1349 = vmax.xlane.f32.xlu1 %v5258_v21 }
 0x31a   : > { %1331 = vmax.xlane.f32.xlu0 %v5267_v26 }
 0x31b   : > { %1345 = vmax.xlane.f32.xlu1 %v5270_v8 }
 0x31e   : > { %1343 = vmax.xlane.f32.xlu0 %v5278_v15 }
 0x31f   : > { %1357 = vmax.xlane.f32.xlu1 %v5274_v17 }
 0x322   : > { %1339 = vmax.xlane.f32.xlu0 %v5283_v11 }
 0x323   : > { %1353 = vmax.xlane.f32.xlu1 %v5286_v24 }
 0x326   : > { %1351 = vmax.xlane.f32.xlu0 %v5291_v36 }
 0x32a   : > { %1347 = vmax.xlane.f32.xlu0 %v5295_v34 }
 0x32e   : > { %1359 = vmax.xlane.f32.xlu0 %v5299_v56 }
 0x332   : > { %1355 = vmax.xlane.f32.xlu0 %v5303_v32 }
 0x35c   : > { %v866_v39 = vpop.xlane.xlu1 %865 }
 0x35d   : > { %v895_v45 = vsub.f32 %v5177_v55, %v866_v39 }
 0x35f   : > { %v913_v27 = vmul.f32 1.442695, %v895_v45 }
 0x360   : > { %v862_v42 = vpop.xlane.xlu1 %861 }
 0x361   : > { %4165 = vpow2.f32 %v913_v27  ;;  %v893_v43 = vsub.f32 %v5181_v60, %v862_v42 }
 0x362   : > { %v864_v41 = vpop.xlane.xlu0 %863 }
 0x363   : > { %v909_v44 = vmul.f32 1.442695, %v893_v43  ;;  %v894_v51 = vsub.f32 %v5184_v1, %v864_v41 }
 0x364   : > { %v868_v47 = vpop.xlane.xlu1 %867 }
 0x365   : > { %4167 = vpow2.f32 %v909_v44  ;;  %v896_v48 = vsub.f32 %v5188_v9, %v868_v47  ;;  %v911_v46 = vmul.f32 1.442695, %v894_v51  ;;  %v6628_v47 = vld [vmem:[#allocation24_spill] sm:$0xff] }
 0x366   : > { %v5310_v3 = vpop.permute.xlu0 %1525 }
 0x367   : > { %v915_v37 = vmul.f32 1.442695, %v896_v48  ;;  %4133 = vmatprep.subr.bf16.mxu1 %v5310_v3 }
 0x368   : > { %4141 = vmatpush3.bf16.msra.mxu1 %v5310_v3  ;;  %v874_v45 = vpop.xlane.xlu1 %873 }
 0x369   : > { %4169 = vpow2.f32 %v915_v37  ;;  %v899_v42 = vsub.f32 %v5193_v57, %v874_v45 }
 0x36a   : > { %4171 = vpow2.f32 %v911_v46 }
 0x36b   : > { %v921_v55 = vmul.f32 1.442695, %v899_v42 }
 0x36c   : > { %v870_v60 = vpop.xlane.xlu1 %869 }
 0x36d   : > { %4173 = vpow2.f32 %v921_v55  ;;  %v897_v41 = vsub.f32 %v5197_v12, %v870_v60 }
 0x36e   : > { %v4166_v44 = vpop.eup %4165 }
 0x36f   : > { %v917_v1 = vmul.f32 1.442695, %v897_v41  ;;  %v5317_v9 = vmul.f32 %v4166_v44, %v6554_v2  ;;  %v6629_v44 = vld [vmem:[#allocation27_spill] sm:$0xff] }
 0x370   : > { %v876_v48 = vpop.xlane.xlu1 %875 }
 0x371   : > { %4175 = vpow2.f32 %v917_v1  ;;  %v900_v39 = vsub.f32 %v5201_v13, %v876_v48  ;;  %961 = vadd.xlane.f32.xlu1 %v5317_v9 }
 0x372   : > { %v4168_v37 = vpop.eup %4167 }
 0x373   : > { %v923_v27 = vmul.f32 1.442695, %v900_v39  ;;  %v5322_v46 = vmul.f32 %v4168_v37, %v6555_v0 }
 0x374   : > { %v872_v57 = vpop.xlane.xlu1 %871 }
 0x375   : > { %4177 = vpow2.f32 %v923_v27  ;;  %v898_v12 = vsub.f32 %v5205_v54, %v872_v57  ;;  %957 = vadd.xlane.f32.xlu1 %v5322_v46  ;;  %v6630_v54 = vld [vmem:[#allocation22_spill] sm:$0xff]  ;;  %v6631_v57 = vld [vmem:[#allocation25_spill] sm:$0xff] }
 0x376   : > { %v4170_v43 = vpop.eup %4169 }
 0x377   : > { %v919_v51 = vmul.f32 1.442695, %v898_v12  ;;  %v5327_v45 = vmul.f32 %v4170_v43, %v6628_v47  ;;  %v4172_v42 = vpop.eup %4171 }
 0x378   : > { %v882_v13 = vpop.xlane.xlu1 %881  ;;  %v5335_v48 = vmul.f32 %v4172_v42, %v6630_v54 }
 0x379   : > { %4179 = vpow2.f32 %v919_v51  ;;  %v903_v55 = vsub.f32 %v5209_v58, %v882_v13  ;;  %963 = vadd.xlane.f32.xlu0 %v5327_v45 }
 0x37a   : > { %v4174_v60 = vpop.eup %4173 }
 0x37b   : > { %v929_v41 = vmul.f32 1.442695, %v903_v55  ;;  %v5332_v1 = vmul.f32 %v4174_v60, %v6629_v44  ;;  %v6632_v55 = vld [vmem:[#allocation28_spill] sm:$0xff] }
 0x37c   : > { %v878_v39 = vpop.xlane.xlu1 %877 }
 0x37d   : > { %4181 = vpow2.f32 %v929_v41  ;;  %v901_v37 = vsub.f32 %v5215_v62, %v878_v39  ;;  %969 = vadd.xlane.f32.xlu1 %v5332_v1  ;;  %959 = vadd.xlane.f32.xlu0 %v5335_v48 }
 0x37e   : > { %v4176_v27 = vpop.eup %4175 }
 0x37f   : > { %v925_v58 = vmul.f32 1.442695, %v901_v37  ;;  %v5341_v12 = vmul.f32 %v4176_v27, %v6631_v57  ;;  %v6633_v27 = vld [vmem:[#allocation26_spill] sm:$0xff] }
 0x380   : > { %v884_v43 = vpop.xlane.xlu1 %883 }
 0x381   : > { %4183 = vpow2.f32 %v925_v58  ;;  %v904_v51 = vsub.f32 %v5219_v22, %v884_v43  ;;  %965 = vadd.xlane.f32.xlu1 %v5341_v12 }
 0x382   : > { %v4178_v42 = vpop.eup %4177 }
 0x383   : > { %v931_v13 = vmul.f32 1.442695, %v904_v51  ;;  %v5346_v60 = vmul.f32 %v4178_v42, %v6632_v55  ;;  %v6634_v42 = vld [vmem:[#allocation31_spill] sm:$0xff] }
 0x384   : > { %v880_v62 = vpop.xlane.xlu1 %879 }
 0x385   : > { %4185 = vpow2.f32 %v931_v13  ;;  %v902_v41 = vsub.f32 %v5223_v4, %v880_v62  ;;  %971 = vadd.xlane.f32.xlu0 %v5346_v60 }
 0x386   : > { %v4180_v39 = vpop.eup %4179 }
 0x387   : > { %v927_v37 = vmul.f32 1.442695, %v902_v41  ;;  %v5351_v40 = vmul.f32 %v4180_v39, %v6633_v27  ;;  %v6636_v39 = vld [vmem:[#allocation29_spill] sm:$0xff] }
 0x388   : > { %v890_v58 = vpop.xlane.xlu1 %889 }
 0x389   : > { %4187 = vpow2.f32 %v927_v37  ;;  %v907_v22 = vsub.f32 %v5227_v50, %v890_v58  ;;  %967 = vadd.xlane.f32.xlu0 %v5351_v40 }
 0x38a   : > { %v4182_v43 = vpop.eup %4181 }
 0x38b   : > { %v937_v51 = vmul.f32 1.442695, %v907_v22  ;;  %v5356_v35 = vmul.f32 %v4182_v43, %v6634_v42  ;;  %v6638_v43 = vld [vmem:[#allocation32_spill] sm:$0xff] }
 0x38c   : > { %v886_v13 = vpop.xlane.xlu1 %885 }
 0x38d   : > { %6635 = vst [vmem:[#allocation120_spill] sm:$0xff] %v5356_v35  ;;  %4189 = vpow2.f32 %v937_v51  ;;  %v905_v4 = vsub.f32 %v5231_v10, %v886_v13  ;;  %977 = vadd.xlane.f32.xlu1 %v5356_v35  ;;  %v6640_v35 = vld [vmem:[#allocation30_spill] sm:$0xff] }
 0x38e   : > { %v4184_v62 = vpop.eup %4183 }
 0x38f   : > { %v933_v41 = vmul.f32 1.442695, %v905_v4  ;;  %v5361_v33 = vmul.f32 %v4184_v62, %v6636_v39 }
 0x390   : > { %v1334_v37 = vpop.xlane.xlu1 %1333 }
 0x391   : > { %6637 = vst [vmem:[#allocation121_spill] sm:$0xff] %v5361_v33  ;;  %4191 = vpow2.f32 %v933_v41  ;;  %v1363_v50 = vsub.f32 %v5234_v7, %v1334_v37  ;;  %973 = vadd.xlane.f32.xlu1 %v5361_v33 }
 0x392   : > { %v4186_v58 = vpop.eup %4185 }
 0x393   : > { %v1381_v22 = vmul.f32 1.442695, %v1363_v50  ;;  %v5366_v30 = vmul.f32 %v4186_v58, %v6638_v43 }
 0x394   : > { %v1330_v51 = vpop.xlane.xlu1 %1329 }
 0x395   : > { %6639 = vst [vmem:[#allocation122_spill] sm:$0xff] %v5366_v30  ;;  %4193 = vpow2.f32 %v1381_v22  ;;  %v1361_v10 = vsub.f32 %v5239_v20, %v1330_v51  ;;  %979 = vadd.xlane.f32.xlu0 %v5366_v30  ;;  %v6642_v51 = vld [vmem:[#allocation35_spill] sm:$0xff] }
 0x396   : > { %v4188_v13 = vpop.eup %4187 }
 0x397   : > { %v1377_v4 = vmul.f32 1.442695, %v1361_v10  ;;  %v892_v62 = vpop.xlane.xlu0 %891  ;;  %v5371_v41 = vmul.f32 %v4188_v13, %v6640_v35 }
 0x398   : > { %v908_v7 = vsub.f32 %v5246_v31, %v892_v62  ;;  %v1342_v37 = vpop.xlane.xlu1 %1341 }
 0x399   : > { %6641 = vst [vmem:[#allocation123_spill] sm:$0xff] %v5371_v41  ;;  %4195 = vpow2.f32 %v1377_v4  ;;  %v1367_v50 = vsub.f32 %v5242_v53, %v1342_v37  ;;  %975 = vadd.xlane.f32.xlu0 %v5371_v41  ;;  %v6643_v41 = vld [vmem:[#allocation33_spill] sm:$0xff] }
 0x39a   : > { %v4190_v58 = vpop.eup %4189  ;;  %v939_v22 = vmul.f32 1.442695, %v908_v7 }
 0x39b   : > { %v1389_v33 = vmul.f32 1.442695, %v1367_v50  ;;  %v888_v20 = vpop.xlane.xlu0 %887  ;;  %v5377_v30 = vmul.f32 %v4190_v58, %v6642_v51 }
 0x39c   : > { %4197 = vpow2.f32 %v939_v22  ;;  %v906_v10 = vsub.f32 %v5251_v63, %v888_v20  ;;  %v1338_v13 = vpop.xlane.xlu1 %1337 }
 0x39d   : > { %4199 = vpow2.f32 %v1389_v33  ;;  %v1365_v31 = vsub.f32 %v5254_v5, %v1338_v13  ;;  %985 = vadd.xlane.f32.xlu1 %v5377_v30 }
 0x39e   : > { %v4192_v4 = vpop.eup %4191  ;;  %v935_v53 = vmul.f32 1.442695, %v906_v10 }
 0x39f   : > { %v1385_v62 = vmul.f32 1.442695, %v1365_v31  ;;  %v1336_v37 = vpop.xlane.xlu0 %1335  ;;  %v5383_v7 = vmul.f32 %v4192_v4, %v6643_v41 }
 0x3a0   : > { %4201 = vpow2.f32 %v935_v53  ;;  %v1364_v50 = vsub.f32 %v5262_v16, %v1336_v37  ;;  %v1350_v58 = vpop.xlane.xlu1 %1349 }
 0x3a1   : > { %4203 = vpow2.f32 %v1385_v62  ;;  %v1371_v63 = vsub.f32 %v5258_v21, %v1350_v58  ;;  %981 = vadd.xlane.f32.xlu1 %v5383_v7 }
 0x3a2   : > { %v4194_v33 = vpop.eup %4193  ;;  %v1383_v5 = vmul.f32 1.442695, %v1364_v50 }
 0x3a3   : > { %v1397_v22 = vmul.f32 1.442695, %v1371_v63  ;;  %v1332_v20 = vpop.xlane.xlu0 %1331  ;;  %v5389_v10 = vmul.f32 %v4194_v33, %v6554_v2 }
 0x3a4   : > { %4205 = vpow2.f32 %v1383_v5  ;;  %v1362_v13 = vsub.f32 %v5267_v26, %v1332_v20  ;;  %v1346_v31 = vpop.xlane.xlu1 %1345  ;;  %v6644_v5 = vld [vmem:[#allocation36_spill] sm:$0xff] }
 0x3a5   : > { %4207 = vpow2.f32 %v1397_v22  ;;  %v1369_v16 = vsub.f32 %v5270_v8, %v1346_v31  ;;  %1429 = vadd.xlane.f32.xlu1 %v5389_v10 }
 0x3a6   : > { %v4196_v4 = vpop.eup %4195  ;;  %v1379_v21 = vmul.f32 1.442695, %v1362_v13 }
 0x3a7   : > { %v1393_v53 = vmul.f32 1.442695, %v1369_v16  ;;  %v1344_v62 = vpop.xlane.xlu0 %1343  ;;  %v5395_v37 = vmul.f32 %v4196_v4, %v6555_v0 }
 0x3a8   : > { %4209 = vpow2.f32 %v1379_v21  ;;  %v1368_v50 = vsub.f32 %v5278_v15, %v1344_v62  ;;  %v1358_v58 = vpop.xlane.xlu1 %1357  ;;  %v6645_v62 = vld [vmem:[#allocation34_spill] sm:$0xff] }
 0x3a9   : > { %v4198_v63 = vpop.eup %4197  ;;  %4211 = vpow2.f32 %v1393_v53  ;;  %v1375_v26 = vsub.f32 %v5274_v17, %v1358_v58  ;;  %1425 = vadd.xlane.f32.xlu1 %v5395_v37 }
 0x3aa   : > { %v4200_v8 = vpop.eup %4199  ;;  %v1391_v33 = vmul.f32 1.442695, %v1368_v50  ;;  %v5401_v22 = vmul.f32 %v4198_v63, %v6644_v5 }
 0x3ab   : > { %v1405_v20 = vmul.f32 1.442695, %v1375_v26  ;;  %v1340_v13 = vpop.xlane.xlu0 %1339  ;;  %v5404_v31 = vmul.f32 %v4200_v8, %v6629_v44 }
 0x3ac   : > { %4213 = vpow2.f32 %v1391_v33  ;;  %v1366_v15 = vsub.f32 %v5283_v11, %v1340_v13  ;;  %v1354_v16 = vpop.xlane.xlu1 %1353  ;;  %987 = vadd.xlane.f32.xlu0 %v5401_v22 }
 0x3ad   : > { %v4202_v4 = vpop.eup %4201  ;;  %4215 = vpow2.f32 %v1405_v20  ;;  %v1373_v17 = vsub.f32 %v5286_v24, %v1354_v16  ;;  %1437 = vadd.xlane.f32.xlu1 %v5404_v31 }
 0x3ae   : > { %v4204_v21 = vpop.eup %4203  ;;  %v1387_v53 = vmul.f32 1.442695, %v1366_v15  ;;  %v5411_v50 = vmul.f32 %v4202_v4, %v6645_v62 }
 0x3af   : > { %v1401_v58 = vmul.f32 1.442695, %v1373_v17  ;;  %v1352_v63 = vpop.xlane.xlu0 %1351  ;;  %v5414_v26 = vmul.f32 %v4204_v21, %v6631_v57 }
 0x3b0   : > { %4217 = vpow2.f32 %v1387_v53  ;;  %v1372_v11 = vsub.f32 %v5291_v36, %v1352_v63  ;;  %983 = vadd.xlane.f32.xlu0 %v5411_v50 }
 0x3b1   : > { %v4206_v8 = vpop.eup %4205  ;;  %4219 = vpow2.f32 %v1401_v58  ;;  %1433 = vadd.xlane.f32.xlu1 %v5414_v26 }
 0x3b2   : > { %v4208_v24 = vpop.eup %4207  ;;  %v1399_v33 = vmul.f32 1.442695, %v1372_v11  ;;  %v5420_v20 = vmul.f32 %v4206_v8, %v6628_v47 }
 0x3b3   : > { %v1348_v13 = vpop.xlane.xlu0 %1347  ;;  %v5423_v15 = vmul.f32 %v4208_v24, %v6634_v42 }
 0x3b4   : > { %4221 = vpow2.f32 %v1399_v33  ;;  %v1370_v16 = vsub.f32 %v5295_v34, %v1348_v13  ;;  %1431 = vadd.xlane.f32.xlu0 %v5420_v20 }
 0x3b5   : > { %v4210_v36 = vpop.eup %4209  ;;  %1445 = vadd.xlane.f32.xlu1 %v5423_v15 }
 0x3b6   : > { %v4212_v4 = vpop.eup %4211  ;;  %v1395_v17 = vmul.f32 1.442695, %v1370_v16  ;;  %v5429_v21 = vmul.f32 %v4210_v36, %v6630_v54 }
 0x3b7   : > { %v1360_v53 = vpop.xlane.xlu0 %1359  ;;  %v5432_v58 = vmul.f32 %v4212_v4, %v6636_v39 }
 0x3b8   : > { %4223 = vpow2.f32 %v1395_v17  ;;  %v1376_v63 = vsub.f32 %v5299_v56, %v1360_v53  ;;  %1427 = vadd.xlane.f32.xlu0 %v5429_v21 }
 0x3b9   : > { %v4214_v34 = vpop.eup %4213  ;;  %1441 = vadd.xlane.f32.xlu1 %v5432_v58 }
 0x3ba   : > { %v4216_v11 = vpop.eup %4215  ;;  %v1407_v8 = vmul.f32 1.442695, %v1376_v63  ;;  %v5438_v24 = vmul.f32 %v4214_v34, %v6632_v55 }
 0x3bb   : > { %v1356_v33 = vpop.xlane.xlu0 %1355  ;;  %v5441_v13 = vmul.f32 %v4216_v11, %v6642_v51 }
 0x3bc   : > { %4225 = vpow2.f32 %v1407_v8  ;;  %v1374_v16 = vsub.f32 %v5303_v32, %v1356_v33  ;;  %1439 = vadd.xlane.f32.xlu0 %v5438_v24 }
 0x3bd   : > { %v4218_v56 = vpop.eup %4217  ;;  %1453 = vadd.xlane.f32.xlu1 %v5441_v13 }
 0x3be   : > { %v4220_v36 = vpop.eup %4219  ;;  %v1403_v4 = vmul.f32 1.442695, %v1374_v16  ;;  %v5447_v17 = vmul.f32 %v4218_v56, %v6633_v27 }
 0x3bf   : > { %v5450_v53 = vmul.f32 %v4220_v36, %v6643_v41  ;;  %v6646_v36 = vld [vmem:[#allocation101_spill] sm:$0xff] }
 0x3c0   : > { %4227 = vpow2.f32 %v1403_v4  ;;  %1435 = vadd.xlane.f32.xlu0 %v5447_v17 }
 0x3c1   : > { %v4222_v63 = vpop.eup %4221  ;;  %1449 = vadd.xlane.f32.xlu1 %v5450_v53 }
 0x3c2   : > { %v5455_v32 = vmul.f32 %v4222_v63, %v6638_v43 }
 0x3c4   : > { %1447 = vadd.xlane.f32.xlu0 %v5455_v32 }
 0x3c5   : > { %v4224_v34 = vpop.eup %4223 }
 0x3c6   : > { %v5459_v11 = vmul.f32 %v4224_v34, %v6640_v35 }
 0x3c8   : > { %1443 = vadd.xlane.f32.xlu0 %v5459_v11 }
 0x3c9   : > { %v4226_v8 = vpop.eup %4225 }
 0x3ca   : > { %v5463_v33 = vmul.f32 %v4226_v8, %v6644_v5 }
 0x3cc   : > { %1455 = vadd.xlane.f32.xlu0 %v5463_v33 }
 0x3cd   : > { %v4228_v16 = vpop.eup %4227 }
 0x3ce   : > { %v5467_v56 = vmul.f32 %v4228_v16, %v6645_v62 }
 0x3d0   : > { %1451 = vadd.xlane.f32.xlu0 %v5467_v56 }
 0x3d2   : > { %1523 = vrot.lane.b32.xlu1 %v5106_v25, %s4656_s7 }
 0x3d6   : > { %1894 = vrot.lane.b32.xlu1 %v4999_v49, %s4657_s8 }
 0x3da   : > { %1896 = vrot.lane.b32.xlu1 %v5002_v59, %s4657_s8 }
 0x3de   : > { %1900 = vrot.lane.b32.xlu1 %v5018_v19, %s4657_s8 }
 0x3e2   : > { %1904 = vrot.lane.b32.xlu1 %v5032_v23, %s4657_s8 }
 0x3e6   : > { %1908 = vrot.lane.b32.xlu1 %v5046_v61, %s4657_s8  ;;  %1521 = vrot.lane.b32.xlu0 %v5111_v14, %s4656_s7 }
 0x3ea   : > { %2261 = vrot.lane.b32.xlu1 %v5080_v29, %s4657_s8  ;;  %1898 = vrot.lane.b32.xlu0 %v5015_v18, %s4657_s8 }
 0x3ee   : > { %2257 = vrot.lane.b32.xlu1 %v5064_v28, %s4657_s8  ;;  %1902 = vrot.lane.b32.xlu0 %v5029_v6, %s4657_s8 }
 0x3f2   : > { %1906 = vrot.lane.b32.xlu0 %v5043_v38, %s4657_s8 }
 0x3f6   : > { %2259 = vrot.lane.b32.xlu0 %v5083_v52, %s4657_s8 }
 0x3fa   : > { %2255 = vrot.lane.b32.xlu0 %v6646_v36, %s4657_s8  ;;  %v962_v4 = vpop.xlane.xlu1 %961 }
 0x3fb   : > { %v991_v29 = vadd.f32 1e-09, %v962_v4 }
 0x3fe   : > { %v958_v63 = vpop.xlane.xlu1 %957 }
 0x3ff   : > { %v989_v16 = vadd.f32 1e-09, %v958_v63 }
 0x402   : > { %v964_v34 = vpop.xlane.xlu0 %963 }
 0x403   : > { %v992_v8 = vadd.f32 1e-09, %v964_v34 }
 0x405   : > { %4229 = vrcp.f32 %v992_v8 }
 0x406   : > { %v970_v61 = vpop.xlane.xlu1 %969  ;;  %v960_v28 = vpop.xlane.xlu0 %959  ;;  %4231 = vrcp.f32 %v989_v16  ;;  %v6648_v16 = vld [vmem:[#allocation119_spill] sm:$0xff] }
 0x407   : > { %v990_v23 = vadd.f32 1e-09, %v960_v28  ;;  %4233 = vrcp.f32 %v991_v29  ;;  %v995_v19 = vadd.f32 1e-09, %v970_v61 }
 0x409   : > { %4235 = vrcp.f32 %v990_v23 }
 0x40a   : > { %v966_v38 = vpop.xlane.xlu1 %965 }
 0x40b   : > { %v993_v18 = vadd.f32 1e-09, %v966_v38 }
 0x40e   : > { %v972_v6 = vpop.xlane.xlu0 %971 }
 0x40f   : > { %v996_v52 = vadd.f32 1e-09, %v972_v6 }
 0x411   : > { %4237 = vrcp.f32 %v996_v52 }
 0x412   : > { %v968_v36 = vpop.xlane.xlu0 %967  ;;  %4239 = vrcp.f32 %v993_v18  ;;  %v4230_v59 = vpop.eup %4229  ;;  %v6647_v18 = vld [vmem:[#allocation118_spill] sm:$0xff] }
 0x413   : > { %v994_v14 = vadd.f32 1e-09, %v968_v36  ;;  %4241 = vrcp.f32 %v995_v19  ;;  %v4232_v63 = vpop.eup %4231  ;;  %v1024_v28 = vmul.f32 %v4230_v59, %v5327_v45 }
 0x414   : > { %v4234_v4 = vpop.eup %4233  ;;  %v1021_v23 = vmul.f32 %v4232_v63, %v5322_v46 }
 0x415   : > { %4243 = vrcp.f32 %v994_v14  ;;  %v1023_v6 = vmul.f32 %v4234_v4, %v5317_v9  ;;  %v6649_v4 = vld [vmem:[#allocation114_spill] sm:$0xff] }
 0x416   : > { %v978_v34 = vpop.xlane.xlu1 %977  ;;  %v4236_v8 = vpop.eup %4235 }
 0x417   : > { %v1022_v29 = vmul.f32 %v4236_v8, %v5335_v48  ;;  %v1038_v61 = vpack.c.bf16 %v1024_v28, %v1023_v6  ;;  %v999_v45 = vadd.f32 1e-09, %v978_v34 }
 0x419   : > { %v1037_v38 = vpack.c.bf16 %v1022_v29, %v1021_v23 }
 0x41a   : > { %v974_v52 = vpop.xlane.xlu1 %973 }
 0x41b   : > { %3876 = vmatprep.mubr.bf16.mxu0 %v1037_v38  ;;  %v997_v36 = vadd.f32 1e-09, %v974_v52  ;;  %v6650_v38 = vld [vmem:[#allocation117_spill] sm:$0xff] }
 0x41c   : > { %3877 = vmatmul.mubr.bf16.vlgmr.msra.gmra.mxu0 %v1038_v61  ;;  %v6651_v61 = vld [vmem:[#allocation116_spill] sm:$0xff] }
 0x41d   : > { %3913 = vmatpush3.bf16.msra.mxu0 %v6647_v18 }
 0x41e   : > { %v980_v19 = vpop.xlane.xlu0 %979  ;;  %v4238_v14 = vpop.eup %4237  ;;  %3914 = vmatprep.subr.bf16.mxu0 %v6648_v16 }
 0x41f   : > { %v1000_v49 = vadd.f32 1e-09, %v980_v19  ;;  %v4240_v59 = vpop.eup %4239  ;;  %v1028_v48 = vmul.f32 %v4238_v14, %v5346_v60  ;;  %v6652_v14 = vld [vmem:[#allocation122_spill] sm:$0xff] }
 0x420   : > { %v4242_v46 = vpop.eup %4241  ;;  %v1025_v28 = vmul.f32 %v4240_v59, %v5341_v12 }
 0x421   : > { %4245 = vrcp.f32 %v1000_v49  ;;  %3915 = vmatpush3.bf16.msra.mxu0 %v6648_v16  ;;  %v1027_v29 = vmul.f32 %v4242_v46, %v5332_v1  ;;  %v6653_v16 = vld [vmem:[#allocation121_spill] sm:$0xff] }
 0x422   : > { %v4244_v63 = vpop.eup %4243  ;;  %v976_v9 = vpop.xlane.xlu0 %975  ;;  %4247 = vrcp.f32 %v997_v36  ;;  %3916 = vmatprep.subr.bf16.mxu0 %v6649_v4 }
 0x423   : > { %v998_v8 = vadd.f32 1e-09, %v976_v9  ;;  %v1026_v23 = vmul.f32 %v4244_v63, %v5351_v40  ;;  %4249 = vrcp.f32 %v999_v45  ;;  %v1040_v6 = vpack.c.bf16 %v1028_v48, %v1027_v29  ;;  %v6654_v45 = vld [vmem:[#allocation123_spill] sm:$0xff]  ;;  %v6655_v63 = vld [vmem:[#allocation120_spill] sm:$0xff] }
 0x425   : > { %4251 = vrcp.f32 %v998_v8  ;;  %v1039_v34 = vpack.c.bf16 %v1026_v23, %v1025_v28  ;;  %3917 = vmatpush3.bf16.msra.mxu0 %v6649_v4 }
 0x426   : > { %v986_v49 = vpop.xlane.xlu1 %985  ;;  %3918 = vmatprep.subr.bf16.mxu0 %v6650_v38 }
 0x427   : > { %3880 = vmatprep.mubr.bf16.mxu0 %v1039_v34  ;;  %v1003_v34 = vadd.f32 1e-09, %v986_v49 }
 0x428   : > { %3881 = vmatmul.mubr.bf16.gmra.mxu0 %v1040_v6 }
 0x429   : > { %3919 = vmatpush3.bf16.msra.mxu0 %v6650_v38 }
 0x42a   : > { %v982_v60 = vpop.xlane.xlu1 %981  ;;  %3920 = vmatprep.subr.bf16.mxu0 %v6651_v61 }
 0x42b   : > { %v1001_v8 = vadd.f32 1e-09, %v982_v60 }
 0x42d   : > { %3921 = vmatpush3.bf16.msra.mxu0 %v6651_v61 }
 0x42e   : > { %v1430_v40 = vpop.xlane.xlu1 %1429  ;;  %v4246_v12 = vpop.eup %4245  ;;  %3922 = vmatprep.subr.bf16.mxu0 %v5310_v3 }
 0x42f   : > { %v4248_v1 = vpop.eup %4247  ;;  %v1032_v36 = vmul.f32 %v4246_v12, %v6652_v14 }
 0x430   : > { %v4250_v52 = vpop.eup %4249  ;;  %v1029_v59 = vmul.f32 %v4248_v1, %v6653_v16 }
 0x431   : > { %3923 = vmatpush3.bf16.msra.mxu0 %v5310_v3  ;;  %v1031_v9 = vmul.f32 %v4250_v52, %v6655_v63 }
 0x432   : > { %v4252_v18 = vpop.eup %4251  ;;  %v1426_v19 = vpop.xlane.xlu1 %1425 }
 0x433   : > { %v1030_v46 = vmul.f32 %v4252_v18, %v6654_v45  ;;  %v1042_v29 = vpack.c.bf16 %v1032_v36, %v1031_v9  ;;  %v1457_v12 = vadd.f32 1e-09, %v1426_v19 }
 0x435   : > { %v988_v48 = vpop.xlane.xlu0 %987  ;;  %v1041_v4 = vpack.c.bf16 %v1030_v46, %v1029_v59 }
 0x436   : > { %v1004_v28 = vadd.f32 1e-09, %v988_v48  ;;  %v1438_v23 = vpop.xlane.xlu1 %1437  ;;  %v1459_v48 = vadd.f32 1e-09, %v1430_v40 }
 0x437   : > { %3884 = vmatprep.mubr.bf16.mxu0 %v1041_v4 }
 0x438   : > { %3885 = vmatmul.mubr.bf16.gmra.mxu0 %v1042_v29  ;;  %4253 = vrcp.f32 %v1004_v28 }
 0x439   : > { %v984_v3 = vpop.xlane.xlu0 %983  ;;  %4255 = vrcp.f32 %v1001_v8 }
 0x43a   : > { %v1002_v6 = vadd.f32 1e-09, %v984_v3  ;;  %v1434_v38 = vpop.xlane.xlu1 %1433  ;;  %4257 = vrcp.f32 %v1003_v34 }
 0x43b   : > { %v1461_v29 = vadd.f32 1e-09, %v1434_v38 }
 0x43c   : > { %4259 = vrcp.f32 %v1002_v6 }
 0x43d   : > { %v1432_v61 = vpop.xlane.xlu0 %1431  ;;  %4261 = vrcp.f32 %v1457_v12 }
 0x43e   : > { %v1446_v1 = vpop.xlane.xlu1 %1445  ;;  %v1460_v45 = vadd.f32 1e-09, %v1432_v61 }
 0x43f   : > { %v1467_v3 = vadd.f32 1e-09, %v1446_v1 }
 0x441   : > { %v1428_v52 = vpop.xlane.xlu0 %1427 }
 0x442   : > { %v1458_v18 = vadd.f32 1e-09, %v1428_v52  ;;  %v1442_v60 = vpop.xlane.xlu1 %1441 }
 0x443   : > { %v1465_v52 = vadd.f32 1e-09, %v1442_v60 }
 0x444   : > { %4263 = vrcp.f32 %v1458_v18 }
 0x445   : > { %v1440_v14 = vpop.xlane.xlu0 %1439  ;;  %v4254_v36 = vpop.eup %4253  ;;  %4265 = vrcp.f32 %v1460_v45 }
 0x446   : > { %v1454_v49 = vpop.xlane.xlu1 %1453  ;;  %v4256_v16 = vpop.eup %4255  ;;  %v1036_v9 = vmul.f32 %v4254_v36, %v5401_v22  ;;  %v1464_v36 = vadd.f32 1e-09, %v1440_v14 }
 0x447   : > { %v4258_v59 = vpop.eup %4257  ;;  %v1033_v19 = vmul.f32 %v4256_v16, %v5383_v7  ;;  %v1463_v7 = vadd.f32 1e-09, %v1438_v23  ;;  %v1471_v23 = vadd.f32 1e-09, %v1454_v49 }
 0x448   : > { %v1035_v34 = vmul.f32 %v4258_v59, %v5377_v30 }
 0x449   : > { %v4260_v46 = vpop.eup %4259  ;;  %v1436_v63 = vpop.xlane.xlu0 %1435 }
 0x44a   : > { %v1462_v4 = vadd.f32 1e-09, %v1436_v63  ;;  %v1450_v8 = vpop.xlane.xlu1 %1449  ;;  %v1034_v28 = vmul.f32 %v4260_v46, %v5411_v50  ;;  %v1044_v61 = vpack.c.bf16 %v1036_v9, %v1035_v34  ;;  %v4262_v40 = vpop.eup %4261 }
 0x44b   : > { %v1489_v60 = vmul.f32 %v4262_v40, %v5395_v37  ;;  %v1469_v45 = vadd.f32 1e-09, %v1450_v8  ;;  %v6656_v40 = vld [vmem:[#allocation78_spill] sm:$0xff] }
 0x44c   : > { %v1043_v6 = vpack.c.bf16 %v1034_v28, %v1033_v19  ;;  %4267 = vrcp.f32 %v1462_v4 }
 0x44d   : > { %v1448_v12 = vpop.xlane.xlu0 %1447  ;;  %4269 = vrcp.f32 %v1459_v48 }
 0x44e   : > { %v1468_v18 = vadd.f32 1e-09, %v1448_v12  ;;  %v1524_v22 = vpop.permute.xlu1 %1523  ;;  %3888 = vmatprep.mubr.bf16.mxu0 %v1043_v6  ;;  %4271 = vrcp.f32 %v1461_v29 }
 0x44f   : > { %3889 = vmatmul.mubr.bf16.gmra.mxu0 %v1044_v61  ;;  %3924 = vmatprep.subr.bf16.mxu0 %v1524_v22  ;;  %4273 = vrcp.f32 %v1467_v3 }
 0x450   : > { %4134 = vmatprep.subr.bf16.mxu1 %v1524_v22  ;;  %3925 = vmatpush3.bf16.msra.mxu0 %v1524_v22  ;;  %4275 = vrcp.f32 %v1468_v18 }
 0x451   : > { %v4264_v30 = vpop.eup %4263  ;;  %4142 = vmatpush3.bf16.msra.mxu1 %v1524_v22  ;;  %v1444_v50 = vpop.xlane.xlu0 %1443  ;;  %4277 = vrcp.f32 %v1465_v52 }
 0x452   : > { %v1466_v38 = vadd.f32 1e-09, %v1444_v50  ;;  %v5525_v1 = vpop.permute.xlu1 %1894  ;;  %v1490_v16 = vmul.f32 %v4264_v30, %v5429_v21  ;;  %4279 = vrcp.f32 %v1464_v36  ;;  %v4266_v9 = vpop.eup %4265 }
 0x453   : > { %v1492_v29 = vmul.f32 %v4266_v9, %v5420_v20  ;;  %v6657_v20 = vld [vmem:[#allocation80_spill] sm:$0xff]  ;;  %v6659_v9 = vld [vmem:[#allocation79_spill] sm:$0xff] }
 0x454   : > { %4281 = vrcp.f32 %v1466_v38  ;;  %v1505_v14 = vpack.c.bf16 %v1490_v16, %v1489_v60  ;;  %v6658_v16 = vld [vmem:[#allocation77_spill] sm:$0xff] }
 0x455   : > { %v1456_v59 = vpop.xlane.xlu0 %1455  ;;  %4283 = vrcp.f32 %v1463_v7 }
 0x456   : > { %v1472_v46 = vadd.f32 1e-09, %v1456_v59  ;;  %v5529_v63 = vpop.permute.xlu1 %1896  ;;  %3928 = vmatprep.mubr.bf16.mxu0 %v1505_v14 }
 0x458   : > { %4285 = vrcp.f32 %v1472_v46 }
 0x459   : > { %v1452_v48 = vpop.xlane.xlu0 %1451  ;;  %v4268_v4 = vpop.eup %4267  ;;  %4287 = vrcp.f32 %v1469_v45 }
 0x45a   : > { %v1470_v19 = vadd.f32 1e-09, %v1452_v48  ;;  %v5531_v37 = vpop.permute.xlu1 %1900  ;;  %v4270_v21 = vpop.eup %4269  ;;  %4289 = vrcp.f32 %v1471_v23  ;;  %v1494_v3 = vmul.f32 %v4268_v4, %v5447_v17 }
 0x45b   : > { %v4272_v28 = vpop.eup %4271  ;;  %v1491_v12 = vmul.f32 %v4270_v21, %v5389_v10 }
 0x45c   : > { %4291 = vrcp.f32 %v1470_v19  ;;  %v4274_v8 = vpop.eup %4273  ;;  %v1493_v52 = vmul.f32 %v4272_v28, %v5414_v26  ;;  %v6661_v19 = vld [vmem:[#allocation110_spill] sm:$0xff] }
 0x45d   : > { %v1522_v34 = vpop.permute.xlu0 %1521  ;;  %v4276_v6 = vpop.eup %4275  ;;  %v1506_v22 = vpack.c.bf16 %v1492_v29, %v1491_v12  ;;  %v1499_v26 = vmul.f32 %v4274_v8, %v5423_v15 }
 0x45e   : > { %v5535_v49 = vpop.permute.xlu1 %1904  ;;  %3926 = vmatprep.subr.bf16.mxu0 %v1522_v34  ;;  %4135 = vmatprep.subr.bf16.mxu1 %v1522_v34  ;;  %v4278_v61 = vpop.eup %4277  ;;  %v1507_v17 = vpack.c.bf16 %v1494_v3, %v1493_v52  ;;  %v1500_v30 = vmul.f32 %v4276_v6, %v5455_v32 }
 0x45f   : > { %3927 = vmatpush3.bf16.msra.mxu0 %v1522_v34  ;;  %4143 = vmatpush3.bf16.msra.mxu1 %v1522_v34  ;;  %v4280_v18 = vpop.eup %4279  ;;  %v1497_v10 = vmul.f32 %v4278_v61, %v5432_v58 }
 0x460   : > { %3964 = vmatprep.subr.bf16.mxu0 %v6656_v40  ;;  %3944 = vmatprep.subr.bf16.mxu1 %v6657_v20  ;;  %v1496_v14 = vmul.f32 %v4280_v18, %v5438_v24  ;;  %v1510_v59 = vpack.c.bf16 %v1500_v30, %v1499_v26 }
 0x461   : > { %v4282_v36 = vpop.eup %4281 }
 0x462   : > { %v5542_v7 = vpop.permute.xlu1 %1908  ;;  %3929 = vmatmul.mubr.bf16.vlgmr.msra.gmra.mxu0 %v1506_v22  ;;  %v1498_v50 = vmul.f32 %v4282_v36, %v5459_v11  ;;  %v4284_v38 = vpop.eup %4283 }
 0x463   : > { %3932 = vmatprep.mubr.bf16.mxu0 %v1507_v17  ;;  %3965 = vmatpush3.bf16.msra.mxu0 %v6656_v40  ;;  %v1495_v46 = vmul.f32 %v4284_v38, %v5404_v31  ;;  %v6660_v31 = vld [vmem:[#allocation109_spill] sm:$0xff] }
 0x464   : > { %v1509_v60 = vpack.c.bf16 %v1498_v50, %v1497_v10  ;;  %3966 = vmatprep.subr.bf16.mxu0 %v6658_v16  ;;  %v5559_v21 = vpack.c.bf16 %v6661_v19, %v6660_v31 }
 0x465   : > { %v4286_v32 = vpop.eup %4285  ;;  %v1508_v15 = vpack.c.bf16 %v1496_v14, %v1495_v46 }
 0x466   : > { %v2262_v45 = vpop.permute.xlu1 %2261  ;;  %3936 = vmatprep.mubr.bf16.mxu1 %v1509_v60  ;;  %v4288_v58 = vpop.eup %4287  ;;  %v1504_v24 = vmul.f32 %v4286_v32, %v5463_v33 }
 0x467   : > { %3937 = vmatmul.mubr.bf16.vlgmr.msra.gmra.mxu1 %v1510_v59  ;;  %3967 = vmatpush3.bf16.msra.mxu0 %v6658_v16  ;;  %v4290_v11 = vpop.eup %4289  ;;  %v1501_v48 = vmul.f32 %v4288_v58, %v5450_v53  ;;  %v5564_v33 = vpop.permute.xlu0 %1898 }
 0x468   : > { %3945 = vmatpush3.bf16.msra.mxu1 %v6657_v20  ;;  %4004 = vmatprep.subr.bf16.mxu0 %v2262_v45  ;;  %v1503_v28 = vmul.f32 %v4290_v11, %v5441_v13 }
 0x469   : > { %v4292_v23 = vpop.eup %4291  ;;  %3946 = vmatprep.subr.bf16.mxu1 %v6659_v9 }
 0x46a   : > { %3933 = vmatmul.mubr.bf16.gmra.mxu0 %v1508_v15  ;;  %v1502_v4 = vmul.f32 %v4292_v23, %v5467_v56  ;;  %v1512_v8 = vpack.c.bf16 %v1504_v24, %v1503_v28  ;;  %v2258_v36 = vpop.permute.xlu1 %2257 }
 0x46b   : > { %v5566_v34 = vpop.permute.xlu0 %1902 }
 0x46c   : > { %3947 = vmatpush3.bf16.msra.mxu1 %v6659_v9  ;;  %v1511_v29 = vpack.c.bf16 %v1502_v4, %v1501_v48 }
 0x46d   : > { %3984 = vmatprep.subr.bf16.mxu1 %v5559_v21 }
 0x46e   : > { %3940 = vmatprep.mubr.bf16.mxu1 %v1511_v29 }
 0x46f   : > { %3941 = vmatmul.mubr.bf16.gmra.mxu1 %v1512_v8  ;;  %v5568_v6 = vpop.permute.xlu0 %1906 }
 0x473   : > { %v2260_v52 = vpop.permute.xlu0 %2259 }
 0x477   : > { %v2256_v50 = vpop.permute.xlu0 %2255 }
 0x4dc   : > { %v3878_v53 = vpop.f32.mrf.mxu0 }
 0x4de   : > { %v1079_v56 = vpop.f32.mrf.mxu0 }
 0x4e0   : > { %v3879_v3 = vpop.f32.mrf.mxu0 }
 0x4e1   : > { %v1143_v13 = vpack.c.bf16 %v3879_v3, %v3878_v53 }
 0x4e2   : > { %v1082_v12 = vpop.f32.mrf.mxu0 }
 0x4e3   : > { %v1142_v61 = vpack.c.bf16 %v1082_v12, %v1079_v56  ;;  %v6662_v12 = vld [vmem:[#allocation107_spill] sm:$0xff] }
 0x4e5   : > { %3968 = vmatprep.mubr.msk.bf16.mxu0 %vm707_vm0, %v1142_v61  ;;  %v6663_v61 = vld [vmem:[#allocation108_spill] sm:$0xff] }
 0x4e6   : > { %3969 = vmatmul.mubr.msk.bf16.vlgmr.msra.gmra.mxu0 %vm707_vm0, %v1143_v13  ;;  %v1892_v13 = vpack.c.bf16 %v6663_v61, %v6662_v12 }
 0x4e7   : > { %4005 = vmatpush3.bf16.msra.mxu0 %v2262_v45 }
 0x4e8   : > { %v3882_v18 = vpop.f32.mrf.mxu0  ;;  %4006 = vmatprep.subr.bf16.mxu0 %v2260_v52 }
 0x4ea   : > { %v1095_v22 = vpop.f32.mrf.mxu0 }
 0x4eb   : > { %4007 = vmatpush3.bf16.msra.mxu0 %v2260_v52 }
 0x4ec   : > { %v3883_v17 = vpop.f32.mrf.mxu0  ;;  %4008 = vmatprep.subr.bf16.mxu0 %v2258_v36 }
 0x4ed   : > { %v1145_v38 = vpack.c.bf16 %v3883_v17, %v3882_v18 }
 0x4ee   : > { %v1098_v30 = vpop.f32.mrf.mxu0 }
 0x4ef   : > { %v1144_v10 = vpack.c.bf16 %v1098_v30, %v1095_v22  ;;  %4009 = vmatpush3.bf16.msra.mxu0 %v2258_v36 }
 0x4f0   : > { %4010 = vmatprep.subr.bf16.mxu0 %v2256_v50 }
 0x4f1   : > { %3972 = vmatprep.mubr.msk.bf16.mxu0 %vm707_vm0, %v1144_v10 }
 0x4f2   : > { %3973 = vmatmul.mubr.msk.bf16.gmra.mxu0 %vm707_vm0, %v1145_v38  ;;  %v6664_v38 = vld [vmem:[#allocation82_spill] sm:$0xff] }
 0x4f3   : > { %4011 = vmatpush3.bf16.msra.mxu0 %v2256_v50 }
 0x4f8   : > { %v3886_v26 = vpop.f32.mrf.mxu0 }
 0x4fa   : > { %v1111_v60 = vpop.f32.mrf.mxu0 }
 0x4fc   : > { %v3887_v14 = vpop.f32.mrf.mxu0 }
 0x4fd   : > { %v1147_v45 = vpack.c.bf16 %v3887_v14, %v3886_v26 }
 0x4fe   : > { %v1114_v59 = vpop.f32.mrf.mxu0 }
 0x4ff   : > { %v1146_v32 = vpack.c.bf16 %v1114_v59, %v1111_v60 }
 0x501   : > { %3976 = vmatprep.mubr.msk.bf16.mxu0 %vm707_vm0, %v1146_v32 }
 0x502   : > { %3977 = vmatmul.mubr.msk.bf16.gmra.mxu0 %vm707_vm0, %v1147_v45  ;;  %v6665_v45 = vld [vmem:[#allocation81_spill] sm:$0xff] }
 0x50f   : > { %v3890_v46 = vpop.f32.mrf.mxu0 }
 0x511   : > { %v1127_v58 = vpop.f32.mrf.mxu0 }
 0x513   : > { %v3891_v11 = vpop.f32.mrf.mxu0 }
 0x514   : > { %v1149_v24 = vpack.c.bf16 %v3891_v11, %v3890_v46 }
 0x515   : > { %v1130_v15 = vpop.f32.mrf.mxu0 }
 0x516   : > { %v1148_v23 = vpack.c.bf16 %v1130_v15, %v1127_v58 }
 0x518   : > { %3980 = vmatprep.mubr.msk.bf16.mxu0 %vm707_vm0, %v1148_v23 }
 0x519   : > { %3981 = vmatmul.mubr.msk.bf16.gmra.mxu0 %vm707_vm0, %v1149_v24 }
 0x522   : > { %v3930_v48 = vpop.f32.mrf.mxu0 }
 0x524   : > { %v1579_v4 = vpop.f32.mrf.mxu0 }
 0x526   : > { %v3931_v31 = vpop.f32.mrf.mxu0 }
 0x527   : > { %v3938_v19 = vpop.f32.mrf.mxu1  ;;  %v1643_v53 = vpack.c.bf16 %v3931_v31, %v3930_v48 }
 0x528   : > { %v1582_v28 = vpop.f32.mrf.mxu0 }
 0x529   : > { %v1642_v29 = vpack.c.bf16 %v1582_v28, %v1579_v4  ;;  %v1611_v8 = vpop.f32.mrf.mxu1 }
 0x52a   : > { %v3934_v56 = vpop.f32.mrf.mxu0 }
 0x52b   : > { %v3939_v3 = vpop.f32.mrf.mxu1  ;;  %3948 = vmatprep.mubr.msk.bf16.mxu1 %vm707_vm0, %v1642_v29 }
 0x52c   : > { %v1595_v52 = vpop.f32.mrf.mxu0  ;;  %3949 = vmatmul.mubr.msk.bf16.vlgmr.msra.gmra.mxu1 %vm707_vm0, %v1643_v53  ;;  %v1647_v14 = vpack.c.bf16 %v3939_v3, %v3938_v19 }
 0x52d   : > { %3985 = vmatpush3.bf16.msra.mxu1 %v5559_v21  ;;  %v1614_v18 = vpop.f32.mrf.mxu1 }
 0x52e   : > { %3986 = vmatprep.subr.bf16.mxu1 %v1892_v13  ;;  %v3935_v22 = vpop.f32.mrf.mxu0  ;;  %v1646_v26 = vpack.c.bf16 %v1614_v18, %v1611_v8 }
 0x52f   : > { %v3942_v36 = vpop.f32.mrf.mxu1  ;;  %v1645_v50 = vpack.c.bf16 %v3935_v22, %v3934_v56 }
 0x530   : > { %v1598_v17 = vpop.f32.mrf.mxu0 }
 0x531   : > { %v1644_v30 = vpack.c.bf16 %v1598_v17, %v1595_v52  ;;  %3987 = vmatpush3.bf16.msra.mxu1 %v1892_v13  ;;  %v1627_v10 = vpop.f32.mrf.mxu1 }
 0x532   : > { %4036 = vmatprep.subr.bf16.mxu1 %v6664_v38 }
 0x533   : > { %3952 = vmatprep.mubr.msk.bf16.mxu1 %vm707_vm0, %v1644_v30  ;;  %v3943_v60 = vpop.f32.mrf.mxu1 }
 0x534   : > { %3953 = vmatmul.mubr.msk.bf16.gmra.mxu1 %vm707_vm0, %v1645_v50  ;;  %v1649_v32 = vpack.c.bf16 %v3943_v60, %v3942_v36 }
 0x535   : > { %3956 = vmatprep.mubr.msk.bf16.mxu1 %vm707_vm0, %v1646_v26  ;;  %v1630_v21 = vpop.f32.mrf.mxu1 }
 0x536   : > { %v1648_v59 = vpack.c.bf16 %v1630_v21, %v1627_v10 }
 0x53c   : > { %3957 = vmatmul.mubr.msk.bf16.gmra.mxu1 %vm707_vm0, %v1647_v14 }
 0x53d   : > { %3960 = vmatprep.mubr.msk.bf16.mxu1 %vm707_vm0, %v1648_v59 }
 0x544   : > { %3961 = vmatmul.mubr.msk.bf16.gmra.mxu1 %vm707_vm0, %v1649_v32 }
 0x545   : > { %3988 = vmatprep.mubr.msk.bf16.mxu1 %vm707_vm0, %v5525_v1 }
 0x54c   : > { %3989 = vmatmul.mubr.msk.bf16.vlgmr.msra.gmra.mxu1 %vm707_vm0, %v5529_v63 }
 0x54d   : > { %3992 = vmatprep.mubr.msk.bf16.mxu1 %vm707_vm0, %v5564_v33  ;;  %4037 = vmatpush3.bf16.msra.mxu1 %v6664_v38 }
 0x54e   : > { %4038 = vmatprep.subr.bf16.mxu1 %v6665_v45 }
 0x551   : > { %4039 = vmatpush3.bf16.msra.mxu1 %v6665_v45  ;;  %v6696_v45 = vld [vmem:[#allocation42_spill] sm:$0xff] }
 0x554   : > { %3993 = vmatmul.mubr.msk.bf16.gmra.mxu1 %vm707_vm0, %v5531_v37 }
 0x555   : > { %3996 = vmatprep.mubr.msk.bf16.mxu1 %vm707_vm0, %v5566_v34 }
 0x55c   : > { %3997 = vmatmul.mubr.msk.bf16.gmra.mxu1 %vm707_vm0, %v5535_v49 }
 0x55d   : > { %4000 = vmatprep.mubr.msk.bf16.mxu1 %vm707_vm0, %v5568_v6 }
 0x564   : > { %4001 = vmatmul.mubr.msk.bf16.gmra.mxu1 %vm707_vm0, %v5542_v7 }
 0x5a6   : > { %v5609_v1 = vpop.f32.mrf.mxu0 }
 0x5a7   : > { %6666 = vst [vmem:[#allocation118_spill] sm:$0xff] %v5609_v1 }
 0x5a8   : > { %v5611_v63 = vpop.f32.mrf.mxu0 }
 0x5a9   : > { %6667 = vst [vmem:[#allocation119_spill] sm:$0xff] %v5611_v63 }
 0x5aa   : > { %v5613_v33 = vpop.f32.mrf.mxu0 }
 0x5ab   : > { %6668 = vst [vmem:[#allocation114_spill] sm:$0xff] %v5613_v33 }
 0x5ac   : > { %v5615_v46 = vpop.f32.mrf.mxu0 }
 0x5ad   : > { %6669 = vst [vmem:[#allocation117_spill] sm:$0xff] %v5615_v46 }
 0x5b2   : > { %v5617_v37 = vpop.f32.mrf.mxu0 }
 0x5b3   : > { %6670 = vst [vmem:[#allocation116_spill] sm:$0xff] %v5617_v37  ;;  %v6704_v37 = vld [vmem:[#allocation50_spill] sm:$0xff] }
 0x5b4   : > { %v5619_v34 = vpop.f32.mrf.mxu0 }
 0x5b5   : > { %6671 = vst [vmem:[#allocation122_spill] sm:$0xff] %v5619_v34 }
 0x5b6   : > { %v5621_v58 = vpop.f32.mrf.mxu0 }
 0x5b7   : > { %6672 = vst [vmem:[#allocation121_spill] sm:$0xff] %v5621_v58 }
 0x5b8   : > { %v1848_v11 = vpop.f32.mrf.mxu0 }
 0x5c2   : > { %v3978_v15 = vpop.f32.mrf.mxu0 }
 0x5c4   : > { %v1861_v48 = vpop.f32.mrf.mxu0 }
 0x5c6   : > { %v3979_v19 = vpop.f32.mrf.mxu0 }
 0x5c8   : > { %v1864_v56 = vpop.f32.mrf.mxu0 }
 0x5d9   : > { %v3982_v61 = vpop.f32.mrf.mxu0 }
 0x5db   : > { %v1877_v36 = vpop.f32.mrf.mxu0 }
 0x5dd   : > { %v3983_v26 = vpop.f32.mrf.mxu0 }
 0x5ec   : > { %v5623_v49 = vpop.f32.mrf.mxu1 }
 0x5ed   : > { %6673 = vst [vmem:[#allocation123_spill] sm:$0xff] %v5623_v49 }
 0x5ee   : > { %v5625_v6 = vpop.f32.mrf.mxu1 }
 0x5ef   : > { %6674 = vst [vmem:[#allocation120_spill] sm:$0xff] %v5625_v6 }
 0x5f0   : > { %v5627_v7 = vpop.f32.mrf.mxu1 }
 0x5f1   : > { %6675 = vst [vmem:[#allocation109_spill] sm:$0xff] %v5627_v7 }
 0x5f2   : > { %v5629_v23 = vpop.f32.mrf.mxu1 }
 0x5f3   : > { %6676 = vst [vmem:[#allocation110_spill] sm:$0xff] %v5629_v23 }
 0x5f4   : > { %v5631_v24 = vpop.f32.mrf.mxu1 }
 0x5f5   : > { %6677 = vst [vmem:[#allocation107_spill] sm:$0xff] %v5631_v24 }
 0x5f6   : > { %v5633_v4 = vpop.f32.mrf.mxu1 }
 0x5f7   : > { %6678 = vst [vmem:[#allocation108_spill] sm:$0xff] %v5633_v4  ;;  %v6703_v4 = vld [vmem:[#allocation49_spill] sm:$0xff] }
 0x5f8   : > { %v5635_v31 = vpop.f32.mrf.mxu1 }
 0x5f9   : > { %6679 = vst [vmem:[#allocation124_spill] sm:$0xff] %v5635_v31 }
 0x5fa   : > { %v1727_v28 = vpop.f32.mrf.mxu1 }
 0x5fb   : > { %v5637_v29 = vadd.f32 %v1848_v11, %v1727_v28 }
 0x5fc   : > { %v3958_v8 = vpop.f32.mrf.mxu1 }
 0x5fd   : > { %6680 = vst [vmem:[#allocation125_spill] sm:$0xff] %v5637_v29  ;;  %v5639_v53 = vadd.f32 %v3978_v15, %v3958_v8  ;;  %v6689_v15 = vld [vmem:[#allocation39_spill] sm:$0xff] }
 0x5fe   : > { %v1740_v3 = vpop.f32.mrf.mxu1  ;;  %v6701_v29 = vld [vmem:[#allocation51_spill] sm:$0xff] }
 0x5ff   : > { %6681 = vst [vmem:[#allocation126_spill] sm:$0xff] %v5639_v53  ;;  %v5641_v12 = vadd.f32 %v1861_v48, %v1740_v3  ;;  %v6700_v53 = vld [vmem:[#allocation46_spill] sm:$0xff] }
 0x600   : > { %v3959_v13 = vpop.f32.mrf.mxu1 }
 0x601   : > { %6682 = vst [vmem:[#allocation127_spill] sm:$0xff] %v5641_v12  ;;  %v5643_v52 = vadd.f32 %v3979_v19, %v3959_v13 }
 0x602   : > { %v1743_v18 = vpop.f32.mrf.mxu1 }
 0x603   : > { %6683 = vst [vmem:[#allocation128_spill] sm:$0xff] %v5643_v52  ;;  %v5645_v22 = vadd.f32 %v1864_v56, %v1743_v18  ;;  %v6690_v56 = vld [vmem:[#allocation37_spill] sm:$0xff] }
 0x604   : > { %v3962_v17 = vpop.f32.mrf.mxu1 }
 0x605   : > { %6684 = vst [vmem:[#allocation129_spill] sm:$0xff] %v5645_v22  ;;  %v5647_v30 = vadd.f32 %v3982_v61, %v3962_v17 }
 0x606   : > { %v1756_v10 = vpop.f32.mrf.mxu1 }
 0x607   : > { %6685 = vst [vmem:[#allocation130_spill] sm:$0xff] %v5647_v30  ;;  %v5649_v50 = vadd.f32 %v1877_v36, %v1756_v10  ;;  %v6691_v36 = vld [vmem:[#allocation38_spill] sm:$0xff] }
 0x608   : > { %v3963_v60 = vpop.f32.mrf.mxu1 }
 0x609   : > { %6686 = vst [vmem:[#allocation131_spill] sm:$0xff] %v5649_v50  ;;  %v5651_v21 = vadd.f32 %v3983_v26, %v3963_v60  ;;  %v6692_v60 = vld [vmem:[#allocation40_spill] sm:$0xff] }
 0x60a   : > { %v5653_v14 = vpop.f32.mrf.mxu1 }
 0x60b   : > { %6687 = vst [vmem:[#allocation132_spill] sm:$0xff] %v5651_v21  ;;  %6688 = vst [vmem:[#allocation133_spill] sm:$0xff] %v5653_v14  ;;  %v6697_v14 = vld [vmem:[#allocation47_spill] sm:$0xff] }
 0x60c   : > { %v3990_v59 = vpop.f32.mrf.mxu1 }
 0x60d   : > { %v2033_v32 = vmul.f32 0.17677669, %v3990_v59 }
 0x60e   : > { %v1968_v11 = vpop.f32.mrf.mxu1 }
 0x60f   : > { %v5656_v48 = vadd.f32 %v2033_v32, %v6689_v15  ;;  %v2031_v19 = vmul.f32 0.17677669, %v1968_v11  ;;  %v6693_v11 = vld [vmem:[#allocation43_spill] sm:$0xff] }
 0x610   : > { %v3991_v28 = vpop.f32.mrf.mxu1 }
 0x611   : > { %2067 = vmax.xlane.f32.xlu0 %v5656_v48  ;;  %v5660_v3 = vadd.f32 %v2031_v19, %v6690_v56  ;;  %v2034_v61 = vmul.f32 0.17677669, %v3991_v28 }
 0x612   : > { %v1971_v8 = vpop.f32.mrf.mxu1 }
 0x613   : > { %v2032_v13 = vmul.f32 0.17677669, %v1971_v8  ;;  %v5667_v59 = vadd.f32 %v2034_v61, %v6692_v60  ;;  %v6695_v61 = vld [vmem:[#allocation41_spill] sm:$0xff] }
 0x614   : > { %v3994_v18 = vpop.f32.mrf.mxu1 }
 0x615   : > { %v5663_v17 = vadd.f32 %v2032_v13, %v6691_v36  ;;  %v2037_v10 = vmul.f32 0.17677669, %v3994_v18  ;;  %2063 = vmax.xlane.f32.xlu0 %v5660_v3  ;;  %v6694_v13 = vld [vmem:[#allocation44_spill] sm:$0xff] }
 0x616   : > { %v1984_v26 = vpop.f32.mrf.mxu1 }
 0x617   : > { %2065 = vmax.xlane.f32.xlu1 %v5663_v17  ;;  %v5671_v9 = vadd.f32 %v2037_v10, %v6693_v11  ;;  %v2035_v19 = vmul.f32 0.17677669, %v1984_v26 }
 0x618   : > { %v3995_v32 = vpop.f32.mrf.mxu1 }
 0x619   : > { %v2038_v28 = vmul.f32 0.17677669, %v3995_v32  ;;  %2069 = vmax.xlane.f32.xlu0 %v5667_v59  ;;  %v5679_v38 = vadd.f32 %v2035_v19, %v6695_v61  ;;  %v6698_v19 = vld [vmem:[#allocation48_spill] sm:$0xff] }
 0x61a   : > { %v1987_v8 = vpop.f32.mrf.mxu1 }
 0x61b   : > { %v5675_v16 = vadd.f32 %v2038_v28, %v6694_v13  ;;  %v2036_v18 = vmul.f32 0.17677669, %v1987_v8  ;;  %2075 = vmax.xlane.f32.xlu1 %v5671_v9 }
 0x61c   : > { %v3998_v20 = vpop.f32.mrf.mxu1 }
 0x61d   : > { %v2041_v40 = vmul.f32 0.17677669, %v3998_v20  ;;  %2077 = vmax.xlane.f32.xlu0 %v5675_v16  ;;  %v5683_v26 = vadd.f32 %v2036_v18, %v6696_v45  ;;  %v6699_v18 = vld [vmem:[#allocation45_spill] sm:$0xff] }
 0x61e   : > { %v2000_v10 = vpop.f32.mrf.mxu1 }
 0x61f   : > { %2071 = vmax.xlane.f32.xlu1 %v5679_v38  ;;  %v5687_v28 = vadd.f32 %v2041_v40, %v6697_v14  ;;  %v2039_v8 = vmul.f32 0.17677669, %v2000_v10 }
 0x620   : > { %v3999_v32 = vpop.f32.mrf.mxu1 }
 0x621   : > { %v2042_v21 = vmul.f32 0.17677669, %v3999_v32  ;;  %2073 = vmax.xlane.f32.xlu0 %v5683_v26  ;;  %v5695_v52 = vadd.f32 %v2039_v8, %v6699_v18  ;;  %v6702_v8 = vld [vmem:[#allocation52_spill] sm:$0xff] }
 0x622   : > { %v2003_v50 = vpop.f32.mrf.mxu1 }
 0x623   : > { %v5691_v30 = vadd.f32 %v2042_v21, %v6698_v19  ;;  %v2040_v20 = vmul.f32 0.17677669, %v2003_v50  ;;  %2083 = vmax.xlane.f32.xlu1 %v5687_v28 }
 0x624   : > { %v4002_v22 = vpop.f32.mrf.mxu1 }
 0x625   : > { %v2045_v12 = vmul.f32 0.17677669, %v4002_v22  ;;  %2085 = vmax.xlane.f32.xlu0 %v5691_v30  ;;  %v5699_v10 = vadd.f32 %v2040_v20, %v6700_v53 }
 0x626   : > { %v2016_v40 = vpop.f32.mrf.mxu1 }
 0x627   : > { %2079 = vmax.xlane.f32.xlu1 %v5695_v52  ;;  %v5703_v21 = vadd.f32 %v2045_v12, %v6701_v29  ;;  %v2043_v50 = vmul.f32 0.17677669, %v2016_v40  ;;  %v6705_v12 = vld [vmem:[#allocation100_spill] sm:$0xff] }
 0x628   : > { %v4003_v32 = vpop.f32.mrf.mxu1 }
 0x629   : > { %v2046_v58 = vmul.f32 0.17677669, %v4003_v32  ;;  %2081 = vmax.xlane.f32.xlu0 %v5699_v10  ;;  %v5711_v20 = vadd.f32 %v2043_v50, %v6703_v4 }
 0x62a   : > { %v2019_v31 = vpop.f32.mrf.mxu1 }
 0x62b   : > { %v5707_v34 = vadd.f32 %v2046_v58, %v6702_v8  ;;  %v2044_v22 = vmul.f32 0.17677669, %v2019_v31  ;;  %2091 = vmax.xlane.f32.xlu1 %v5703_v21  ;;  %v6706_v58 = vld [vmem:[#allocation104_spill] sm:$0xff] }
 0x62d   : > { %2093 = vmax.xlane.f32.xlu0 %v5707_v34  ;;  %v5715_v24 = vadd.f32 %v2044_v22, %v6704_v37 }
 0x62f   : > { %2087 = vmax.xlane.f32.xlu1 %v5711_v20 }
 0x631   : > { %2089 = vmax.xlane.f32.xlu0 %v5715_v24 }
 0x640   : > { %2253 = vrot.lane.b32.xlu1 %v6705_v12, %s4657_s8 }
 0x647   : > { %2251 = vrot.lane.b32.xlu0 %v6706_v58, %s4657_s8 }
 0x69a   : > { %v2068_v31 = vpop.xlane.xlu0 %2067 }
 0x69b   : > { %v2097_v40 = vsub.f32 %v5656_v48, %v2068_v31 }
 0x69d   : > { %v2115_v32 = vmul.f32 1.442695, %v2097_v40 }
 0x69e   : > { %v2064_v50 = vpop.xlane.xlu0 %2063 }
 0x69f   : > { %4293 = vpow2.f32 %v2115_v32  ;;  %v2095_v46 = vsub.f32 %v5660_v3, %v2064_v50 }
 0x6a0   : > { %v2066_v22 = vpop.xlane.xlu1 %2065 }
 0x6a1   : > { %v2111_v23 = vmul.f32 1.442695, %v2095_v46  ;;  %v2096_v33 = vsub.f32 %v5663_v17, %v2066_v22 }
 0x6a2   : > { %v2070_v7 = vpop.xlane.xlu0 %2069 }
 0x6a3   : > { %4295 = vpow2.f32 %v2111_v23  ;;  %v2098_v63 = vsub.f32 %v5667_v59, %v2070_v7  ;;  %v2113_v6 = vmul.f32 1.442695, %v2096_v33 }
 0x6a4   : > { %v2076_v1 = vpop.xlane.xlu1 %2075 }
 0x6a5   : > { %v2117_v49 = vmul.f32 1.442695, %v2098_v63  ;;  %v2101_v58 = vsub.f32 %v5671_v9, %v2076_v1 }
 0x6a6   : > { %v2078_v12 = vpop.xlane.xlu0 %2077 }
 0x6a7   : > { %4297 = vpow2.f32 %v2117_v49  ;;  %v2123_v48 = vmul.f32 1.442695, %v2101_v58  ;;  %v2102_v31 = vsub.f32 %v5675_v16, %v2078_v12 }
 0x6a8   : > { %4299 = vpow2.f32 %v2113_v6  ;;  %v2072_v3 = vpop.xlane.xlu1 %2071 }
 0x6a9   : > { %4301 = vpow2.f32 %v2123_v48  ;;  %v2125_v46 = vmul.f32 1.442695, %v2102_v31  ;;  %v2099_v17 = vsub.f32 %v5679_v38, %v2072_v3 }
 0x6aa   : > { %v2074_v40 = vpop.xlane.xlu0 %2073 }
 0x6ab   : > { %v2119_v23 = vmul.f32 1.442695, %v2099_v17  ;;  %v2100_v7 = vsub.f32 %v5683_v26, %v2074_v40  ;;  %4303 = vpow2.f32 %v2125_v46 }
 0x6ac   : > { %v4294_v33 = vpop.eup %4293  ;;  %v2084_v63 = vpop.xlane.xlu1 %2083 }
 0x6ad   : > { %4305 = vpow2.f32 %v2119_v23  ;;  %v2121_v9 = vmul.f32 1.442695, %v2100_v7  ;;  %v2105_v1 = vsub.f32 %v5687_v28, %v2084_v63  ;;  %v5733_v49 = vmul.f32 %v4294_v33, %v6554_v2 }
 0x6ae   : > { %v2086_v16 = vpop.xlane.xlu0 %2085 }
 0x6af   : > { %v2131_v6 = vmul.f32 1.442695, %v2105_v1  ;;  %v2106_v59 = vsub.f32 %v5691_v30, %v2086_v16  ;;  %2163 = vadd.xlane.f32.xlu1 %v5733_v49  ;;  %4307 = vpow2.f32 %v2121_v9 }
 0x6b0   : > { %v4296_v38 = vpop.eup %4295  ;;  %v2080_v12 = vpop.xlane.xlu1 %2079 }
 0x6b1   : > { %4309 = vpow2.f32 %v2131_v6  ;;  %v2133_v26 = vmul.f32 1.442695, %v2106_v59  ;;  %v2103_v58 = vsub.f32 %v5695_v52, %v2080_v12  ;;  %v5739_v32 = vmul.f32 %v4296_v38, %v6555_v0 }
 0x6b2   : > { %v2082_v28 = vpop.xlane.xlu0 %2081 }
 0x6b3   : > { %v2127_v50 = vmul.f32 1.442695, %v2103_v58  ;;  %v2104_v22 = vsub.f32 %v5699_v10, %v2082_v28  ;;  %2159 = vadd.xlane.f32.xlu1 %v5739_v32  ;;  %4311 = vpow2.f32 %v2133_v26 }
 0x6b4   : > { %v4298_v48 = vpop.eup %4297  ;;  %v2092_v30 = vpop.xlane.xlu1 %2091 }
 0x6b5   : > { %v4300_v31 = vpop.eup %4299  ;;  %4313 = vpow2.f32 %v2127_v50  ;;  %v2129_v3 = vmul.f32 1.442695, %v2104_v22  ;;  %v2109_v46 = vsub.f32 %v5703_v21, %v2092_v30  ;;  %v5745_v17 = vmul.f32 %v4298_v48, %v6628_v47 }
 0x6b6   : > { %v4302_v52 = vpop.eup %4301  ;;  %v2094_v40 = vpop.xlane.xlu0 %2093  ;;  %v5755_v1 = vmul.f32 %v4300_v31, %v6630_v54 }
 0x6b7   : > { %v2139_v23 = vmul.f32 1.442695, %v2109_v46  ;;  %v2110_v7 = vsub.f32 %v5707_v34, %v2094_v40  ;;  %2165 = vadd.xlane.f32.xlu0 %v5745_v17  ;;  %v5750_v10 = vmul.f32 %v4302_v52, %v6629_v44  ;;  %4315 = vpow2.f32 %v2129_v3 }
 0x6b8   : > { %v2088_v33 = vpop.xlane.xlu1 %2087  ;;  %v4304_v63 = vpop.eup %4303 }
 0x6b9   : > { %4317 = vpow2.f32 %v2139_v23  ;;  %v2141_v9 = vmul.f32 1.442695, %v2110_v7  ;;  %v2107_v21 = vsub.f32 %v5711_v20, %v2088_v33  ;;  %2171 = vadd.xlane.f32.xlu1 %v5750_v10  ;;  %v5764_v58 = vmul.f32 %v4304_v63, %v6632_v55 }
 0x6ba   : > { %v4306_v16 = vpop.eup %4305  ;;  %v2090_v6 = vpop.xlane.xlu0 %2089 }
 0x6bb   : > { %v2135_v34 = vmul.f32 1.442695, %v2107_v21  ;;  %v2108_v59 = vsub.f32 %v5715_v24, %v2090_v6  ;;  %2161 = vadd.xlane.f32.xlu0 %v5755_v1  ;;  %v5760_v38 = vmul.f32 %v4306_v16, %v6631_v57  ;;  %4319 = vpow2.f32 %v2141_v9  ;;  %v6707_v6 = vld [vmem:[#allocation91_spill] sm:$0xff] }
 0x6bc   : > { %v2254_v12 = vpop.permute.xlu1 %2253  ;;  %v4308_v26 = vpop.eup %4307 }
 0x6bd   : > { %4321 = vpow2.f32 %v2135_v34  ;;  %v2137_v20 = vmul.f32 1.442695, %v2108_v59  ;;  %4012 = vmatprep.subr.bf16.mxu0 %v2254_v12  ;;  %2167 = vadd.xlane.f32.xlu1 %v5760_v38  ;;  %v5772_v48 = vmul.f32 %v4308_v26, %v6633_v27  ;;  %v6708_v34 = vld [vmem:[#allocation92_spill] sm:$0xff]  ;;  %v6709_v59 = vld [vmem:[#allocation106_spill] sm:$0xff]  ;;  %v6711_v26 = vld [vmem:[#allocation93_spill] sm:$0xff] }
 0x6be   : > { %v4310_v28 = vpop.eup %4309  ;;  %4013 = vmatpush3.bf16.msra.mxu0 %v2254_v12  ;;  %v2252_v50 = vpop.permute.xlu0 %2251  ;;  %v6710_v12 = vld [vmem:[#allocation94_spill] sm:$0xff] }
 0x6bf   : > { %2173 = vadd.xlane.f32.xlu0 %v5764_v58  ;;  %4014 = vmatprep.subr.bf16.mxu0 %v2252_v50  ;;  %v5768_v24 = vmul.f32 %v4310_v28, %v6634_v42  ;;  %4323 = vpow2.f32 %v2137_v20  ;;  %v6712_v20 = vld [vmem:[#allocation96_spill] sm:$0xff]  ;;  %v6713_v28 = vld [vmem:[#allocation95_spill] sm:$0xff] }
 0x6c0   : > { %v4312_v22 = vpop.eup %4311 }
 0x6c1   : > { %2179 = vadd.xlane.f32.xlu1 %v5768_v24  ;;  %v5780_v46 = vmul.f32 %v4312_v22, %v6638_v43  ;;  %v6715_v22 = vld [vmem:[#allocation97_spill] sm:$0xff] }
 0x6c2   : > { %v4314_v30 = vpop.eup %4313  ;;  %4015 = vmatpush3.bf16.msra.mxu0 %v2252_v50  ;;  %v6714_v50 = vld [vmem:[#allocation98_spill] sm:$0xff] }
 0x6c3   : > { %2169 = vadd.xlane.f32.xlu0 %v5772_v48  ;;  %v5776_v31 = vmul.f32 %v4314_v30, %v6636_v39  ;;  %v6716_v30 = vld [vmem:[#allocation102_spill] sm:$0xff] }
 0x6c4   : > { %v4316_v3 = vpop.eup %4315 }
 0x6c5   : > { %2175 = vadd.xlane.f32.xlu1 %v5776_v31  ;;  %v5788_v7 = vmul.f32 %v4316_v3, %v6640_v35  ;;  %v6717_v3 = vld [vmem:[#allocation103_spill] sm:$0xff] }
 0x6c6   : > { %v4318_v52 = vpop.eup %4317 }
 0x6c7   : > { %2181 = vadd.xlane.f32.xlu0 %v5780_v46  ;;  %v5784_v40 = vmul.f32 %v4318_v52, %v6642_v51  ;;  %v6718_v52 = vld [vmem:[#allocation99_spill] sm:$0xff] }
 0x6c8   : > { %v4320_v23 = vpop.eup %4319 }
 0x6c9   : > { %2187 = vadd.xlane.f32.xlu1 %v5784_v40  ;;  %v5796_v9 = vmul.f32 %v4320_v23, %v6644_v5  ;;  %v6719_v23 = vld [vmem:[#allocation101_spill] sm:$0xff] }
 0x6ca   : > { %v4322_v33 = vpop.eup %4321 }
 0x6cb   : > { %2177 = vadd.xlane.f32.xlu0 %v5788_v7  ;;  %v5792_v63 = vmul.f32 %v4322_v33, %v6643_v41 }
 0x6cc   : > { %v4324_v21 = vpop.eup %4323 }
 0x6cd   : > { %2183 = vadd.xlane.f32.xlu1 %v5792_v63  ;;  %v5800_v16 = vmul.f32 %v4324_v21, %v6645_v62 }
 0x6cf   : > { %2189 = vadd.xlane.f32.xlu0 %v5796_v9 }
 0x6d3   : > { %2185 = vadd.xlane.f32.xlu0 %v5800_v16 }
 0x6de   : > { %2249 = vrot.lane.b32.xlu1 %v5106_v25, %s4657_s8 }
 0x6e2   : > { %2515 = vrot.lane.b32.xlu1 %v6707_v6, %s4658_s9 }
 0x6e6   : > { %2517 = vrot.lane.b32.xlu1 %v6708_v34, %s4658_s9 }
 0x6e9   : > { %2247 = vrot.lane.b32.xlu0 %v6709_v59, %s4657_s8 }
 0x6ea   : > { %2521 = vrot.lane.b32.xlu1 %v6710_v12, %s4658_s9 }
 0x6ed   : > { %2519 = vrot.lane.b32.xlu0 %v6711_v26, %s4658_s9 }
 0x6ee   : > { %2525 = vrot.lane.b32.xlu1 %v6712_v20, %s4658_s9 }
 0x6f1   : > { %2523 = vrot.lane.b32.xlu0 %v6713_v28, %s4658_s9 }
 0x6f2   : > { %2529 = vrot.lane.b32.xlu1 %v6714_v50, %s4658_s9 }
 0x6f5   : > { %2527 = vrot.lane.b32.xlu0 %v6715_v22, %s4658_s9 }
 0x6f6   : > { %2882 = vrot.lane.b32.xlu1 %v6716_v30, %s4658_s9 }
 0x6f9   : > { %2880 = vrot.lane.b32.xlu0 %v6717_v3, %s4658_s9 }
 0x6fa   : > { %2878 = vrot.lane.b32.xlu1 %v6718_v52, %s4658_s9 }
 0x6fd   : > { %2876 = vrot.lane.b32.xlu0 %v6719_v23, %s4658_s9 }
 0x738   : > { %v2164_v33 = vpop.xlane.xlu1 %2163 }
 0x739   : > { %v2193_v59 = vadd.f32 1e-09, %v2164_v33 }
 0x73c   : > { %v2160_v21 = vpop.xlane.xlu1 %2159 }
 0x73d   : > { %v2191_v34 = vadd.f32 1e-09, %v2160_v21 }
 0x73f   : > { %4325 = vrcp.f32 %v2191_v34 }
 0x740   : > { %v2166_v6 = vpop.xlane.xlu0 %2165 }
 0x741   : > { %v2194_v30 = vadd.f32 1e-09, %v2166_v6 }
 0x742   : > { %v2172_v12 = vpop.xlane.xlu1 %2171 }
 0x743   : > { %v2197_v35 = vadd.f32 1e-09, %v2172_v12 }
 0x744   : > { %v2162_v26 = vpop.xlane.xlu0 %2161 }
 0x745   : > { %v2192_v20 = vadd.f32 1e-09, %v2162_v26 }
 0x746   : > { %v2168_v28 = vpop.xlane.xlu1 %2167 }
 0x747   : > { %4327 = vrcp.f32 %v2192_v20  ;;  %v2195_v52 = vadd.f32 1e-09, %v2168_v28 }
 0x748   : > { %v2174_v50 = vpop.xlane.xlu0 %2173  ;;  %4329 = vrcp.f32 %v2194_v30 }
 0x749   : > { %v2198_v41 = vadd.f32 1e-09, %v2174_v50 }
 0x74a   : > { %v2180_v22 = vpop.xlane.xlu1 %2179 }
 0x74c   : > { %v2170_v3 = vpop.xlane.xlu0 %2169  ;;  %v4326_v5 = vpop.eup %4325 }
 0x74d   : > { %v2196_v25 = vadd.f32 1e-09, %v2170_v3  ;;  %v2223_v51 = vmul.f32 %v4326_v5, %v5739_v32 }
 0x74e   : > { %v2176_v62 = vpop.xlane.xlu1 %2175 }
 0x74f   : > { %4331 = vrcp.f32 %v2196_v25  ;;  %v2199_v33 = vadd.f32 1e-09, %v2176_v62 }
 0x750   : > { %v2182_v23 = vpop.xlane.xlu0 %2181  ;;  %4333 = vrcp.f32 %v2193_v59 }
 0x751   : > { %4335 = vrcp.f32 %v2195_v52  ;;  %v2202_v30 = vadd.f32 1e-09, %v2182_v23  ;;  %v6720_v23 = vld [vmem:[#allocation113_spill] sm:$0xff] }
 0x752   : > { %v2188_v21 = vpop.xlane.xlu1 %2187  ;;  %4337 = vrcp.f32 %v2198_v41 }
 0x754   : > { %v4328_v34 = vpop.eup %4327  ;;  %v2178_v26 = vpop.xlane.xlu0 %2177 }
 0x755   : > { %v2200_v20 = vadd.f32 1e-09, %v2178_v26  ;;  %v2224_v6 = vmul.f32 %v4328_v34, %v5755_v1  ;;  %v4330_v50 = vpop.eup %4329  ;;  %v2201_v26 = vadd.f32 1e-09, %v2180_v22 }
 0x756   : > { %v2184_v3 = vpop.xlane.xlu1 %2183 }
 0x757   : > { %v2239_v28 = vpack.c.bf16 %v2224_v6, %v2223_v51  ;;  %4339 = vrcp.f32 %v2200_v20  ;;  %v2203_v1 = vadd.f32 1e-09, %v2184_v3  ;;  %v2226_v51 = vmul.f32 %v4330_v50, %v5745_v17  ;;  %v6721_v20 = vld [vmem:[#allocation115_spill] sm:$0xff] }
 0x758   : > { %v2190_v25 = vpop.xlane.xlu0 %2189  ;;  %4341 = vrcp.f32 %v2197_v35  ;;  %v2514_v6 = vpack.c.bf16 %v6721_v20, %v6720_v23 }
 0x759   : > { %4020 = vmatprep.mubr.bf16.mxu0 %v2239_v28  ;;  %4343 = vrcp.f32 %v2199_v33  ;;  %v2206_v28 = vadd.f32 1e-09, %v2190_v25 }
 0x75a   : > { %v2250_v59 = vpop.permute.xlu1 %2249  ;;  %4345 = vrcp.f32 %v2202_v30 }
 0x75b   : > { %4016 = vmatprep.subr.bf16.mxu0 %v2250_v59 }
 0x75c   : > { %4017 = vmatpush3.bf16.msra.mxu0 %v2250_v59  ;;  %v2186_v12 = vpop.xlane.xlu0 %2185  ;;  %v4332_v52 = vpop.eup %4331 }
 0x75d   : > { %v2204_v5 = vadd.f32 1e-09, %v2186_v12  ;;  %v4334_v32 = vpop.eup %4333  ;;  %v2228_v34 = vmul.f32 %v4332_v52, %v5772_v48  ;;  %v6722_v12 = vld [vmem:[#allocation111_spill] sm:$0xff]  ;;  %v6723_v48 = vld [vmem:[#allocation112_spill] sm:$0xff] }
 0x75e   : > { %v5833_v62 = vpop.permute.xlu1 %2515  ;;  %v4336_v41 = vpop.eup %4335  ;;  %v2225_v22 = vmul.f32 %v4334_v32, %v5733_v49  ;;  %v2513_v52 = vpack.c.bf16 %v6723_v48, %v6722_v12 }
 0x75f   : > { %4347 = vrcp.f32 %v2204_v5  ;;  %v2227_v3 = vmul.f32 %v4336_v41, %v5760_v38  ;;  %v4338_v17 = vpop.eup %4337  ;;  %v2205_v5 = vadd.f32 1e-09, %v2188_v21 }
 0x760   : > { %v2248_v35 = vpop.permute.xlu0 %2247  ;;  %4349 = vrcp.f32 %v2201_v26  ;;  %v2240_v59 = vpack.c.bf16 %v2226_v51, %v2225_v22  ;;  %v2230_v38 = vmul.f32 %v4338_v17, %v5764_v58  ;;  %v6724_v51 = vld [vmem:[#allocation84_spill] sm:$0xff] }
 0x761   : > { %4018 = vmatprep.subr.bf16.mxu0 %v2248_v35  ;;  %4351 = vrcp.f32 %v2203_v1  ;;  %v2241_v30 = vpack.c.bf16 %v2228_v34, %v2227_v3 }
 0x762   : > { %v2518_v33 = vpop.permute.xlu1 %2517  ;;  %4019 = vmatpush3.bf16.msra.mxu0 %v2248_v35  ;;  %4353 = vrcp.f32 %v2206_v28 }
 0x763   : > { %4056 = vmatprep.subr.bf16.mxu0 %v2514_v6  ;;  %4355 = vrcp.f32 %v2205_v5 }
 0x764   : > { %v4340_v50 = vpop.eup %4339 }
 0x765   : > { %4021 = vmatmul.mubr.bf16.vlgmr.msra.gmra.mxu0 %v2240_v59  ;;  %v4342_v26 = vpop.eup %4341  ;;  %v2232_v25 = vmul.f32 %v4340_v50, %v5788_v7 }
 0x766   : > { %v2522_v23 = vpop.permute.xlu1 %2521  ;;  %4024 = vmatprep.mubr.bf16.mxu0 %v2241_v30  ;;  %4057 = vmatpush3.bf16.msra.mxu0 %v2514_v6  ;;  %v4344_v49 = vpop.eup %4343  ;;  %v2229_v32 = vmul.f32 %v4342_v26, %v5750_v10 }
 0x767   : > { %4058 = vmatprep.subr.bf16.mxu0 %v2513_v52  ;;  %v2231_v41 = vmul.f32 %v4344_v49, %v5776_v31  ;;  %v4346_v35 = vpop.eup %4345 }
 0x768   : > { %v2242_v21 = vpack.c.bf16 %v2230_v38, %v2229_v32  ;;  %v2234_v7 = vmul.f32 %v4346_v35, %v5780_v46  ;;  %v6725_v46 = vld [vmem:[#allocation83_spill] sm:$0xff] }
 0x769   : > { %v2243_v34 = vpack.c.bf16 %v2232_v25, %v2231_v41 }
 0x76a   : > { %v2526_v1 = vpop.permute.xlu1 %2525  ;;  %4059 = vmatpush3.bf16.msra.mxu0 %v2513_v52 }
 0x76b   : > { %4108 = vmatprep.subr.bf16.mxu0 %v6724_v51 }
 0x76c   : > { %v4348_v20 = vpop.eup %4347 }
 0x76d   : > { %4025 = vmatmul.mubr.bf16.gmra.mxu0 %v2242_v21  ;;  %v4350_v6 = vpop.eup %4349  ;;  %v2236_v3 = vmul.f32 %v4348_v20, %v5800_v16 }
 0x76e   : > { %v2530_v22 = vpop.permute.xlu1 %2529  ;;  %4028 = vmatprep.mubr.bf16.mxu0 %v2243_v34  ;;  %v4352_v58 = vpop.eup %4351  ;;  %v2233_v10 = vmul.f32 %v4350_v6, %v5768_v24 }
 0x76f   : > { %v2235_v31 = vmul.f32 %v4352_v58, %v5792_v63  ;;  %v4354_v17 = vpop.eup %4353  ;;  %v2520_v24 = vpop.permute.xlu0 %2519 }
 0x770   : > { %v2244_v59 = vpack.c.bf16 %v2234_v7, %v2233_v10  ;;  %v4356_v50 = vpop.eup %4355  ;;  %v2238_v12 = vmul.f32 %v4354_v17, %v5796_v9  ;;  %v5866_v9 = vpop.f32.mrf.mxu0 }
 0x771   : > { %v2245_v30 = vpack.c.bf16 %v2236_v3, %v2235_v31  ;;  %v2237_v48 = vmul.f32 %v4356_v50, %v5784_v40 }
 0x772   : > { %v2883_v28 = vpop.permute.xlu1 %2882 }
 0x773   : > { %4076 = vmatprep.subr.bf16.mxu1 %v2883_v28  ;;  %v2246_v52 = vpack.c.bf16 %v2238_v12, %v2237_v48  ;;  %v2524_v63 = vpop.permute.xlu0 %2523 }
 0x775   : > { %4029 = vmatmul.mubr.bf16.gmra.mxu0 %v2244_v59 }
 0x776   : > { %4032 = vmatprep.mubr.bf16.mxu0 %v2245_v30  ;;  %v2879_v41 = vpop.permute.xlu1 %2878 }
 0x777   : > { %v2528_v40 = vpop.permute.xlu0 %2527 }
 0x77b   : > { %v2881_v25 = vpop.permute.xlu0 %2880 }
 0x77d   : > { %4033 = vmatmul.mubr.bf16.gmra.mxu0 %v2246_v52 }
 0x77e   : > { %4060 = vmatprep.mubr.msk.bf16.mxu0 %vm707_vm0, %v5833_v62 }
 0x77f   : > { %v2877_v6 = vpop.permute.xlu0 %2876 }
 0x785   : > { %4061 = vmatmul.mubr.msk.bf16.vlgmr.msra.gmra.mxu0 %vm707_vm0, %v2518_v33 }
 0x786   : > { %4064 = vmatprep.mubr.msk.bf16.mxu0 %vm707_vm0, %v2520_v24  ;;  %4109 = vmatpush3.bf16.msra.mxu0 %v6724_v51 }
 0x787   : > { %4110 = vmatprep.subr.bf16.mxu0 %v6725_v46 }
 0x78a   : > { %4111 = vmatpush3.bf16.msra.mxu0 %v6725_v46 }
 0x78d   : > { %4065 = vmatmul.mubr.msk.bf16.gmra.mxu0 %vm707_vm0, %v2522_v23 }
 0x78e   : > { %4068 = vmatprep.mubr.msk.bf16.mxu0 %vm707_vm0, %v2524_v63 }
 0x795   : > { %4069 = vmatmul.mubr.msk.bf16.gmra.mxu0 %vm707_vm0, %v2526_v1 }
 0x796   : > { %4072 = vmatprep.mubr.msk.bf16.mxu0 %vm707_vm0, %v2528_v40 }
 0x79d   : > { %4073 = vmatmul.mubr.msk.bf16.gmra.mxu0 %vm707_vm0, %v2530_v22 }
 0x825   : > { %v4022_v16 = vpop.f32.mrf.mxu0 }
 0x827   : > { %v2305_v62 = vpop.f32.mrf.mxu0 }
 0x829   : > { %v4023_v33 = vpop.f32.mrf.mxu0 }
 0x82a   : > { %v2369_v49 = vpack.c.bf16 %v4023_v33, %v4022_v16 }
 0x82b   : > { %v2308_v5 = vpop.f32.mrf.mxu0 }
 0x82c   : > { %v2368_v26 = vpack.c.bf16 %v2308_v5, %v2305_v62 }
 0x82d   : > { %v4026_v38 = vpop.f32.mrf.mxu0 }
 0x82e   : > { %4040 = vmatprep.mubr.msk.bf16.mxu1 %vm707_vm0, %v2368_v26 }
 0x82f   : > { %v2321_v23 = vpop.f32.mrf.mxu0  ;;  %4041 = vmatmul.mubr.msk.bf16.vlgmr.msra.gmra.mxu1 %vm707_vm0, %v2369_v49 }
 0x830   : > { %4077 = vmatpush3.bf16.msra.mxu1 %v2883_v28 }
 0x831   : > { %4078 = vmatprep.subr.bf16.mxu1 %v2881_v25  ;;  %v4027_v32 = vpop.f32.mrf.mxu0 }
 0x832   : > { %v2371_v35 = vpack.c.bf16 %v4027_v32, %v4026_v38 }
 0x833   : > { %v2324_v1 = vpop.f32.mrf.mxu0 }
 0x834   : > { %v2370_v21 = vpack.c.bf16 %v2324_v1, %v2321_v23  ;;  %4079 = vmatpush3.bf16.msra.mxu1 %v2881_v25 }
 0x835   : > { %4080 = vmatprep.subr.bf16.mxu1 %v2879_v41  ;;  %v4030_v34 = vpop.f32.mrf.mxu0 }
 0x836   : > { %4044 = vmatprep.mubr.msk.bf16.mxu1 %vm707_vm0, %v2370_v21 }
 0x837   : > { %v2337_v20 = vpop.f32.mrf.mxu0  ;;  %4045 = vmatmul.mubr.msk.bf16.gmra.mxu1 %vm707_vm0, %v2371_v35 }
 0x838   : > { %4081 = vmatpush3.bf16.msra.mxu1 %v2879_v41 }
 0x839   : > { %4082 = vmatprep.subr.bf16.mxu1 %v2877_v6  ;;  %v4031_v22 = vpop.f32.mrf.mxu0 }
 0x83a   : > { %v2373_v3 = vpack.c.bf16 %v4031_v22, %v4030_v34 }
 0x83b   : > { %v2340_v58 = vpop.f32.mrf.mxu0 }
 0x83c   : > { %v2372_v7 = vpack.c.bf16 %v2340_v58, %v2337_v20  ;;  %4083 = vmatpush3.bf16.msra.mxu1 %v2877_v6 }
 0x83d   : > { %v4034_v10 = vpop.f32.mrf.mxu0 }
 0x83e   : > { %4048 = vmatprep.mubr.msk.bf16.mxu1 %vm707_vm0, %v2372_v7 }
 0x83f   : > { %v2353_v28 = vpop.f32.mrf.mxu0  ;;  %4049 = vmatmul.mubr.msk.bf16.gmra.mxu1 %vm707_vm0, %v2373_v3 }
 0x841   : > { %v4035_v31 = vpop.f32.mrf.mxu0 }
 0x842   : > { %v2375_v30 = vpack.c.bf16 %v4035_v31, %v4034_v10 }
 0x843   : > { %v2356_v59 = vpop.f32.mrf.mxu0 }
 0x844   : > { %v2374_v17 = vpack.c.bf16 %v2356_v59, %v2353_v28 }
 0x845   : > { %v4062_v50 = vpop.f32.mrf.mxu0 }
 0x846   : > { %v2654_v12 = vmul.f32 0.17677669, %v4062_v50  ;;  %4052 = vmatprep.mubr.msk.bf16.mxu1 %vm707_vm0, %v2374_v17 }
 0x847   : > { %4053 = vmatmul.mubr.msk.bf16.gmra.mxu1 %vm707_vm0, %v2375_v30  ;;  %v2589_v48 = vpop.f32.mrf.mxu0 }
 0x848   : > { %v5877_v52 = vadd.f32 %v2654_v12, %v6689_v15  ;;  %v2652_v24 = vmul.f32 0.17677669, %v2589_v48 }
 0x849   : > { %v4063_v63 = vpop.f32.mrf.mxu0 }
 0x84a   : > { %2688 = vmax.xlane.f32.xlu0 %v5877_v52  ;;  %v5881_v16 = vadd.f32 %v2652_v24, %v6690_v56  ;;  %v2655_v62 = vmul.f32 0.17677669, %v4063_v63 }
 0x84b   : > { %v2592_v40 = vpop.f32.mrf.mxu0 }
 0x84c   : > { %v2653_v33 = vmul.f32 0.17677669, %v2592_v40  ;;  %v5888_v15 = vadd.f32 %v2655_v62, %v6692_v60 }
 0x84d   : > { %v4066_v5 = vpop.f32.mrf.mxu0 }
 0x84e   : > { %v5884_v26 = vadd.f32 %v2653_v33, %v6691_v36  ;;  %v2658_v49 = vmul.f32 0.17677669, %v4066_v5  ;;  %2684 = vmax.xlane.f32.xlu0 %v5881_v16 }
 0x84f   : > { %v2605_v38 = vpop.f32.mrf.mxu0 }
 0x850   : > { %2686 = vmax.xlane.f32.xlu1 %v5884_v26  ;;  %v5892_v25 = vadd.f32 %v2658_v49, %v6693_v11  ;;  %v2656_v56 = vmul.f32 0.17677669, %v2605_v38 }
 0x851   : > { %v4067_v23 = vpop.f32.mrf.mxu0 }
 0x852   : > { %v2659_v32 = vmul.f32 0.17677669, %v4067_v23  ;;  %2690 = vmax.xlane.f32.xlu0 %v5888_v15  ;;  %v5900_v60 = vadd.f32 %v2656_v56, %v6695_v61 }
 0x853   : > { %v2608_v1 = vpop.f32.mrf.mxu0 }
 0x854   : > { %v5896_v36 = vadd.f32 %v2659_v32, %v6694_v13  ;;  %v2657_v41 = vmul.f32 0.17677669, %v2608_v1  ;;  %2696 = vmax.xlane.f32.xlu1 %v5892_v25 }
 0x855   : > { %v4070_v21 = vpop.f32.mrf.mxu0 }
 0x856   : > { %v2662_v35 = vmul.f32 0.17677669, %v4070_v21  ;;  %2698 = vmax.xlane.f32.xlu0 %v5896_v36  ;;  %v5904_v34 = vadd.f32 %v2657_v41, %v6696_v45 }
 0x857   : > { %v2621_v11 = vpop.f32.mrf.mxu0 }
 0x858   : > { %2692 = vmax.xlane.f32.xlu1 %v5900_v60  ;;  %v5908_v13 = vadd.f32 %v2662_v35, %v6697_v14  ;;  %v2660_v6 = vmul.f32 0.17677669, %v2621_v11 }
 0x859   : > { %v4071_v20 = vpop.f32.mrf.mxu0 }
 0x85a   : > { %v2663_v22 = vmul.f32 0.17677669, %v4071_v20  ;;  %2694 = vmax.xlane.f32.xlu0 %v5904_v34  ;;  %v5916_v45 = vadd.f32 %v2660_v6, %v6699_v18 }
 0x85b   : > { %v2624_v58 = vpop.f32.mrf.mxu0 }
 0x85c   : > { %v5912_v61 = vadd.f32 %v2663_v22, %v6698_v19  ;;  %v2661_v7 = vmul.f32 0.17677669, %v2624_v58  ;;  %2704 = vmax.xlane.f32.xlu1 %v5908_v13 }
 0x85d   : > { %v4074_v3 = vpop.f32.mrf.mxu0 }
 0x85e   : > { %v2666_v10 = vmul.f32 0.17677669, %v4074_v3  ;;  %2706 = vmax.xlane.f32.xlu0 %v5912_v61  ;;  %v5920_v28 = vadd.f32 %v2661_v7, %v6700_v53 }
 0x85f   : > { %v2637_v14 = vpop.f32.mrf.mxu0 }
 0x860   : > { %2700 = vmax.xlane.f32.xlu1 %v5916_v45  ;;  %v5924_v19 = vadd.f32 %v2666_v10, %v6701_v29  ;;  %v2664_v59 = vmul.f32 0.17677669, %v2637_v14  ;;  %v6726_v29 = vld [vmem:[#allocation100_spill] sm:$0xff] }
 0x861   : > { %v4075_v31 = vpop.f32.mrf.mxu0 }
 0x862   : > { %v2667_v17 = vmul.f32 0.17677669, %v4075_v31  ;;  %2702 = vmax.xlane.f32.xlu0 %v5920_v28  ;;  %v5932_v53 = vadd.f32 %v2664_v59, %v6703_v4 }
 0x863   : > { %v2640_v30 = vpop.f32.mrf.mxu0 }
 0x864   : > { %v5928_v18 = vadd.f32 %v2667_v17, %v6702_v8  ;;  %v2665_v50 = vmul.f32 0.17677669, %v2640_v30  ;;  %2712 = vmax.xlane.f32.xlu1 %v5924_v19  ;;  %v6727_v8 = vld [vmem:[#allocation104_spill] sm:$0xff] }
 0x866   : > { %2714 = vmax.xlane.f32.xlu0 %v5928_v18  ;;  %v5936_v12 = vadd.f32 %v2665_v50, %v6704_v37  ;;  %v6729_v50 = vld [vmem:[#allocation118_spill] sm:$0xff] }
 0x868   : > { %2708 = vmax.xlane.f32.xlu1 %v5932_v53 }
 0x86a   : > { %2710 = vmax.xlane.f32.xlu0 %v5936_v12 }
 0x879   : > { %2874 = vrot.lane.b32.xlu1 %v6726_v29, %s4658_s9 }
 0x880   : > { %2872 = vrot.lane.b32.xlu0 %v6727_v8, %s4658_s9 }
 0x8d3   : > { %v2689_v48 = vpop.xlane.xlu0 %2688 }
 0x8d4   : > { %v2718_v24 = vsub.f32 %v5877_v52, %v2689_v48 }
 0x8d6   : > { %v2736_v4 = vmul.f32 1.442695, %v2718_v24 }
 0x8d7   : > { %v2685_v63 = vpop.xlane.xlu0 %2684 }
 0x8d8   : > { %4357 = vpow2.f32 %v2736_v4  ;;  %v2716_v40 = vsub.f32 %v5881_v16, %v2685_v63 }
 0x8d9   : > { %v2687_v37 = vpop.xlane.xlu1 %2686 }
 0x8da   : > { %v2732_v62 = vmul.f32 1.442695, %v2716_v40  ;;  %v2717_v33 = vsub.f32 %v5884_v26, %v2687_v37 }
 0x8db   : > { %v2691_v5 = vpop.xlane.xlu0 %2690 }
 0x8dc   : > { %4359 = vpow2.f32 %v2732_v62  ;;  %v2719_v49 = vsub.f32 %v5888_v15, %v2691_v5  ;;  %v2734_v38 = vmul.f32 1.442695, %v2717_v33  ;;  %v6731_v62 = vld [vmem:[#allocation119_spill] sm:$0xff] }
 0x8dd   : > { %v2697_v23 = vpop.xlane.xlu1 %2696 }
 0x8de   : > { %v2738_v56 = vmul.f32 1.442695, %v2719_v49  ;;  %v2722_v32 = vsub.f32 %v5892_v25, %v2697_v23  ;;  %v6732_v23 = vld [vmem:[#allocation109_spill] sm:$0xff] }
 0x8df   : > { %v2699_v1 = vpop.xlane.xlu0 %2698 }
 0x8e0   : > { %4361 = vpow2.f32 %v2738_v56  ;;  %v2744_v52 = vmul.f32 1.442695, %v2722_v32  ;;  %v2723_v41 = vsub.f32 %v5896_v36, %v2699_v1  ;;  %v6733_v56 = vld [vmem:[#allocation114_spill] sm:$0xff] }
 0x8e1   : > { %4363 = vpow2.f32 %v2734_v38  ;;  %v2693_v16 = vpop.xlane.xlu1 %2692  ;;  %v1841_v32 = vadd.f32 %v6733_v56, %v6732_v23 }
 0x8e2   : > { %4365 = vpow2.f32 %v2744_v52  ;;  %v2746_v21 = vmul.f32 1.442695, %v2723_v41  ;;  %v2720_v26 = vsub.f32 %v5900_v60, %v2693_v16 }
 0x8e3   : > { %v2695_v35 = vpop.xlane.xlu0 %2694 }
 0x8e4   : > { %v2740_v11 = vmul.f32 1.442695, %v2720_v26  ;;  %v2721_v15 = vsub.f32 %v5904_v34, %v2695_v35  ;;  %4367 = vpow2.f32 %v2746_v21 }
 0x8e5   : > { %v4358_v20 = vpop.eup %4357  ;;  %v2705_v6 = vpop.xlane.xlu1 %2704 }
 0x8e6   : > { %4369 = vpow2.f32 %v2740_v11  ;;  %v2742_v25 = vmul.f32 1.442695, %v2721_v15  ;;  %v2726_v22 = vsub.f32 %v5908_v13, %v2705_v6  ;;  %v5954_v58 = vmul.f32 %v4358_v20, %v6554_v2  ;;  %v6734_v20 = vld [vmem:[#allocation110_spill] sm:$0xff]  ;;  %v6735_v6 = vld [vmem:[#allocation117_spill] sm:$0xff] }
 0x8e7   : > { %v2707_v36 = vpop.xlane.xlu0 %2706 }
 0x8e8   : > { %v2752_v7 = vmul.f32 1.442695, %v2726_v22  ;;  %v2727_v3 = vsub.f32 %v5912_v61, %v2707_v36  ;;  %2784 = vadd.xlane.f32.xlu1 %v5954_v58  ;;  %4371 = vpow2.f32 %v2742_v25  ;;  %v6728_v61 = vld [vmem:[#allocation123_spill] sm:$0xff]  ;;  %v1833_v25 = vadd.f32 %v6735_v6, %v6734_v20 }
 0x8e9   : > { %v4360_v60 = vpop.eup %4359  ;;  %v2701_v10 = vpop.xlane.xlu1 %2700  ;;  %v1838_v29 = vadd.f32 %v6729_v50, %v6728_v61  ;;  %v6744_v6 = vld [vmem:[#allocation35_spill] sm:$0xff] }
 0x8ea   : > { %4373 = vpow2.f32 %v2752_v7  ;;  %v2754_v34 = vmul.f32 1.442695, %v2727_v3  ;;  %v2724_v14 = vsub.f32 %v5916_v45, %v2701_v10  ;;  %v5960_v31 = vmul.f32 %v4360_v60, %v6555_v0  ;;  %v6736_v3 = vld [vmem:[#allocation107_spill] sm:$0xff]  ;;  %v6737_v60 = vld [vmem:[#allocation116_spill] sm:$0xff] }
 0x8eb   : > { %v2703_v13 = vpop.xlane.xlu0 %2702  ;;  %v1854_v10 = vadd.f32 %v6737_v60, %v6736_v3  ;;  %v6745_v3 = vld [vmem:[#allocation127_spill] sm:$0xff] }
 0x8ec   : > { %v2748_v59 = vmul.f32 1.442695, %v2724_v14  ;;  %v2725_v17 = vsub.f32 %v5920_v28, %v2703_v13  ;;  %2780 = vadd.xlane.f32.xlu1 %v5960_v31  ;;  %4375 = vpow2.f32 %v2754_v34  ;;  %v6730_v28 = vld [vmem:[#allocation120_spill] sm:$0xff] }
 0x8ed   : > { %v4362_v30 = vpop.eup %4361  ;;  %v2713_v8 = vpop.xlane.xlu1 %2712  ;;  %v1830_v33 = vadd.f32 %v6731_v62, %v6730_v28  ;;  %v6741_v28 = vld [vmem:[#allocation121_spill] sm:$0xff] }
 0x8ee   : > { %v4364_v48 = vpop.eup %4363  ;;  %4377 = vpow2.f32 %v2748_v59  ;;  %v2750_v24 = vmul.f32 1.442695, %v2725_v17  ;;  %v2730_v45 = vsub.f32 %v5924_v19, %v2713_v8  ;;  %v5968_v4 = vmul.f32 %v4362_v30, %v6628_v47  ;;  %v6739_v8 = vld [vmem:[#allocation122_spill] sm:$0xff] }
 0x8ef   : > { %v4366_v63 = vpop.eup %4365  ;;  %v4042_v40 = vpop.f32.mrf.mxu1  ;;  %v5982_v41 = vmul.f32 %v4364_v48, %v6630_v54 }
 0x8f0   : > { %v2715_v37 = vpop.xlane.xlu0 %2714  ;;  %v2760_v5 = vmul.f32 1.442695, %v2730_v45  ;;  %v5972_v49 = vadd.f32 %v4042_v40, %v1838_v29  ;;  %2786 = vadd.xlane.f32.xlu0 %v5968_v4  ;;  %4379 = vpow2.f32 %v2750_v24  ;;  %v5979_v52 = vmul.f32 %v4366_v63, %v6629_v44  ;;  %v6738_v29 = vld [vmem:[#allocation108_spill] sm:$0xff] }
 0x8f1   : > { %v2731_v38 = vsub.f32 %v5928_v18, %v2715_v37  ;;  %v2434_v19 = vpop.f32.mrf.mxu1  ;;  %v2709_v1 = vpop.xlane.xlu1 %2708  ;;  %v1846_v48 = vadd.f32 %v6739_v8, %v6738_v29  ;;  %v6740_v37 = vld [vmem:[#allocation124_spill] sm:$0xff]  ;;  %v6749_v8 = vld [vmem:[#allocation129_spill] sm:$0xff] }
 0x8f2   : > { %v4368_v16 = vpop.eup %4367  ;;  %4381 = vpow2.f32 %v2760_v5  ;;  %v5984_v26 = vadd.f32 %v2434_v19, %v1830_v33  ;;  %v2728_v18 = vsub.f32 %v5932_v53, %v2709_v1  ;;  %2792 = vadd.xlane.f32.xlu1 %v5979_v52  ;;  %v1857_v62 = vadd.f32 %v6741_v28, %v6740_v37 }
 0x8f3   : > { %v2762_v21 = vmul.f32 1.442695, %v2731_v38  ;;  %v4370_v35 = vpop.eup %4369  ;;  %v4043_v11 = vpop.f32.mrf.mxu1  ;;  %v6002_v30 = vmul.f32 %v4368_v16, %v6632_v55  ;;  %v6742_v16 = vld [vmem:[#allocation125_spill] sm:$0xff] }
 0x8f4   : > { %v2711_v15 = vpop.xlane.xlu0 %2710  ;;  %v2756_v22 = vmul.f32 1.442695, %v2728_v18  ;;  %v5990_v36 = vadd.f32 %v4043_v11, %v1841_v32  ;;  %2782 = vadd.xlane.f32.xlu0 %v5982_v41  ;;  %v5997_v14 = vmul.f32 %v4370_v35, %v6631_v57 }
 0x8f5   : > { %v2729_v7 = vsub.f32 %v5936_v12, %v2711_v15  ;;  %4383 = vpow2.f32 %v2762_v21  ;;  %v2437_v53 = vpop.f32.mrf.mxu1  ;;  %v2875_v34 = vpop.permute.xlu1 %2874  ;;  %v6743_v15 = vld [vmem:[#allocation126_spill] sm:$0xff] }
 0x8f6   : > { %v4372_v13 = vpop.eup %4371  ;;  %4385 = vpow2.f32 %v2756_v22  ;;  %v5999_v17 = vadd.f32 %v2437_v53, %v1833_v25  ;;  %4084 = vmatprep.subr.bf16.mxu1 %v2875_v34  ;;  %2788 = vadd.xlane.f32.xlu1 %v5997_v14 }
 0x8f7   : > { %v2758_v59 = vmul.f32 1.442695, %v2729_v7  ;;  %v4374_v12 = vpop.eup %4373  ;;  %v4046_v61 = vpop.f32.mrf.mxu1  ;;  %4085 = vmatpush3.bf16.msra.mxu1 %v2875_v34  ;;  %v6018_v5 = vmul.f32 %v4372_v13, %v6633_v27 }
 0x8f8   : > { %v2873_v50 = vpop.permute.xlu0 %2872  ;;  %v6007_v24 = vadd.f32 %v4046_v61, %v1854_v10  ;;  %2794 = vadd.xlane.f32.xlu0 %v6002_v30  ;;  %v6011_v45 = vmul.f32 %v4374_v12, %v6634_v42  ;;  %v6746_v10 = vld [vmem:[#allocation30_spill] sm:$0xff]  ;;  %v6748_v61 = vld [vmem:[#allocation33_spill] sm:$0xff] }
 0x8f9   : > { %4086 = vmatprep.subr.bf16.mxu1 %v2873_v50  ;;  %v2450_v63 = vpop.f32.mrf.mxu1  ;;  %v4376_v40 = vpop.eup %4375  ;;  %4387 = vpow2.f32 %v2758_v59  ;;  %v6747_v59 = vld [vmem:[#allocation128_spill] sm:$0xff] }
 0x8fa   : > { %v6015_v33 = vadd.f32 %v2450_v63, %v1846_v48  ;;  %2800 = vadd.xlane.f32.xlu1 %v6011_v45  ;;  %v6031_v18 = vmul.f32 %v4376_v40, %v6638_v43  ;;  %v6750_v63 = vld [vmem:[#allocation36_spill] sm:$0xff] }
 0x8fb   : > { %v4378_v38 = vpop.eup %4377  ;;  %v4047_v23 = vpop.f32.mrf.mxu1  ;;  %4087 = vmatpush3.bf16.msra.mxu1 %v2873_v50 }
 0x8fc   : > { %v6021_v56 = vadd.f32 %v4047_v23, %v1857_v62  ;;  %2790 = vadd.xlane.f32.xlu0 %v6018_v5  ;;  %v6025_v32 = vmul.f32 %v4378_v38, %v6636_v39  ;;  %v6751_v62 = vld [vmem:[#allocation130_spill] sm:$0xff] }
 0x8fd   : > { %v2453_v19 = vpop.f32.mrf.mxu1  ;;  %v4380_v1 = vpop.eup %4379 }
 0x8fe   : > { %v6028_v21 = vadd.f32 %v2453_v19, %v6742_v16  ;;  %2796 = vadd.xlane.f32.xlu1 %v6025_v32  ;;  %v6045_v53 = vmul.f32 %v4380_v1, %v6746_v10  ;;  %v6752_v19 = vld [vmem:[#allocation131_spill] sm:$0xff]  ;;  %v6753_v16 = vld [vmem:[#allocation34_spill] sm:$0xff] }
 0x8ff   : > { %v4382_v35 = vpop.eup %4381  ;;  %v4050_v11 = vpop.f32.mrf.mxu1 }
 0x900   : > { %v6035_v20 = vadd.f32 %v4050_v11, %v6743_v15  ;;  %2802 = vadd.xlane.f32.xlu0 %v6031_v18  ;;  %v6039_v25 = vmul.f32 %v4382_v35, %v6744_v6  ;;  %v6754_v15 = vld [vmem:[#allocation132_spill] sm:$0xff] }
 0x901   : > { %v2466_v22 = vpop.f32.mrf.mxu1 }
 0x902   : > { %v4384_v7 = vpop.eup %4383  ;;  %v6042_v60 = vadd.f32 %v2466_v22, %v6745_v3  ;;  %2808 = vadd.xlane.f32.xlu1 %v6039_v25  ;;  %v6755_v22 = vld [vmem:[#allocation105_spill] sm:$0xff] }
 0x903   : > { %v4386_v34 = vpop.eup %4385  ;;  %v4051_v13 = vpop.f32.mrf.mxu1  ;;  %v6059_v40 = vmul.f32 %v4384_v7, %v6750_v63  ;;  %v6756_v7 = vld [vmem:[#allocation106_spill] sm:$0xff] }
 0x904   : > { %v6049_v12 = vadd.f32 %v4051_v13, %v6747_v59  ;;  %2798 = vadd.xlane.f32.xlu0 %v6045_v53  ;;  %v6053_v50 = vmul.f32 %v4386_v34, %v6748_v61 }
 0x905   : > { %v2469_v29 = vpop.f32.mrf.mxu1 }
 0x906   : > { %v6056_v48 = vadd.f32 %v2469_v29, %v6749_v8  ;;  %v4388_v37 = vpop.eup %4387  ;;  %2804 = vadd.xlane.f32.xlu1 %v6053_v50 }
 0x907   : > { %v4054_v28 = vpop.f32.mrf.mxu1  ;;  %v6070_v35 = vmul.f32 %v4388_v37, %v6753_v16 }
 0x908   : > { %v6063_v38 = vadd.f32 %v4054_v28, %v6751_v62  ;;  %2810 = vadd.xlane.f32.xlu0 %v6059_v40 }
 0x909   : > { %v2482_v23 = vpop.f32.mrf.mxu1 }
 0x90a   : > { %v6067_v1 = vadd.f32 %v2482_v23, %v6752_v19 }
 0x90b   : > { %v4055_v11 = vpop.f32.mrf.mxu1 }
 0x90c   : > { %v6073_v6 = vadd.f32 %v4055_v11, %v6754_v15  ;;  %2806 = vadd.xlane.f32.xlu0 %v6070_v35 }
 0x917   : > { %2870 = vrot.lane.b32.xlu1 %v6755_v22, %s4658_s9 }
 0x922   : > { %2868 = vrot.lane.b32.xlu0 %v6756_v7, %s4658_s9 }
 0x971   : > { %v2785_v3 = vpop.xlane.xlu1 %2784 }
 0x972   : > { %v2814_v23 = vadd.f32 1e-09, %v2785_v3 }
 0x975   : > { %v2781_v10 = vpop.xlane.xlu1 %2780 }
 0x976   : > { %v2812_v13 = vadd.f32 1e-09, %v2781_v10 }
 0x978   : > { %4389 = vrcp.f32 %v2812_v13 }
 0x979   : > { %v2787_v34 = vpop.xlane.xlu0 %2786 }
 0x97a   : > { %v2815_v37 = vadd.f32 1e-09, %v2787_v34 }
 0x97b   : > { %v2793_v59 = vpop.xlane.xlu1 %2792 }
 0x97d   : > { %v2783_v61 = vpop.xlane.xlu0 %2782 }
 0x97e   : > { %v2813_v29 = vadd.f32 1e-09, %v2783_v61 }
 0x97f   : > { %v2789_v8 = vpop.xlane.xlu1 %2788 }
 0x980   : > { %4391 = vrcp.f32 %v2813_v29  ;;  %v2816_v16 = vadd.f32 1e-09, %v2789_v8  ;;  %v2818_v29 = vadd.f32 1e-09, %v2793_v59 }
 0x981   : > { %v2795_v63 = vpop.xlane.xlu0 %2794  ;;  %4393 = vrcp.f32 %v2815_v37 }
 0x982   : > { %v2819_v7 = vadd.f32 1e-09, %v2795_v63 }
 0x983   : > { %v2801_v28 = vpop.xlane.xlu1 %2800 }
 0x985   : > { %v2791_v62 = vpop.xlane.xlu0 %2790  ;;  %v4390_v22 = vpop.eup %4389 }
 0x986   : > { %v2817_v19 = vadd.f32 1e-09, %v2791_v62  ;;  %v2844_v34 = vmul.f32 %v4390_v22, %v5960_v31 }
 0x987   : > { %v2797_v11 = vpop.xlane.xlu1 %2796 }
 0x988   : > { %4395 = vrcp.f32 %v2817_v19  ;;  %v2820_v3 = vadd.f32 1e-09, %v2797_v11 }
 0x989   : > { %v2803_v15 = vpop.xlane.xlu0 %2802  ;;  %4397 = vrcp.f32 %v2814_v23 }
 0x98a   : > { %4399 = vrcp.f32 %v2816_v16  ;;  %v2823_v23 = vadd.f32 1e-09, %v2803_v15 }
 0x98b   : > { %v2809_v10 = vpop.xlane.xlu1 %2808  ;;  %4401 = vrcp.f32 %v2819_v7 }
 0x98d   : > { %v4392_v13 = vpop.eup %4391  ;;  %v2799_v61 = vpop.xlane.xlu0 %2798 }
 0x98e   : > { %v2821_v0 = vadd.f32 1e-09, %v2799_v61  ;;  %v2845_v2 = vmul.f32 %v4392_v13, %v5982_v41  ;;  %v4394_v19 = vpop.eup %4393  ;;  %v2822_v61 = vadd.f32 1e-09, %v2801_v28 }
 0x98f   : > { %v2805_v8 = vpop.xlane.xlu1 %2804 }
 0x990   : > { %v2860_v37 = vpack.c.bf16 %v2845_v2, %v2844_v34  ;;  %4403 = vrcp.f32 %v2821_v0  ;;  %v2824_v41 = vadd.f32 1e-09, %v2805_v8  ;;  %v2847_v2 = vmul.f32 %v4394_v19, %v5968_v4 }
 0x991   : > { %v2811_v62 = vpop.xlane.xlu0 %2810  ;;  %4405 = vrcp.f32 %v2818_v29 }
 0x992   : > { %4092 = vmatprep.mubr.bf16.mxu1 %v2860_v37  ;;  %4407 = vrcp.f32 %v2820_v3  ;;  %v2827_v13 = vadd.f32 1e-09, %v2811_v62  ;;  %v2826_v37 = vadd.f32 1e-09, %v2809_v10 }
 0x993   : > { %v2871_v63 = vpop.permute.xlu1 %2870  ;;  %4409 = vrcp.f32 %v2823_v23 }
 0x994   : > { %4088 = vmatprep.subr.bf16.mxu1 %v2871_v63 }
 0x995   : > { %v2807_v16 = vpop.xlane.xlu0 %2806  ;;  %v4396_v59 = vpop.eup %4395  ;;  %4089 = vmatpush3.bf16.msra.mxu1 %v2871_v63 }
 0x996   : > { %v2825_v31 = vadd.f32 1e-09, %v2807_v16  ;;  %v4398_v22 = vpop.eup %4397  ;;  %v2849_v7 = vmul.f32 %v4396_v59, %v6018_v5 }
 0x997   : > { %v4400_v11 = vpop.eup %4399  ;;  %v2846_v15 = vmul.f32 %v4398_v22, %v5954_v58 }
 0x998   : > { %4411 = vrcp.f32 %v2825_v31  ;;  %v2848_v28 = vmul.f32 %v4400_v11, %v5997_v14  ;;  %v4402_v34 = vpop.eup %4401 }
 0x999   : > { %v2869_v0 = vpop.permute.xlu0 %2868  ;;  %4413 = vrcp.f32 %v2822_v61  ;;  %v2861_v29 = vpack.c.bf16 %v2847_v2, %v2846_v15  ;;  %v2851_v5 = vmul.f32 %v4402_v34, %v6002_v30  ;;  %v6096_v15 = vpop.f32.mrf.mxu1 }
 0x99a   : > { %4090 = vmatprep.subr.bf16.mxu1 %v2869_v0  ;;  %4415 = vrcp.f32 %v2824_v41  ;;  %v2862_v3 = vpack.c.bf16 %v2849_v7, %v2848_v28 }
 0x99b   : > { %4091 = vmatpush3.bf16.msra.mxu1 %v2869_v0  ;;  %4417 = vrcp.f32 %v2827_v13 }
 0x99c   : > { %4419 = vrcp.f32 %v2826_v37 }
 0x99d   : > { %v4404_v8 = vpop.eup %4403 }
 0x99e   : > { %4093 = vmatmul.mubr.bf16.vlgmr.msra.gmra.mxu1 %v2861_v29  ;;  %v4406_v4 = vpop.eup %4405  ;;  %v2853_v63 = vmul.f32 %v4404_v8, %v6045_v53 }
 0x99f   : > { %4096 = vmatprep.mubr.bf16.mxu1 %v2862_v3  ;;  %v4408_v23 = vpop.eup %4407  ;;  %v2850_v58 = vmul.f32 %v4406_v4, %v5979_v52 }
 0x9a0   : > { %v2852_v14 = vmul.f32 %v4408_v23, %v6025_v32  ;;  %v4410_v19 = vpop.eup %4409 }
 0x9a1   : > { %v2863_v62 = vpack.c.bf16 %v2851_v5, %v2850_v58  ;;  %v2855_v31 = vmul.f32 %v4410_v19, %v6031_v18 }
 0x9a2   : > { %v2864_v16 = vpack.c.bf16 %v2853_v63, %v2852_v14 }
 0x9a5   : > { %v4412_v59 = vpop.eup %4411 }
 0x9a6   : > { %4097 = vmatmul.mubr.bf16.gmra.mxu1 %v2863_v62  ;;  %v4414_v10 = vpop.eup %4413  ;;  %v2857_v22 = vmul.f32 %v4412_v59, %v6070_v35 }
 0x9a7   : > { %4100 = vmatprep.mubr.bf16.mxu1 %v2864_v16  ;;  %v4416_v61 = vpop.eup %4415  ;;  %v2854_v30 = vmul.f32 %v4414_v10, %v6011_v45 }
 0x9a8   : > { %v2856_v53 = vmul.f32 %v4416_v61, %v6053_v50  ;;  %v4418_v52 = vpop.eup %4417 }
 0x9a9   : > { %v2865_v41 = vpack.c.bf16 %v2855_v31, %v2854_v30  ;;  %v4420_v32 = vpop.eup %4419  ;;  %v2859_v2 = vmul.f32 %v4418_v52, %v6059_v40  ;;  %v6757_v30 = vld [vmem:[#allocation88_spill] sm:$0xff] }
 0x9aa   : > { %v2866_v11 = vpack.c.bf16 %v2857_v22, %v2856_v53  ;;  %v2858_v0 = vmul.f32 %v4420_v32, %v6039_v25 }
 0x9ac   : > { %v2867_v7 = vpack.c.bf16 %v2859_v2, %v2858_v0 }
 0x9ae   : > { %4101 = vmatmul.mubr.bf16.gmra.mxu1 %v2865_v41 }
 0x9af   : > { %4104 = vmatprep.mubr.bf16.mxu1 %v2866_v11  ;;  %v4453_v11 = vld [vmem:[#allocation2 + $0x58] sm:$0xff] }
 0x9b6   : > { %4105 = vmatmul.mubr.bf16.gmra.mxu1 %v2867_v7 }
 0xa5e   : > { %v4094_v18 = vpop.f32.mrf.mxu1 }
 0xa60   : > { %v2926_v35 = vpop.f32.mrf.mxu1 }
 0xa62   : > { %v4095_v28 = vpop.f32.mrf.mxu1 }
 0xa63   : > { %v2990_v50 = vpack.c.bf16 %v4095_v28, %v4094_v18  ;;  %v4454_v28 = vld [vmem:[#allocation2 + $0x30] sm:$0xff] }
 0xa64   : > { %v2929_v45 = vpop.f32.mrf.mxu1 }
 0xa65   : > { %v2989_v13 = vpack.c.bf16 %v2929_v45, %v2926_v35 }
 0xa66   : > { %v4098_v29 = vpop.f32.mrf.mxu1 }
 0xa67   : > { %4112 = vmatprep.mubr.msk.bf16.mxu0 %vm707_vm0, %v2989_v13 }
 0xa68   : > { %v2942_v34 = vpop.f32.mrf.mxu1  ;;  %4113 = vmatmul.mubr.msk.bf16.vlgmr.msra.gmra.mxu0 %vm707_vm0, %v2990_v50 }
 0xa6a   : > { %v4099_v3 = vpop.f32.mrf.mxu1 }
 0xa6b   : > { %v2992_v25 = vpack.c.bf16 %v4099_v3, %v4098_v29 }
 0xa6c   : > { %v2945_v40 = vpop.f32.mrf.mxu1 }
 0xa6d   : > { %v2991_v8 = vpack.c.bf16 %v2945_v40, %v2942_v34  ;;  %v4456_v40 = vld [vmem:[#allocation2] sm:$0xff] }
 0xa6e   : > { %v4102_v37 = vpop.f32.mrf.mxu1 }
 0xa6f   : > { %4116 = vmatprep.mubr.msk.bf16.mxu0 %vm707_vm0, %v2991_v8 }
 0xa70   : > { %v2958_v4 = vpop.f32.mrf.mxu1  ;;  %4117 = vmatmul.mubr.msk.bf16.gmra.mxu0 %vm707_vm0, %v2992_v25  ;;  %v4457_v25 = vld [vmem:[#allocation2 + $0x8] sm:$0xff] }
 0xa72   : > { %v4103_v23 = vpop.f32.mrf.mxu1 }
 0xa73   : > { %v2994_v58 = vpack.c.bf16 %v4103_v23, %v4102_v37 }
 0xa74   : > { %v2961_v5 = vpop.f32.mrf.mxu1 }
 0xa75   : > { %v2993_v63 = vpack.c.bf16 %v2961_v5, %v2958_v4 }
 0xa76   : > { %v4106_v14 = vpop.f32.mrf.mxu1 }
 0xa77   : > { %4120 = vmatprep.mubr.msk.bf16.mxu0 %vm707_vm0, %v2993_v63 }
 0xa78   : > { %v2974_v62 = vpop.f32.mrf.mxu1  ;;  %4121 = vmatmul.mubr.msk.bf16.gmra.mxu0 %vm707_vm0, %v2994_v58  ;;  %v4458_v58 = vld [vmem:[#allocation2 + $0x50] sm:$0xff] }
 0xa7a   : > { %v4107_v19 = vpop.f32.mrf.mxu1 }
 0xa7b   : > { %v2996_v10 = vpack.c.bf16 %v4107_v19, %v4106_v14 }
 0xa7c   : > { %v2977_v16 = vpop.f32.mrf.mxu1 }
 0xa7d   : > { %v2995_v59 = vpack.c.bf16 %v2977_v16, %v2974_v62  ;;  %v4459_v62 = vld [vmem:[#allocation2 + $0x48] sm:$0xff] }
 0xa7f   : > { %4124 = vmatprep.mubr.msk.bf16.mxu0 %vm707_vm0, %v2995_v59 }
 0xa80   : > { %4125 = vmatmul.mubr.msk.bf16.gmra.mxu0 %vm707_vm0, %v2996_v10 }
 0xb28   : > { %v4114_v61 = vpop.f32.mrf.mxu0 }
 0xb29   : > { %v3120_v31 = vadd.f32 %v4114_v61, %v5972_v49 }
 0xb2a   : > { %v3055_v22 = vpop.f32.mrf.mxu0 }
 0xb2b   : > { %v3142_v53 = vadd.f32 %v6757_v30, %v3120_v31  ;;  %v3118_v41 = vadd.f32 %v3055_v22, %v5984_v26  ;;  %v4455_v26 = vld [vmem:[#allocation2 + $0x18] sm:$0xff]  ;;  %v4460_v31 = vld [vmem:[#allocation2 + $0x68] sm:$0xff] }
 0xb2c   : > { %v4115_v52 = vpop.f32.mrf.mxu0 }
 0xb2d   : > { %v6109_v32 = vadd.f32 %v4453_v11, %v3142_v53  ;;  %v3140_v2 = vadd.f32 %v6757_v30, %v3118_v41  ;;  %v3121_v0 = vadd.f32 %v4115_v52, %v5990_v36  ;;  %v4461_v53 = vld [vmem:[#allocation2 + $0x10] sm:$0xff] }
 0xb2e   : > { %v3058_v7 = vpop.f32.mrf.mxu0 }
 0xb2f   : > { %v3143_v18 = vadd.f32 %v6757_v30, %v3121_v0  ;;  %v3119_v35 = vadd.f32 %v3058_v7, %v5999_v17  ;;  %3176 = vadd.xlane.f32.xlu1 %v6109_v32  ;;  %v6116_v45 = vadd.f32 %v4454_v28, %v3140_v2  ;;  %v4462_v7 = vld [vmem:[#allocation2 + $0x40] sm:$0xff] }
 0xb30   : > { %v4118_v49 = vpop.f32.mrf.mxu0 }
 0xb31   : > { %v6118_v13 = vadd.f32 %v4455_v26, %v3143_v18  ;;  %v3141_v50 = vadd.f32 %v6757_v30, %v3119_v35  ;;  %v3124_v29 = vadd.f32 %v4118_v49, %v6007_v24  ;;  %v4463_v35 = vld [vmem:[#allocation2 + $0x38] sm:$0xff] }
 0xb32   : > { %v3071_v34 = vpop.f32.mrf.mxu0 }
 0xb33   : > { %v3146_v36 = vadd.f32 %v6757_v30, %v3124_v29  ;;  %v3122_v3 = vadd.f32 %v3071_v34, %v6015_v33  ;;  %3172 = vadd.xlane.f32.xlu1 %v6116_v45  ;;  %3178 = vadd.xlane.f32.xlu0 %v6118_v13  ;;  %v6126_v8 = vadd.f32 %v4456_v40, %v3141_v50 }
 0xb34   : > { %v4119_v17 = vpop.f32.mrf.mxu0 }
 0xb35   : > { %v6128_v37 = vadd.f32 %v4457_v25, %v3146_v36  ;;  %v3144_v4 = vadd.f32 %v6757_v30, %v3122_v3  ;;  %v3125_v24 = vadd.f32 %v4119_v17, %v6021_v56  ;;  %v4464_v3 = vld [vmem:[#allocation2 + $0x20] sm:$0xff] }
 0xb36   : > { %v3074_v23 = vpop.f32.mrf.mxu0 }
 0xb37   : > { %v3147_v5 = vadd.f32 %v6757_v30, %v3125_v24  ;;  %v3123_v33 = vadd.f32 %v3074_v23, %v6028_v21  ;;  %3174 = vadd.xlane.f32.xlu0 %v6126_v8  ;;  %3184 = vadd.xlane.f32.xlu1 %v6128_v37  ;;  %v6136_v14 = vadd.f32 %v4458_v58, %v3144_v4 }
 0xb38   : > { %v4122_v63 = vpop.f32.mrf.mxu0 }
 0xb39   : > { %v6138_v19 = vadd.f32 %v4459_v62, %v3147_v5  ;;  %v3145_v16 = vadd.f32 %v6757_v30, %v3123_v33  ;;  %v3128_v56 = vadd.f32 %v4122_v63, %v6035_v20  ;;  %v4467_v63 = vld [vmem:[#allocation2 + $0x70] sm:$0xff] }
 0xb3a   : > { %v3087_v59 = vpop.f32.mrf.mxu0 }
 0xb3b   : > { %v3150_v10 = vadd.f32 %v6757_v30, %v3128_v56  ;;  %v3126_v21 = vadd.f32 %v3087_v59, %v6042_v60  ;;  %3180 = vadd.xlane.f32.xlu1 %v6136_v14  ;;  %3186 = vadd.xlane.f32.xlu0 %v6138_v19  ;;  %v6146_v22 = vadd.f32 %v4460_v31, %v3145_v16 }
 0xb3c   : > { %v4123_v61 = vpop.f32.mrf.mxu0 }
 0xb3d   : > { %v6148_v41 = vadd.f32 %v4461_v53, %v3150_v10  ;;  %v3148_v52 = vadd.f32 %v6757_v30, %v3126_v21  ;;  %v3129_v20 = vadd.f32 %v4123_v61, %v6049_v12  ;;  %v6758_v12 = vld [vmem:[#allocation133_spill] sm:$0xff] }
 0xb3e   : > { %v3090_v11 = vpop.f32.mrf.mxu0  ;;  %v1881_v50 = vadd.f32 %v5866_v9, %v6758_v12  ;;  %v4465_v9 = vld [vmem:[#allocation2 + $0x60] sm:$0xff] }
 0xb3f   : > { %v3151_v2 = vadd.f32 %v6757_v30, %v3129_v20  ;;  %v3127_v60 = vadd.f32 %v3090_v11, %v6056_v48  ;;  %3182 = vadd.xlane.f32.xlu0 %v6146_v22  ;;  %3192 = vadd.xlane.f32.xlu1 %v6148_v41  ;;  %v6156_v18 = vadd.f32 %v4462_v7, %v3148_v52 }
 0xb40   : > { %v4126_v0 = vpop.f32.mrf.mxu0  ;;  %v2510_v36 = vadd.f32 %v6096_v15, %v1881_v50  ;;  %v4466_v15 = vld [vmem:[#allocation2 + $0x78] sm:$0xff] }
 0xb41   : > { %v6158_v49 = vadd.f32 %v4463_v35, %v3151_v2  ;;  %v3149_v28 = vadd.f32 %v6757_v30, %v3127_v60  ;;  %v3132_v29 = vadd.f32 %v4126_v0, %v6063_v38 }
 0xb42   : > { %v3103_v26 = vpop.f32.mrf.mxu0 }
 0xb43   : > { %v3130_v48 = vadd.f32 %v3103_v26, %v6067_v1  ;;  %3188 = vadd.xlane.f32.xlu1 %v6156_v18  ;;  %3194 = vadd.xlane.f32.xlu0 %v6158_v49  ;;  %v6168_v17 = vadd.f32 %v4464_v3, %v3149_v28  ;;  %v3154_v4 = vadd.f32 %v6757_v30, %v3132_v29 }
 0xb44   : > { %v4127_v34 = vpop.f32.mrf.mxu0 }
 0xb45   : > { %v3152_v40 = vadd.f32 %v6757_v30, %v3130_v48  ;;  %v3133_v38 = vadd.f32 %v4127_v34, %v6073_v6  ;;  %v6178_v5 = vadd.f32 %v4466_v15, %v3154_v4  ;;  %v4468_v6 = vld [vmem:[#allocation2 + $0x28] sm:$0xff] }
 0xb46   : > { %v3106_v25 = vpop.f32.mrf.mxu0 }
 0xb47   : > { %v6172_v24 = vadd.f32 %v4465_v9, %v3152_v40  ;;  %v3131_v1 = vadd.f32 %v3106_v25, %v2510_v36  ;;  %3190 = vadd.xlane.f32.xlu0 %v6168_v17  ;;  %v3155_v33 = vadd.f32 %v6757_v30, %v3133_v38 }
 0xb49   : > { %v3153_v23 = vadd.f32 %v6757_v30, %v3131_v1  ;;  %3196 = vadd.xlane.f32.xlu1 %v6172_v24  ;;  %v6185_v62 = vadd.f32 %v4468_v6, %v3155_v33 }
 0xb4b   : > { %v6181_v58 = vadd.f32 %v4467_v63, %v3153_v23 }
 0xb4d   : > { %3200 = vadd.xlane.f32.xlu1 %v6178_v5  ;;  %3198 = vadd.xlane.f32.xlu0 %v6181_v58 }
 0xb51   : > { %3202 = vadd.xlane.f32.xlu0 %v6185_v62 }
 0xbb8   : > { %v3177_v16 = vpop.xlane.xlu1 %3176 }
 0xbb9   : > { %v3207_v56 = vmul.f32 0.0078125, %v3177_v16 }
 0xbbb   : > { %v6189_v59 = vsub.f32 %v6109_v32, %v3207_v56 }
 0xbbc   : > { %v3173_v10 = vpop.xlane.xlu1 %3172  ;;  %v3179_v21 = vpop.xlane.xlu0 %3178 }
 0xbbd   : > { %v3205_v61 = vmul.f32 0.0078125, %v3173_v10  ;;  %v3208_v31 = vmul.f32 0.0078125, %v3179_v21  ;;  %v3239_v53 = vmul.f32 %v6189_v59, %v6189_v59 }
 0xbbf   : > { %v6194_v52 = vsub.f32 %v6116_v45, %v3205_v61  ;;  %v6197_v20 = vsub.f32 %v6118_v13, %v3208_v31  ;;  %3257 = vadd.xlane.f32.xlu1 %v3239_v53 }
 0xbc0   : > { %v3175_v11 = vpop.xlane.xlu0 %3174  ;;  %v3185_v2 = vpop.xlane.xlu1 %3184 }
 0xbc1   : > { %v3206_v60 = vmul.f32 0.0078125, %v3175_v11  ;;  %v3211_v0 = vmul.f32 0.0078125, %v3185_v2  ;;  %v3237_v32 = vmul.f32 %v6194_v52, %v6194_v52  ;;  %v3240_v7 = vmul.f32 %v6197_v20, %v6197_v20 }
 0xbc3   : > { %v6204_v35 = vsub.f32 %v6126_v8, %v3206_v60  ;;  %v6207_v45 = vsub.f32 %v6128_v37, %v3211_v0  ;;  %3253 = vadd.xlane.f32.xlu1 %v3237_v32  ;;  %3259 = vadd.xlane.f32.xlu0 %v3240_v7 }
 0xbc4   : > { %v3181_v13 = vpop.xlane.xlu1 %3180  ;;  %v3187_v28 = vpop.xlane.xlu0 %3186 }
 0xbc5   : > { %v3209_v26 = vmul.f32 0.0078125, %v3181_v13  ;;  %v3212_v12 = vmul.f32 0.0078125, %v3187_v28  ;;  %v3243_v50 = vmul.f32 %v6207_v45, %v6207_v45  ;;  %v3238_v29 = vmul.f32 %v6204_v35, %v6204_v35 }
 0xbc7   : > { %v6214_v48 = vsub.f32 %v6136_v14, %v3209_v26  ;;  %v6217_v8 = vsub.f32 %v6138_v19, %v3212_v12  ;;  %3265 = vadd.xlane.f32.xlu1 %v3243_v50  ;;  %3255 = vadd.xlane.f32.xlu0 %v3238_v29 }
 0xbc8   : > { %v3183_v37 = vpop.xlane.xlu0 %3182  ;;  %v3193_v34 = vpop.xlane.xlu1 %3192 }
 0xbc9   : > { %v3210_v36 = vmul.f32 0.0078125, %v3183_v37  ;;  %v3215_v3 = vmul.f32 0.0078125, %v3193_v34  ;;  %v3241_v40 = vmul.f32 %v6214_v48, %v6214_v48  ;;  %v3244_v25 = vmul.f32 %v6217_v8, %v6217_v8 }
 0xbcb   : > { %v6224_v4 = vsub.f32 %v6146_v22, %v3210_v36  ;;  %v6227_v14 = vsub.f32 %v6148_v41, %v3215_v3  ;;  %3261 = vadd.xlane.f32.xlu1 %v3241_v40  ;;  %3267 = vadd.xlane.f32.xlu0 %v3244_v25 }
 0xbcc   : > { %v3189_v19 = vpop.xlane.xlu1 %3188  ;;  %v3195_v9 = vpop.xlane.xlu0 %3194 }
 0xbcd   : > { %v3213_v38 = vmul.f32 0.0078125, %v3189_v19  ;;  %v3216_v1 = vmul.f32 0.0078125, %v3195_v9  ;;  %v3247_v23 = vmul.f32 %v6227_v14, %v6227_v14  ;;  %v3242_v15 = vmul.f32 %v6224_v4, %v6224_v4 }
 0xbcf   : > { %v6234_v33 = vsub.f32 %v6156_v18, %v3213_v38  ;;  %v6237_v22 = vsub.f32 %v6158_v49, %v3216_v1  ;;  %3273 = vadd.xlane.f32.xlu1 %v3247_v23  ;;  %3263 = vadd.xlane.f32.xlu0 %v3242_v15 }
 0xbd0   : > { %v3191_v41 = vpop.xlane.xlu0 %3190 }
 0xbd1   : > { %v3214_v63 = vmul.f32 0.0078125, %v3191_v41  ;;  %v3245_v6 = vmul.f32 %v6234_v33, %v6234_v33  ;;  %v3248_v16 = vmul.f32 %v6237_v22, %v6237_v22 }
 0xbd2   : > { %v3197_v56 = vpop.xlane.xlu1 %3196 }
 0xbd3   : > { %v6244_v10 = vsub.f32 %v6168_v17, %v3214_v63  ;;  %v3217_v21 = vmul.f32 0.0078125, %v3197_v56  ;;  %3269 = vadd.xlane.f32.xlu1 %v3245_v6  ;;  %3275 = vadd.xlane.f32.xlu0 %v3248_v16 }
 0xbd5   : > { %v6247_v18 = vsub.f32 %v6172_v24, %v3217_v21  ;;  %v3246_v49 = vmul.f32 %v6244_v10, %v6244_v10 }
 0xbd6   : > { %v3201_v61 = vpop.xlane.xlu1 %3200  ;;  %v3199_v31 = vpop.xlane.xlu0 %3198 }
 0xbd7   : > { %v3219_v53 = vmul.f32 0.0078125, %v3201_v61  ;;  %v3218_v11 = vmul.f32 0.0078125, %v3199_v31  ;;  %3271 = vadd.xlane.f32.xlu0 %v3246_v49  ;;  %v3249_v2 = vmul.f32 %v6247_v18, %v6247_v18 }
 0xbd9   : > { %v6254_v17 = vsub.f32 %v6178_v5, %v3219_v53  ;;  %v6257_v60 = vsub.f32 %v6181_v58, %v3218_v11  ;;  %3277 = vadd.xlane.f32.xlu1 %v3249_v2 }
 0xbda   : > { %v3203_v24 = vpop.xlane.xlu0 %3202 }
 0xbdb   : > { %v3220_v0 = vmul.f32 0.0078125, %v3203_v24  ;;  %v3251_v32 = vmul.f32 %v6254_v17, %v6254_v17  ;;  %v3250_v7 = vmul.f32 %v6257_v60, %v6257_v60  ;;  %v6759_v24 = vld [vmem:[#allocation89_spill] sm:$0xff] }
 0xbdd   : > { %v6264_v13 = vsub.f32 %v6185_v62, %v3220_v0  ;;  %3281 = vadd.xlane.f32.xlu1 %v3251_v32  ;;  %3279 = vadd.xlane.f32.xlu0 %v3250_v7 }
 0xbdf   : > { %v3252_v5 = vmul.f32 %v6264_v13, %v6264_v13 }
 0xbe1   : > { %3283 = vadd.xlane.f32.xlu0 %v3252_v5 }
 0xc48   : > { %v3258_v58 = vpop.xlane.xlu1 %3257 }
 0xc49   : > { %v3287_v28 = vmul.f32 0.0078125, %v3258_v58 }
 0xc4b   : > { %v3303_v26 = vadd.f32 1e-05, %v3287_v28  ;;  %v6760_v28 = vld [vmem:[#allocation90_spill] sm:$0xff] }
 0xc4c   : > { %v3254_v12 = vpop.xlane.xlu1 %3253  ;;  %v3260_v50 = vpop.xlane.xlu0 %3259 }
 0xc4d   : > { %4421 = vrsqrt.f32 %v3303_v26  ;;  %v3285_v29 = vmul.f32 0.0078125, %v3254_v12  ;;  %v3288_v37 = vmul.f32 0.0078125, %v3260_v50 }
 0xc4f   : > { %v3301_v34 = vadd.f32 1e-05, %v3285_v29  ;;  %v3304_v36 = vadd.f32 1e-05, %v3288_v37 }
 0xc50   : > { %v3266_v3 = vpop.xlane.xlu1 %3265  ;;  %v3256_v40 = vpop.xlane.xlu0 %3255 }
 0xc51   : > { %4423 = vrsqrt.f32 %v3301_v34  ;;  %v3291_v62 = vmul.f32 0.0078125, %v3266_v3  ;;  %v3286_v25 = vmul.f32 0.0078125, %v3256_v40 }
 0xc52   : > { %4425 = vrsqrt.f32 %v3304_v36 }
 0xc53   : > { %v3307_v19 = vadd.f32 1e-05, %v3291_v62  ;;  %v3302_v9 = vadd.f32 1e-05, %v3286_v25 }
 0xc54   : > { %v3262_v38 = vpop.xlane.xlu1 %3261  ;;  %v3268_v1 = vpop.xlane.xlu0 %3267 }
 0xc55   : > { %4427 = vrsqrt.f32 %v3307_v19  ;;  %v3289_v23 = vmul.f32 0.0078125, %v3262_v38  ;;  %v3292_v15 = vmul.f32 0.0078125, %v3268_v1 }
 0xc56   : > { %4429 = vrsqrt.f32 %v3302_v9 }
 0xc57   : > { %v3305_v41 = vadd.f32 1e-05, %v3289_v23  ;;  %v3308_v63 = vadd.f32 1e-05, %v3292_v15 }
 0xc58   : > { %v3274_v6 = vpop.xlane.xlu1 %3273  ;;  %v3264_v16 = vpop.xlane.xlu0 %3263 }
 0xc59   : > { %4431 = vrsqrt.f32 %v3305_v41  ;;  %v3295_v56 = vmul.f32 0.0078125, %v3274_v6  ;;  %v3290_v21 = vmul.f32 0.0078125, %v3264_v16 }
 0xc5a   : > { %v4422_v49 = vpop.eup %4421  ;;  %4433 = vrsqrt.f32 %v3308_v63 }
 0xc5b   : > { %v3335_v61 = vmul.f32 %v4422_v49, %v6189_v59  ;;  %v3311_v31 = vadd.f32 1e-05, %v3295_v56  ;;  %v3306_v53 = vadd.f32 1e-05, %v3290_v21 }
 0xc5c   : > { %v3270_v11 = vpop.xlane.xlu1 %3269  ;;  %v3276_v2 = vpop.xlane.xlu0 %3275 }
 0xc5d   : > { %v3357_v0 = vmul.f32 %v6759_v24, %v3335_v61  ;;  %4435 = vrsqrt.f32 %v3311_v31  ;;  %v3293_v32 = vmul.f32 0.0078125, %v3270_v11  ;;  %v3296_v7 = vmul.f32 0.0078125, %v3276_v2 }
 0xc5e   : > { %v4424_v5 = vpop.eup %4423  ;;  %4437 = vrsqrt.f32 %v3306_v53 }
 0xc5f   : > { %v4426_v58 = vpop.eup %4425  ;;  %v3379_v26 = vadd.f32 %v6760_v28, %v3357_v0  ;;  %v3333_v12 = vmul.f32 %v4424_v5, %v6194_v52  ;;  %v3309_v50 = vadd.f32 1e-05, %v3293_v32  ;;  %v3312_v29 = vadd.f32 1e-05, %v3296_v7 }
 0xc60   : > { %v3336_v59 = vmul.f32 %v4426_v58, %v6197_v20  ;;  %v3272_v37 = vpop.xlane.xlu0 %3271 }
 0xc61   : > { %3395 = vst [vmem:[#allocation2 + $0x58] sm:$0xff] %v3379_v26  ;;  %v3355_v34 = vmul.f32 %v6759_v24, %v3333_v12  ;;  %4439 = vrsqrt.f32 %v3309_v50  ;;  %v3294_v36 = vmul.f32 0.0078125, %v3272_v37 }
 0xc62   : > { %v4428_v3 = vpop.eup %4427  ;;  %v3358_v40 = vmul.f32 %v6759_v24, %v3336_v59  ;;  %4441 = vrsqrt.f32 %v3312_v29  ;;  %v3278_v62 = vpop.xlane.xlu1 %3277 }
 0xc63   : > { %v4430_v25 = vpop.eup %4429  ;;  %v3377_v19 = vadd.f32 %v6760_v28, %v3355_v34  ;;  %v3339_v52 = vmul.f32 %v4428_v3, %v6207_v45  ;;  %v3310_v9 = vadd.f32 1e-05, %v3294_v36  ;;  %v3297_v38 = vmul.f32 0.0078125, %v3278_v62 }
 0xc64   : > { %v3380_v20 = vadd.f32 %v6760_v28, %v3358_v40  ;;  %v3334_v1 = vmul.f32 %v4430_v25, %v6204_v35 }
 0xc65   : > { %3393 = vst [vmem:[#allocation2 + $0x30] sm:$0xff] %v3377_v19  ;;  %v3361_v23 = vmul.f32 %v6759_v24, %v3339_v52  ;;  %4443 = vrsqrt.f32 %v3310_v9  ;;  %v3313_v15 = vadd.f32 1e-05, %v3297_v38 }
 0xc66   : > { %v4432_v41 = vpop.eup %4431  ;;  %3396 = vst [vmem:[#allocation2 + $0x18] sm:$0xff] %v3380_v20  ;;  %v3356_v63 = vmul.f32 %v6759_v24, %v3334_v1  ;;  %v3282_v6 = vpop.xlane.xlu1 %3281 }
 0xc67   : > { %v3280_v16 = vpop.xlane.xlu0 %3279  ;;  %v4434_v56 = vpop.eup %4433  ;;  %v3383_v45 = vadd.f32 %v6760_v28, %v3361_v23  ;;  %v3337_v21 = vmul.f32 %v4432_v41, %v6214_v48  ;;  %4445 = vrsqrt.f32 %v3313_v15  ;;  %v3299_v49 = vmul.f32 0.0078125, %v3282_v6 }
 0xc68   : > { %v3378_v35 = vadd.f32 %v6760_v28, %v3356_v63  ;;  %v3340_v61 = vmul.f32 %v4434_v56, %v6217_v8  ;;  %v3298_v31 = vmul.f32 0.0078125, %v3280_v16 }
 0xc69   : > { %3399 = vst [vmem:[#allocation2 + $0x8] sm:$0xff] %v3383_v45  ;;  %v3359_v53 = vmul.f32 %v6759_v24, %v3337_v21  ;;  %v3315_v11 = vadd.f32 1e-05, %v3299_v49 }
 0xc6a   : > { %v4436_v2 = vpop.eup %4435  ;;  %3394 = vst [vmem:[#allocation2] sm:$0xff] %v3378_v35  ;;  %v3362_v0 = vmul.f32 %v6759_v24, %v3340_v61  ;;  %v3314_v32 = vadd.f32 1e-05, %v3298_v31  ;;  %v3411_v61 = vld [vmem:[#allocation2 + $0x58] sm:$0xff] (%p320_p7) }
 0xc6b   : > { %v3284_v7 = vpop.xlane.xlu0 %3283  ;;  %v4438_v5 = vpop.eup %4437  ;;  %v3381_v48 = vadd.f32 %v6760_v28, %v3359_v53  ;;  %v3343_v58 = vmul.f32 %v4436_v2, %v6227_v14  ;;  %4447 = vrsqrt.f32 %v3315_v11  ;;  %3427 = vst [vmem:[#allocation15 + $0x10] sm:$0xff] (%p320_p7), %v3411_v61 }
 0xc6c   : > { %v3300_v26 = vmul.f32 0.0078125, %v3284_v7  ;;  %v3384_v8 = vadd.f32 %v6760_v28, %v3362_v0  ;;  %v3338_v12 = vmul.f32 %v4438_v5, %v6224_v4  ;;  %4449 = vrsqrt.f32 %v3314_v32 }
 0xc6d   : > { %3397 = vst [vmem:[#allocation2 + $0x50] sm:$0xff] %v3381_v48  ;;  %v3365_v50 = vmul.f32 %v6759_v24, %v3343_v58 }
 0xc6e   : > { %v3316_v29 = vadd.f32 1e-05, %v3300_v26  ;;  %v4440_v59 = vpop.eup %4439  ;;  %3400 = vst [vmem:[#allocation2 + $0x48] sm:$0xff] %v3384_v8  ;;  %v3360_v37 = vmul.f32 %v6759_v24, %v3338_v12 }
 0xc6f   : > { %v4442_v34 = vpop.eup %4441  ;;  %v3387_v36 = vadd.f32 %v6760_v28, %v3365_v50  ;;  %v3341_v14 = vmul.f32 %v4440_v59, %v6234_v33 }
 0xc70   : > { %4451 = vrsqrt.f32 %v3316_v29  ;;  %v3382_v3 = vadd.f32 %v6760_v28, %v3360_v37  ;;  %v3344_v40 = vmul.f32 %v4442_v34, %v6237_v22  ;;  %v3415_v11 = vld [vmem:[#allocation2 + $0x8] sm:$0xff] (%p320_p7) }
 0xc71   : > { %3403 = vst [vmem:[#allocation2 + $0x10] sm:$0xff] %v3387_v36  ;;  %v3363_v4 = vmul.f32 %v6759_v24, %v3341_v14  ;;  %v3410_v35 = vld [vmem:[#allocation2] sm:$0xff] (%p320_p7)  ;;  %3431 = vst [vmem:[#allocation15 + $0x30] sm:$0xff] (%p320_p7), %v3415_v11 }
 0xc72   : > { %v4444_v62 = vpop.eup %4443  ;;  %3398 = vst [vmem:[#allocation2 + $0x68] sm:$0xff] %v3382_v3  ;;  %v3366_v25 = vmul.f32 %v6759_v24, %v3344_v40  ;;  %3426 = vst [vmem:[#allocation15 + $0x8] sm:$0xff] (%p320_p7), %v3410_v35 }
 0xc73   : > { %v3385_v19 = vadd.f32 %v6760_v28, %v3363_v4  ;;  %v3342_v52 = vmul.f32 %v4444_v62, %v6244_v10 }
 0xc74   : > { %v4446_v9 = vpop.eup %4445  ;;  %v3388_v38 = vadd.f32 %v6760_v28, %v3366_v25  ;;  %v3413_v31 = vld [vmem:[#allocation2 + $0x50] sm:$0xff] (%p320_p7) }
 0xc75   : > { %3401 = vst [vmem:[#allocation2 + $0x40] sm:$0xff] %v3385_v19  ;;  %v3364_v33 = vmul.f32 %v6759_v24, %v3342_v52  ;;  %v3345_v20 = vmul.f32 %v4446_v9, %v6247_v18  ;;  %3429 = vst [vmem:[#allocation15 + $0x20] sm:$0xff] (%p320_p7), %v3413_v31  ;;  %v3416_v2 = vld [vmem:[#allocation2 + $0x48] sm:$0xff] (%p320_p7) }
 0xc76   : > { %3404 = vst [vmem:[#allocation2 + $0x38] sm:$0xff] %v3388_v38  ;;  %3432 = vst [vmem:[#allocation15 + $0x38] sm:$0xff] (%p320_p7), %v3416_v2 }
 0xc77   : > { %v3386_v22 = vadd.f32 %v6760_v28, %v3364_v33  ;;  %v3367_v1 = vmul.f32 %v6759_v24, %v3345_v20 }
 0xc78   : > { %v4448_v23 = vpop.eup %4447  ;;  %v3419_v44 = vld [vmem:[#allocation2 + $0x10] sm:$0xff] (%p320_p7) }
 0xc79   : > { %v4450_v15 = vpop.eup %4449  ;;  %3402 = vst [vmem:[#allocation2 + $0x20] sm:$0xff] %v3386_v22  ;;  %v3389_v41 = vadd.f32 %v6760_v28, %v3367_v1  ;;  %v3347_v10 = vmul.f32 %v4448_v23, %v6254_v17  ;;  %v3414_v53 = vld [vmem:[#allocation2 + $0x68] sm:$0xff] (%p320_p7)  ;;  %3435 = vst [vmem:[#allocation15 + $0x50] sm:$0xff] (%p320_p7), %v3419_v44 }
 0xc7a   : > { %v3346_v63 = vmul.f32 %v4450_v15, %v6257_v60  ;;  %v3409_v60 = vld [vmem:[#allocation2 + $0x30] sm:$0xff] (%p320_p7)  ;;  %3430 = vst [vmem:[#allocation15 + $0x28] sm:$0xff] (%p320_p7), %v3414_v53 }
 0xc7b   : > { %3405 = vst [vmem:[#allocation2 + $0x60] sm:$0xff] %v3389_v41  ;;  %v3369_v6 = vmul.f32 %v6759_v24, %v3347_v10  ;;  %3425 = vst [vmem:[#allocation15] sm:$0xff] (%p320_p7), %v3409_v60 }
 0xc7c   : > { %v3368_v18 = vmul.f32 %v6759_v24, %v3346_v63  ;;  %v3417_v0 = vld [vmem:[#allocation2 + $0x40] sm:$0xff] (%p320_p7) }
 0xc7d   : > { %v4452_v16 = vpop.eup %4451  ;;  %v3391_v56 = vadd.f32 %v6760_v28, %v3369_v6  ;;  %3433 = vst [vmem:[#allocation15 + $0x40] sm:$0xff] (%p320_p7), %v3417_v0  ;;  %v3420_v54 = vld [vmem:[#allocation2 + $0x38] sm:$0xff] (%p320_p7) }
 0xc7e   : > { %v3348_v45 = vmul.f32 %v4452_v16, %v6264_v13  ;;  %v3390_v21 = vadd.f32 %v6760_v28, %v3368_v18  ;;  %v3412_v13 = vld [vmem:[#allocation2 + $0x18] sm:$0xff] (%p320_p7)  ;;  %3436 = vst [vmem:[#allocation15 + $0x58] sm:$0xff] (%p320_p7), %v3420_v54 }
 0xc7f   : > { %3407 = vst [vmem:[#allocation2 + $0x78] sm:$0xff] %v3391_v56  ;;  %3428 = vst [vmem:[#allocation15 + $0x18] sm:$0xff] (%p320_p7), %v3412_v13 }
 0xc80   : > { %v3370_v49 = vmul.f32 %v6759_v24, %v3348_v45  ;;  %3406 = vst [vmem:[#allocation2 + $0x70] sm:$0xff] %v3390_v21  ;;  %322 = sbr.rel (!%p320_p7) target bundleno = 138 (0x8a), region = 103  ;;  %v3418_v47 = vld [vmem:[#allocation2 + $0x20] sm:$0xff] (%p320_p7) }
 0xc81   :  { %3434 = vst [vmem:[#allocation15 + $0x48] sm:$0xff] (%p320_p7), %v3418_v47 }
 0xc82   : > { %v3392_v17 = vadd.f32 %v6760_v28, %v3370_v49  ;;  %v3421_v57 = vld [vmem:[#allocation2 + $0x60] sm:$0xff] (%p320_p7) }
 0xc83   :  { %3437 = vst [vmem:[#allocation15 + $0x60] sm:$0xff] (%p320_p7), %v3421_v57 }
 0xc84   : > { %3408 = vst [vmem:[#allocation2 + $0x28] sm:$0xff] %v3392_v17 }
 0xc86   :  { %v3423_v27 = vld [vmem:[#allocation2 + $0x78] sm:$0xff] }
 0xc87   :  { %v3422_v55 = vld [vmem:[#allocation2 + $0x70] sm:$0xff]  ;;  %3439 = vst [vmem:[#allocation15 + $0x70] sm:$0xff] %v3423_v27 }
 0xc88   :  { %3438 = vst [vmem:[#allocation15 + $0x68] sm:$0xff] %v3422_v55 }
 0xc8b   :  { %v3424_v42 = vld [vmem:[#allocation2 + $0x28] sm:$0xff] }
 0xc8c   :  { %3440 = vst [vmem:[#allocation15 + $0x78] sm:$0xff] %v3424_v42 }
 0xc8d   :  { %4620 = shalt.err (!%p4617_p12)
}
 0xc8e   :  { %3452 = dma.vmem_to_hbm [thread:$0]  %s3447_s28, 2048, %s6337_s12, [#allocation5], %s4649_s26, %s4649_s26, %s4650_s27  }
 0xc8f   :  { %4641 = dma.done.wait [#allocation5], 2048  }
 0xc90   :  { %4642 = vsyncadd [#allocation5], 4294965248 }
 0xc91   :  { %3456 = vsyncpa [#allocation4], 1 }
 0xc92   :  { %3457 = vsyncpa [#allocation7], 1 }
 0xc93   :  { %3458 = vsyncpa [#allocation10], 1 }
 0xc94   :  { %3459 = vsyncpa [#allocation13], 1 }
 0xc95   :  { %3460 = vsyncpa [#allocation5], 1 }

</bundles_post_ra>
